<compile_context>
chip_gen: v5e
topology: v5e:2x2
jax: 0.10.0
libtpu: 0.0.40
codegen_flags: <defaults>
</compile_context>

<pallas_src>
import functools

import jax
import jax.numpy as jnp
from jax.experimental import pallas as pl
from jax.experimental.pallas import tpu as pltpu


def _round_up(x: int, m: int) -> int:
    return ((x + m - 1) // m) * m


def _device_kind() -> str:
    try:
        return jax.devices()[0].device_kind.lower()
    except Exception:
        return ""


def _default_bf16_epilogue() -> bool:
    """bf16 VALU exists on v6e / v7x; older chips (v5e and earlier) are f32-only."""
    k = _device_kind()
    return ("v6" in k) or ("v7" in k) or ("tpu7" in k)


def _default_vmem_limit() -> int:
    k = _device_kind()
    if ("v7" in k) or ("tpu7" in k):
        return 24 << 20          # v7x has only 64 MiB VMEM/core; working set <10 MiB
    return 48 << 20              # v5e / v6e: 128 MiB physical


def _choose_tiling(B: int, tm_max: int = 1024):
    """Pick (tm, b_pad): batch-tile rows (multiple of 16) and padded batch."""
    b16 = _round_up(max(B, 1), 16)
    cands = [c for c in (1024, 512, 256, 128) if c <= max(tm_max, 128)]
    if b16 <= max(tm_max, 128):
        if b16 >= 256:
            # Two even tiles so a second TensorCore (v7x) has work; <=15 pad rows.
            half = _round_up((b16 + 1) // 2, 16)
            return half, 2 * half
        return b16, b16
    # Large batch: minimize pad waste, prefer bigger tiles (amortize per-step cost).
    best_tm, best_key = None, None
    for cand in cands:
        pad = _round_up(b16, cand) - b16
        key = (pad, -cand)
        if best_key is None or key < best_key:
            best_key, best_tm = key, cand
    return best_tm, _round_up(b16, best_tm)


# ---------------------------------------------------------------------------
# Kernel
# ---------------------------------------------------------------------------
def _mlp_kernel(x_ref,
                w1_ref, b1_ref,
                w2_ref, b2_ref,
                w3_ref, b3_ref,
                w4_ref, b4_ref,
                w5_ref, b5_ref,
                out_ref,
                *, log_softmax: bool, valid_out: int, bf16_epilogue: bool):
    """One batch tile: full 5-layer MLP + (log-)softmax, all in VMEM."""
    h = x_ref[...]  # bf16 (TM, in_pad)

    def matmul(a, w_ref):
        # bf16 MXU inputs, f32 accumulation.
        return jnp.dot(a.astype(jnp.bfloat16), w_ref[...],
                       preferred_element_type=jnp.float32)

    def hidden(a, w_ref, b_ref):
        acc = matmul(a, w_ref)
        if bf16_epilogue:
            # v6e / v7x: bias + ReLU in bf16 -> fewer VALU ops and the next
            # layer's LHS is already bf16 (half the VMEM load traffic).
            hb = acc.astype(jnp.bfloat16) + b_ref[...].astype(jnp.bfloat16)
            return jnp.maximum(hb, 0.0)
        # v5e: f32-only VPU/EUP; f32 epilogue hides under the MXU.
        return jnp.maximum(acc + b_ref[...], 0.0)

    h = hidden(h, w1_ref, b1_ref)
    h = hidden(h, w2_ref, b2_ref)
    h = hidden(h, w3_ref, b3_ref)
    h = hidden(h, w4_ref, b4_ref)
    logits = matmul(h, w5_ref) + b5_ref[...]          # (TM, out_pad) f32

    out_pad = logits.shape[-1]
    if valid_out != out_pad:
        # Mask padded lanes so they contribute zero probability.
        lane = jax.lax.broadcasted_iota(jnp.int32, logits.shape, dimension=1)
        logits = jnp.where(lane < valid_out, logits, -jnp.inf)

    # Numerically-stable softmax / log-softmax over the last (lane) axis, f32.
    m = jnp.max(logits, axis=-1, keepdims=True)
    shifted = logits - m
    e = jnp.exp(shifted)
    s = jnp.sum(e, axis=-1, keepdims=True)
    if log_softmax:
        out_ref[...] = (shifted - jnp.log(s)).astype(out_ref.dtype)
    else:
        # Exact division (NOT approx reciprocal) so rows sum to 1 to f32 precision.
        out_ref[...] = (e / s).astype(out_ref.dtype)


# ---------------------------------------------------------------------------
# Wrapper
# ---------------------------------------------------------------------------
def prepare_params(params):
    """One-time pad/cast of weights to kernel layout.

    Call once at model-load time; keeps the ~3 MB f32 -> 1.5 MB bf16 pad/cast
    out of every forward call.  Weights are (in, out) bf16, biases (1, out) f32.
    """
    in_dim = params["w1"].shape[0]
    out_dim = params["w5"].shape[1]
    in_pad = _round_up(in_dim, 128)
    out_pad = _round_up(out_dim, 128)

    def pad_w(w, rows, cols):
        return jnp.zeros((rows, cols), jnp.bfloat16).at[
            :w.shape[0], :w.shape[1]].set(w.astype(jnp.bfloat16))

    def pad_b(b, cols):
        return jnp.zeros((1, cols), jnp.float32).at[0, :b.shape[0]].set(
            b.astype(jnp.float32))

    prepped = {
        "in_dim": in_dim, "out_dim": out_dim,
        "in_pad": in_pad, "out_pad": out_pad,
        "w1": pad_w(params["w1"], in_pad, 512), "b1": pad_b(params["b1"], 512),
        "w2": pad_w(params["w2"], 512, 512),    "b2": pad_b(params["b2"], 512),
        "w3": pad_w(params["w3"], 512, 512),    "b3": pad_b(params["b3"], 512),
        "w4": pad_w(params["w4"], 512, 256),    "b4": pad_b(params["b4"], 256),
        "w5": pad_w(params["w5"], 256, out_pad), "b5": pad_b(params["b5"], out_pad),
    }
    # Materialize on device now so the per-call path does zero weight prep.
    for k, v in prepped.items():
        if not isinstance(v, int):
            prepped[k] = jax.block_until_ready(v)
    return prepped


def tiny_audio_net_forward(x, prepped, *, log_softmax=False, tm_max=1024,
                           bf16_epilogue=None, out_dtype=jnp.float32):
    """x: (B, inputsize) float.  prepped: output of prepare_params()."""
    if bf16_epilogue is None:
        bf16_epilogue = _default_bf16_epilogue()

    B, in_dim = x.shape
    assert in_dim == prepped["in_dim"], "input feature dim mismatch"
    in_pad, out_pad = prepped["in_pad"], prepped["out_pad"]
    out_dim = prepped["out_dim"]

    tm, b_pad = _choose_tiling(B, tm_max)
    grid = (b_pad // tm,)

    # Pre-cast activations to bf16 (halves input DMA); skip the pad copy when
    # shapes are already aligned.
    if B == b_pad and in_dim == in_pad:
        x_p = x.astype(jnp.bfloat16)
    else:
        x_p = jnp.zeros((b_pad, in_pad), jnp.bfloat16).at[:B, :in_dim].set(
            x.astype(jnp.bfloat16))

    kernel = functools.partial(_mlp_kernel, log_softmax=log_softmax,
                               valid_out=out_dim, bf16_epilogue=bf16_epilogue)

    # Weight/bias blocks are VMEM-resident across batch tiles (constant index_map).
    resident = lambda i: (0, 0)
    in_specs = [
        pl.BlockSpec((tm, in_pad), lambda i: (i, 0)),            # x tile (bf16)
        pl.BlockSpec((in_pad, 512), resident), pl.BlockSpec((1, 512), resident),
        pl.BlockSpec((512, 512), resident),    pl.BlockSpec((1, 512), resident),
        pl.BlockSpec((512, 512), resident),    pl.BlockSpec((1, 512), resident),
        pl.BlockSpec((512, 256), resident),    pl.BlockSpec((1, 256), resident),
        pl.BlockSpec((256, out_pad), resident), pl.BlockSpec((1, out_pad), resident),
    ]
    out_specs = pl.BlockSpec((tm, out_pad), lambda i: (i, 0))

    args = (x_p,
            prepped["w1"], prepped["b1"], prepped["w2"], prepped["b2"],
            prepped["w3"], prepped["b3"], prepped["w4"], prepped["b4"],
            prepped["w5"], prepped["b5"])

    flops = 2 * b_pad * (in_pad * 512 + 512 * 512 + 512 * 512
                         + 512 * 256 + 256 * out_pad)
    weight_bytes = 2 * (in_pad * 512 + 512 * 512 * 2 + 512 * 256 + 256 * out_pad) \
                   + 4 * (512 * 3 + 256 + out_pad)
    bytes_accessed = weight_bytes + 2 * b_pad * in_pad \
                     + jnp.dtype(out_dtype).itemsize * b_pad * out_pad
    cost = pl.CostEstimate(flops=flops,
                           transcendentals=b_pad * out_pad,
                           bytes_accessed=int(bytes_accessed))

    out = pl.pallas_call(
        kernel,
        out_shape=jax.ShapeDtypeStruct((b_pad, out_pad), out_dtype),
        grid_spec=pltpu.PrefetchScalarGridSpec(
            num_scalar_prefetch=0,
            grid=grid,
            in_specs=in_specs,
            out_specs=out_specs,
        ),
        compiler_params=pltpu.CompilerParams(
            dimension_semantics=("parallel",),     # megacore on v7x when grid >= 2
            vmem_limit_bytes=_default_vmem_limit(),
        ),
        cost_estimate=cost,
    )(*args)

    return out[:B, :out_dim]


# ---------------------------------------------------------------------------
# Params + references + test
# ---------------------------------------------------------------------------
def init_params(key, inputsize, outputsize):
    """Deterministic init mimicking nn.Linear's U(-1/sqrt(fan_in), +1/sqrt(fan_in)).

    Weights stored as (in, out) = transpose of nn.Linear.weight.
    """
    dims = [(inputsize, 512), (512, 512), (512, 512), (512, 256), (256, outputsize)]
    params = {}
    for i, (fan_in, fan_out) in enumerate(dims, start=1):
        key, kw, kb = jax.random.split(key, 3)
        bound = 1.0 / jnp.sqrt(jnp.float32(fan_in))
        params[f"w{i}"] = jax.random.uniform(
            kw, (fan_in, fan_out), jnp.float32, minval=-bound, maxval=bound)
        params[f"b{i}"] = jax.random.uniform(
            kb, (fan_out,), jnp.float32, minval=-bound, maxval=bound)
    return params


def _reference_forward_f32(x, params, *, log_softmax=False):
    """Pure f32 reference (mirrors the PyTorch module)."""
    h = x
    for i in range(1, 5):
        h = jnp.maximum(h @ params[f"w{i}"] + params[f"b{i}"], 0.0)
    logits = h @ params["w5"] + params["b5"]
    return (jax.nn.log_softmax(logits, axis=-1) if log_softmax
            else jax.nn.softmax(logits, axis=-1))


def _reference_forward_mixed(x, params, *, log_softmax=False, bf16_epilogue=False):
    """Pure-JAX reference mirroring the kernel's mixed precision exactly."""
    def mm(a, w):
        return jnp.dot(a.astype(jnp.bfloat16), w.astype(jnp.bfloat16),
                       preferred_element_type=jnp.float32)

    h = x.astype(jnp.bfloat16)
    for i in range(1, 5):
        acc = mm(h, params[f"w{i}"])
        b = params[f"b{i}"]
        if bf16_epilogue:
            h = jnp.maximum(acc.astype(jnp.bfloat16) + b.astype(jnp.bfloat16), 0.0)
        else:
            h = jnp.maximum(acc + b, 0.0)
    logits = mm(h, params["w5"]) + params["b5"]
    return (jax.nn.log_softmax(logits, axis=-1) if log_softmax
            else jax.nn.softmax(logits, axis=-1))


if __name__ == "__main__":
    INPUTSIZE = 128   # inputsize
    OUTPUTSIZE = 128  # outputsize
    BATCH = 8

    key = jax.random.PRNGKey(0)
    key, kx = jax.random.split(key)
    x = jax.random.normal(kx, (BATCH, INPUTSIZE), jnp.float32)
    params = init_params(key, INPUTSIZE, OUTPUTSIZE)

    bf16_epi = _default_bf16_epilogue()           # per-chip epilogue precision
    prepped = prepare_params(params)              # one-time weight pad/cast

    # eval branch: softmax
    out = tiny_audio_net_forward(x, prepped, log_softmax=False,
                                 bf16_epilogue=bf16_epi)
    out = jax.block_until_ready(out)

    ref_mixed = _reference_forward_mixed(x, params, log_softmax=False,
                                         bf16_epilogue=bf16_epi)
    ref_f32 = _reference_forward_f32(x, params, log_softmax=False)

    assert out.shape == (BATCH, OUTPUTSIZE)
    assert jnp.allclose(out, ref_mixed, atol=2e-3, rtol=2e-3), \
        "mismatch vs mixed-precision reference"
    assert jnp.allclose(out, ref_f32, atol=5e-2, rtol=5e-2), \
        "mismatch vs f32 reference"
    # Rows of a softmax sum to 1 (exact f32 division in-kernel).
    assert jnp.allclose(jnp.sum(out, axis=-1), jnp.ones((BATCH,)), atol=1e-4)

    # training / only_logsoftmax branch: log_softmax
    out_ls = tiny_audio_net_forward(x, prepped, log_softmax=True,
                                    bf16_epilogue=bf16_epi)
    out_ls = jax.block_until_ready(out_ls)
    ref_ls = _reference_forward_mixed(x, params, log_softmax=True,
                                      bf16_epilogue=bf16_epi)
    assert jnp.allclose(out_ls, ref_ls, atol=2e-3, rtol=2e-3), \
        "mismatch vs log-softmax reference"

    print("KERNEL_OK")
</pallas_src>

<mosaic_0001>
module attributes {stable_mosaic.version = 11 : i64} {
  func.func @_mlp_kernel(%arg0: i32, %arg1: memref<16x128xbf16, #tpu.memory_space<vmem>>, %arg2: memref<128x512xbf16, #tpu.memory_space<vmem>>, %arg3: memref<1x512xf32, #tpu.memory_space<vmem>>, %arg4: memref<512x512xbf16, #tpu.memory_space<vmem>>, %arg5: memref<1x512xf32, #tpu.memory_space<vmem>>, %arg6: memref<512x512xbf16, #tpu.memory_space<vmem>>, %arg7: memref<1x512xf32, #tpu.memory_space<vmem>>, %arg8: memref<512x256xbf16, #tpu.memory_space<vmem>>, %arg9: memref<1x256xf32, #tpu.memory_space<vmem>>, %arg10: memref<256x128xbf16, #tpu.memory_space<vmem>>, %arg11: memref<1x128xf32, #tpu.memory_space<vmem>>, %arg12: memref<16x128xf32, #tpu.memory_space<vmem>>) attributes {dimension_semantics = [#tpu.dimension_semantics<parallel>], iteration_bounds = array<i64: 1>, scalar_prefetch = 0 : i64, scratch_operands = 0 : i64, tpu.core_type = #tpu.core_type<tc>, window_params = [{transform_indices = @transform_0, window_bounds = array<i64: 16, 128>}, {pipeline_mode = #tpu.pipeline_mode<synchronous>, transform_indices = @transform_1, window_bounds = array<i64: 128, 512>}, {pipeline_mode = #tpu.pipeline_mode<synchronous>, transform_indices = @transform_2, window_bounds = array<i64: 1, 512>}, {pipeline_mode = #tpu.pipeline_mode<synchronous>, transform_indices = @transform_3, window_bounds = array<i64: 512, 512>}, {pipeline_mode = #tpu.pipeline_mode<synchronous>, transform_indices = @transform_4, window_bounds = array<i64: 1, 512>}, {pipeline_mode = #tpu.pipeline_mode<synchronous>, transform_indices = @transform_5, window_bounds = array<i64: 512, 512>}, {pipeline_mode = #tpu.pipeline_mode<synchronous>, transform_indices = @transform_6, window_bounds = array<i64: 1, 512>}, {pipeline_mode = #tpu.pipeline_mode<synchronous>, transform_indices = @transform_7, window_bounds = array<i64: 512, 256>}, {pipeline_mode = #tpu.pipeline_mode<synchronous>, transform_indices = @transform_8, window_bounds = array<i64: 1, 256>}, {pipeline_mode = #tpu.pipeline_mode<synchronous>, transform_indices = @transform_9, window_bounds = array<i64: 256, 128>}, {pipeline_mode = #tpu.pipeline_mode<synchronous>, transform_indices = @transform_10, window_bounds = array<i64: 1, 128>}, {transform_indices = @transform_11, window_bounds = array<i64: 16, 128>}]} {
    %c0 = arith.constant 0 : index
    %c0_0 = arith.constant 0 : index
    %0 = vector.load %arg1[%c0, %c0_0] : memref<16x128xbf16, #tpu.memory_space<vmem>>, vector<16x128xbf16>
    %c0_1 = arith.constant 0 : index
    %c0_2 = arith.constant 0 : index
    %1 = vector.load %arg2[%c0_1, %c0_2] : memref<128x512xbf16, #tpu.memory_space<vmem>>, vector<128x512xbf16>
    %cst = arith.constant dense<0.000000e+00> : vector<16x512xf32>
    %2 = tpu.matmul %0, %1, %cst {dimension_numbers = #tpu.dot_dimension_numbers<[1], [0], [0], [1], [0, 0, 1, 1], [], []>} : vector<16x128xbf16>, vector<128x512xbf16>, vector<16x512xf32> -> vector<16x512xf32>
    %c0_3 = arith.constant 0 : index
    %c0_4 = arith.constant 0 : index
    %3 = vector.load %arg3[%c0_3, %c0_4] : memref<1x512xf32, #tpu.memory_space<vmem>>, vector<1x512xf32>
    %4 = vector.broadcast %3 : vector<1x512xf32> to vector<16x512xf32>
    %5 = arith.addf %2, %4 : vector<16x512xf32>
    %cst_5 = arith.constant 0.000000e+00 : f32
    %6 = vector.broadcast %cst_5 : f32 to vector<16x512xf32>
    %7 = arith.maximumf %5, %6 : vector<16x512xf32>
    %8 = arith.truncf %7 : vector<16x512xf32> to vector<16x512xbf16>
    %c0_6 = arith.constant 0 : index
    %c0_7 = arith.constant 0 : index
    %9 = vector.load %arg4[%c0_6, %c0_7] : memref<512x512xbf16, #tpu.memory_space<vmem>>, vector<512x512xbf16>
    %cst_8 = arith.constant dense<0.000000e+00> : vector<16x512xf32>
    %10 = tpu.matmul %8, %9, %cst_8 {dimension_numbers = #tpu.dot_dimension_numbers<[1], [0], [0], [1], [0, 0, 1, 1], [], []>} : vector<16x512xbf16>, vector<512x512xbf16>, vector<16x512xf32> -> vector<16x512xf32>
    %c0_9 = arith.constant 0 : index
    %c0_10 = arith.constant 0 : index
    %11 = vector.load %arg5[%c0_9, %c0_10] : memref<1x512xf32, #tpu.memory_space<vmem>>, vector<1x512xf32>
    %12 = vector.broadcast %11 : vector<1x512xf32> to vector<16x512xf32>
    %13 = arith.addf %10, %12 : vector<16x512xf32>
    %cst_11 = arith.constant 0.000000e+00 : f32
    %14 = vector.broadcast %cst_11 : f32 to vector<16x512xf32>
    %15 = arith.maximumf %13, %14 : vector<16x512xf32>
    %16 = arith.truncf %15 : vector<16x512xf32> to vector<16x512xbf16>
    %c0_12 = arith.constant 0 : index
    %c0_13 = arith.constant 0 : index
    %17 = vector.load %arg6[%c0_12, %c0_13] : memref<512x512xbf16, #tpu.memory_space<vmem>>, vector<512x512xbf16>
    %cst_14 = arith.constant dense<0.000000e+00> : vector<16x512xf32>
    %18 = tpu.matmul %16, %17, %cst_14 {dimension_numbers = #tpu.dot_dimension_numbers<[1], [0], [0], [1], [0, 0, 1, 1], [], []>} : vector<16x512xbf16>, vector<512x512xbf16>, vector<16x512xf32> -> vector<16x512xf32>
    %c0_15 = arith.constant 0 : index
    %c0_16 = arith.constant 0 : index
    %19 = vector.load %arg7[%c0_15, %c0_16] : memref<1x512xf32, #tpu.memory_space<vmem>>, vector<1x512xf32>
    %20 = vector.broadcast %19 : vector<1x512xf32> to vector<16x512xf32>
    %21 = arith.addf %18, %20 : vector<16x512xf32>
    %cst_17 = arith.constant 0.000000e+00 : f32
    %22 = vector.broadcast %cst_17 : f32 to vector<16x512xf32>
    %23 = arith.maximumf %21, %22 : vector<16x512xf32>
    %24 = arith.truncf %23 : vector<16x512xf32> to vector<16x512xbf16>
    %c0_18 = arith.constant 0 : index
    %c0_19 = arith.constant 0 : index
    %25 = vector.load %arg8[%c0_18, %c0_19] : memref<512x256xbf16, #tpu.memory_space<vmem>>, vector<512x256xbf16>
    %cst_20 = arith.constant dense<0.000000e+00> : vector<16x256xf32>
    %26 = tpu.matmul %24, %25, %cst_20 {dimension_numbers = #tpu.dot_dimension_numbers<[1], [0], [0], [1], [0, 0, 1, 1], [], []>} : vector<16x512xbf16>, vector<512x256xbf16>, vector<16x256xf32> -> vector<16x256xf32>
    %c0_21 = arith.constant 0 : index
    %c0_22 = arith.constant 0 : index
    %27 = vector.load %arg9[%c0_21, %c0_22] : memref<1x256xf32, #tpu.memory_space<vmem>>, vector<1x256xf32>
    %28 = vector.broadcast %27 : vector<1x256xf32> to vector<16x256xf32>
    %29 = arith.addf %26, %28 : vector<16x256xf32>
    %cst_23 = arith.constant 0.000000e+00 : f32
    %30 = vector.broadcast %cst_23 : f32 to vector<16x256xf32>
    %31 = arith.maximumf %29, %30 : vector<16x256xf32>
    %32 = arith.truncf %31 : vector<16x256xf32> to vector<16x256xbf16>
    %c0_24 = arith.constant 0 : index
    %c0_25 = arith.constant 0 : index
    %33 = vector.load %arg10[%c0_24, %c0_25] : memref<256x128xbf16, #tpu.memory_space<vmem>>, vector<256x128xbf16>
    %cst_26 = arith.constant dense<0.000000e+00> : vector<16x128xf32>
    %34 = tpu.matmul %32, %33, %cst_26 {dimension_numbers = #tpu.dot_dimension_numbers<[1], [0], [0], [1], [0, 0, 1, 1], [], []>} : vector<16x256xbf16>, vector<256x128xbf16>, vector<16x128xf32> -> vector<16x128xf32>
    %c0_27 = arith.constant 0 : index
    %c0_28 = arith.constant 0 : index
    %35 = vector.load %arg11[%c0_27, %c0_28] : memref<1x128xf32, #tpu.memory_space<vmem>>, vector<1x128xf32>
    %36 = vector.broadcast %35 : vector<1x128xf32> to vector<16x128xf32>
    %37 = arith.addf %34, %36 : vector<16x128xf32>
    %cst_29 = arith.constant dense<0xFF800000> : vector<16xf32>
    %38 = vector.multi_reduction <maximumf>, %37, %cst_29 [1] : vector<16x128xf32> to vector<16xf32>
    %39 = vector.shape_cast %38 : vector<16xf32> to vector<16x1xf32>
    %40 = vector.broadcast %39 : vector<16x1xf32> to vector<16x128xf32>
    %41 = arith.subf %37, %40 : vector<16x128xf32>
    %42 = math.exp %41 : vector<16x128xf32>
    %cst_30 = arith.constant dense<0.000000e+00> : vector<16xf32>
    %43 = vector.multi_reduction <add>, %42, %cst_30 [1] : vector<16x128xf32> to vector<16xf32>
    %44 = vector.shape_cast %43 : vector<16xf32> to vector<16x1xf32>
    %45 = vector.broadcast %44 : vector<16x1xf32> to vector<16x128xf32>
    %46 = arith.divf %42, %45 : vector<16x128xf32>
    %c0_31 = arith.constant 0 : index
    %c0_32 = arith.constant 0 : index
    %47 = vector.load %arg12[%c0_31, %c0_32] : memref<16x128xf32, #tpu.memory_space<vmem>>, vector<16x128xf32>
    tpu.vector_store %arg12[%c0_31, %c0_32], %46 {strides = array<i32>} : memref<16x128xf32, #tpu.memory_space<vmem>>, vector<16x128xf32>,
    return
  }
  func.func @transform_0(%arg0: i32) -> (i32, i32) {
    %c0_i32 = arith.constant 0 : i32
    %c0_i32_0 = arith.constant 0 : i32
    return %arg0, %c0_i32 : i32, i32
  }
  func.func @transform_1(%arg0: i32) -> (i32, i32) {
    %c0_i32 = arith.constant 0 : i32
    %c0_i32_0 = arith.constant 0 : i32
    %c0_i32_1 = arith.constant 0 : i32
    return %c0_i32, %c0_i32_0 : i32, i32
  }
  func.func @transform_2(%arg0: i32) -> (i32, i32) {
    %c0_i32 = arith.constant 0 : i32
    %c0_i32_0 = arith.constant 0 : i32
    %c0_i32_1 = arith.constant 0 : i32
    return %c0_i32, %c0_i32_0 : i32, i32
  }
  func.func @transform_3(%arg0: i32) -> (i32, i32) {
    %c0_i32 = arith.constant 0 : i32
    %c0_i32_0 = arith.constant 0 : i32
    %c0_i32_1 = arith.constant 0 : i32
    return %c0_i32, %c0_i32_0 : i32, i32
  }
  func.func @transform_4(%arg0: i32) -> (i32, i32) {
    %c0_i32 = arith.constant 0 : i32
    %c0_i32_0 = arith.constant 0 : i32
    %c0_i32_1 = arith.constant 0 : i32
    return %c0_i32, %c0_i32_0 : i32, i32
  }
  func.func @transform_5(%arg0: i32) -> (i32, i32) {
    %c0_i32 = arith.constant 0 : i32
    %c0_i32_0 = arith.constant 0 : i32
    %c0_i32_1 = arith.constant 0 : i32
    return %c0_i32, %c0_i32_0 : i32, i32
  }
  func.func @transform_6(%arg0: i32) -> (i32, i32) {
    %c0_i32 = arith.constant 0 : i32
    %c0_i32_0 = arith.constant 0 : i32
    %c0_i32_1 = arith.constant 0 : i32
    return %c0_i32, %c0_i32_0 : i32, i32
  }
  func.func @transform_7(%arg0: i32) -> (i32, i32) {
    %c0_i32 = arith.constant 0 : i32
    %c0_i32_0 = arith.constant 0 : i32
    %c0_i32_1 = arith.constant 0 : i32
    return %c0_i32, %c0_i32_0 : i32, i32
  }
  func.func @transform_8(%arg0: i32) -> (i32, i32) {
    %c0_i32 = arith.constant 0 : i32
    %c0_i32_0 = arith.constant 0 : i32
    %c0_i32_1 = arith.constant 0 : i32
    return %c0_i32, %c0_i32_0 : i32, i32
  }
  func.func @transform_9(%arg0: i32) -> (i32, i32) {
    %c0_i32 = arith.constant 0 : i32
    %c0_i32_0 = arith.constant 0 : i32
    %c0_i32_1 = arith.constant 0 : i32
    return %c0_i32, %c0_i32_0 : i32, i32
  }
  func.func @transform_10(%arg0: i32) -> (i32, i32) {
    %c0_i32 = arith.constant 0 : i32
    %c0_i32_0 = arith.constant 0 : i32
    %c0_i32_1 = arith.constant 0 : i32
    return %c0_i32, %c0_i32_0 : i32, i32
  }
  func.func @transform_11(%arg0: i32) -> (i32, i32) {
    %c0_i32 = arith.constant 0 : i32
    %c0_i32_0 = arith.constant 0 : i32
    return %arg0, %c0_i32 : i32, i32
  }
}

</mosaic_0001>

<bundles_post_ra>
// kernel: tpu_custom_call.1
= control target key start
LH: loop header
LB: loop body
LE: loop exit
PB: predicated region body
PF: predicated region fallthrough
CT: control target
= control target key end

     0   :  { %16 = vsyncpa [#allocation3], 0  ;;  %s5495_s0 = inlined_call_operand.hbm [shape: bf16[16,128], index: 0, kind: input, shape index: {}]   ;;  %s5496_s1 = inlined_call_operand.hbm [shape: bf16[128,512], index: 1, kind: input, shape index: {}]   ;;  %s5497_s2 = inlined_call_operand.hbm [shape: f32[1,512], index: 2, kind: input, shape index: {}]   ;;  %s5498_s3 = inlined_call_operand.hbm [shape: bf16[512,512], index: 3, kind: input, shape index: {}]   ;;  %s5499_s4 = inlined_call_operand.hbm [shape: f32[1,512], index: 4, kind: input, shape index: {}]   ;;  %s5500_s5 = inlined_call_operand.hbm [shape: bf16[512,512], index: 5, kind: input, shape index: {}]   ;;  %s5501_s6 = inlined_call_operand.vmem [shape: f32[1,512], index: 6, kind: input, shape index: {}]   ;;  %s5502_s7 = inlined_call_operand.hbm [shape: bf16[512,256], index: 7, kind: input, shape index: {}]   ;;  %s5503_s8 = inlined_call_operand.vmem [shape: f32[1,256], index: 8, kind: input, shape index: {}]   ;;  %s5504_s9 = inlined_call_operand.hbm [shape: bf16[256,128], index: 9, kind: input, shape index: {}]   ;;  %s5505_s10 = inlined_call_operand.vmem [shape: f32[1,128], index: 10, kind: input, shape index: {}]   ;;  %s5506_s11 = inlined_call_operand.hbm [shape: f32[16,128], index: 11, kind: output, shape index: {}]  }
   0x1   :  { %17 = vsyncpa [#allocation6], 0 }
   0x2   :  { %18 = vsyncpa [#allocation9], 0 }
   0x3   :  { %19 = vsyncpa [#allocation12], 0 }
   0x4   :  { %20 = vsyncpa [#allocation15], 0  ;;  %s39_s19 = sshll.u32 %s5496_s1, 4  ;;  %s40_s19 = int_to_ptr.hbm [resolvable:$true] %s39_s19 }
   0x5   :  { %21 = vsyncpa [#allocation4], 0  ;;  %s5300_s20 = smov [#allocation5]   ;;  %s63_s24 = sshll.u32 %s5498_s3, 4  ;;  %s64_s24 = int_to_ptr.hbm [resolvable:$true] %s63_s24 }
   0x6   :  { %s41_s21 = sshll.u32 %s5300_s20, 4  ;;  %s5301_s25 = smov 256   ;;  %s42_s21 = int_to_ptr.vmem [resolvable:$true] %s41_s21 }
   0x7   :  { %s5302_s26 = smov 16   ;;  %s5303_s27 = smov [#allocation8]  }
   0x8   :  { %47 = dma.hbm_to_vmem [thread:$0]  %s40_s19, 4096, %s42_s21, [#allocation6], %s5301_s25, %s5301_s25, %s5302_s26  }
   0x9   :  { %s65_s28 = sshll.u32 %s5303_s27, 4  ;;  %s87_s12 = sshll.u32 %s5500_s5, 4  ;;  %s66_s28 = int_to_ptr.vmem [resolvable:$true] %s65_s28  ;;  %s88_s12 = int_to_ptr.hbm [resolvable:$true] %s87_s12 }
   0xa   :  { %71 = dma.hbm_to_vmem [thread:$0]  %s64_s24, 16384, %s66_s28, [#allocation9], %s5301_s25, %s5301_s25, %s5302_s26  }
   0xb   :  { %s26_s14 = sshll.u32 %s5495_s0, 4  ;;  %s5304_s15 = smov [#allocation11]   ;;  %s27_s14 = int_to_ptr.hbm [resolvable:$true] %s26_s14 }
   0xc   :  { %s89_s16 = sshll.u32 %s5304_s15, 4  ;;  %s5305_s3 = smov [#allocation2]   ;;  %s90_s16 = int_to_ptr.vmem [resolvable:$true] %s89_s16 }
   0xd   :  { %95 = dma.hbm_to_vmem [thread:$0]  %s88_s12, 16384, %s90_s16, [#allocation12], %s5301_s25, %s5301_s25, %s5302_s26  }
   0xe   :  { %s28_s17 = sshll.u32 %s5305_s3, 4  ;;  %s5306_s18 = smov 64   ;;  %s29_s17 = int_to_ptr.vmem [resolvable:$true] %s28_s17 }
   0xf   :  { %s5307_s19 = smov 4   ;;  %s53_s21 = sshll.u32 %s5497_s2, 4  ;;  %s54_s21 = int_to_ptr.hbm [resolvable:$true] %s53_s21 }
  0x10   :  { %34 = dma.hbm_to_vmem [thread:$0]  %s27_s14, 128, %s29_s17, [#allocation3], %s5306_s18, %s5306_s18, %s5307_s19  }
  0x11   :  { %s5308_s0 = smov [#allocation7]   ;;  %s77_s25 = sshll.u32 %s5499_s4, 4  ;;  %s78_s25 = int_to_ptr.hbm [resolvable:$true] %s77_s25 }
  0x12   :  { %s55_s22 = sshll.u32 %s5308_s0, 4  ;;  %s5309_s26 = smov [#allocation10]   ;;  %s56_s22 = int_to_ptr.vmem [resolvable:$true] %s55_s22 }
  0x13   :  { %58 = dma.hbm_to_vmem [thread:$0]  %s54_s21, 64, %s56_s22, [#allocation6]  }
  0x14   :  { %s79_s27 = sshll.u32 %s5309_s26, 4  ;;  %s102_s30 = sshll.u32 %s5502_s7, 4  ;;  %s80_s27 = int_to_ptr.vmem [resolvable:$true] %s79_s27  ;;  %s103_s30 = int_to_ptr.hbm [resolvable:$true] %s102_s30 }
  0x15   :  { %82 = dma.hbm_to_vmem [thread:$0]  %s78_s25, 64, %s80_s27, [#allocation9]  }
  0x16   :  { %s5310_s2 = smov [#allocation13]   ;;  %s117_s14 = sshll.u32 %s5504_s9, 4  ;;  %s118_s14 = int_to_ptr.hbm [resolvable:$true] %s117_s14 }
  0x17   :  { %s104_s12 = sshll.u32 %s5310_s2, 4  ;;  %s5311_s15 = smov 128   ;;  %s105_s12 = int_to_ptr.vmem [resolvable:$true] %s104_s12 }
  0x18   :  { %s5312_s4 = smov 8   ;;  %s5313_s16 = smov [#allocation14]  }
  0x19   :  { %110 = dma.hbm_to_vmem [thread:$0]  %s103_s30, 8192, %s105_s12, [#allocation12], %s5311_s15, %s5311_s15, %s5312_s4  }
  0x1a   :  { %s119_s3 = sshll.u32 %s5313_s16, 4  ;;  %s120_s3 = int_to_ptr.vmem [resolvable:$true] %s119_s3 }
  0x1b   :  { %125 = dma.hbm_to_vmem [thread:$0]  %s118_s14, 2048, %s120_s3, [#allocation15], %s5306_s18, %s5306_s18, %s5307_s19  }
  0x1c   :  { %5288 = dma.done.wait [#allocation3], 128  }
  0x1d   :  { %5289 = vsyncadd [#allocation3], 4294967168 }
  0x1e   :  { %5290 = dma.done.wait [#allocation6], 4160  }
  0x1f   :  { %5291 = vsyncadd [#allocation6], 4294963136 }
  0x20   :  { %5292 = dma.done.wait [#allocation9], 16448  }
  0x21   :  { %5293 = vsyncadd [#allocation9], 4294950848 }
  0x22   :  { %5294 = dma.done.wait [#allocation12], 24576  }
  0x23   :  { %5295 = vsyncadd [#allocation12], 4294942720 }
  0x24   :  { %5296 = dma.done.wait [#allocation15], 2048  }
  0x25   :  { %5297 = vsyncadd [#allocation15], 4294965248  ;;  %v3321_v0 = vld [vmem:[#allocation5 + $0xe0] sm:$0xf]  ;;  %v4710_v1 = vld [vmem:[#allocation5 + $0xec] sm:$0xf0] }
  0x26   :  { %v4708_v2 = vld [vmem:[#allocation5 + $0xe4] sm:$0xf]  ;;  %v3322_v3 = vor.u32 %v4710_v1, %v3321_v0  ;;  %v3323_v4 = vld [vmem:[#allocation5 + $0xf0] sm:$0xf0]  ;;  %v3329_v5 = vld [vmem:[#allocation5 + $0xe8] sm:$0xf] }
  0x27   :  { %v4711_v6 = vld [vmem:[#allocation5 + $0xf4] sm:$0xf0]  ;;  %v3326_v7 = vor.u32 %v4708_v2, %v3323_v4  ;;  %v4709_v9 = vld [vmem:[#allocation5 + $0xec] sm:$0xf]  ;;  %v3331_v10 = vld [vmem:[#allocation5 + $0xf8] sm:$0xf0] }
  0x28   :  { %v3330_v8 = vor.u32 %v4711_v6, %v3329_v5  ;;  %v3305_v11 = vld [vmem:[#allocation5 + $0xc0] sm:$0xf]  ;;  %370 = vmatpush.bf16.msra.mxu0 %v3322_v3  ;;  %v3334_v12 = vor.u32 %v4709_v9, %v3331_v10  ;;  %v4706_v13 = vld [vmem:[#allocation5 + $0xcc] sm:$0xf0]  ;;  %v4704_v14 = vld [vmem:[#allocation5 + $0xc4] sm:$0xf] }
  0x29   :  { %v3307_v15 = vld [vmem:[#allocation5 + $0xd0] sm:$0xf0]  ;;  %384 = vmatpush.bf16.msra.mxu1 %v3326_v7  ;;  %v3306_v16 = vor.u32 %v4706_v13, %v3305_v11  ;;  %v3313_v18 = vld [vmem:[#allocation5 + $0xc8] sm:$0xf]  ;;  %v4707_v19 = vld [vmem:[#allocation5 + $0xd4] sm:$0xf0] }
  0x2a   :  { %398 = vmatpush.bf16.msra.mxu2 %v3330_v8  ;;  %v3310_v17 = vor.u32 %v4704_v14, %v3307_v15  ;;  %v4705_v20 = vld [vmem:[#allocation5 + $0xcc] sm:$0xf]  ;;  %412 = vmatpush.bf16.msra.mxu3 %v3334_v12  ;;  %v3314_v21 = vor.u32 %v4707_v19, %v3313_v18  ;;  %v3315_v22 = vld [vmem:[#allocation5 + $0xd8] sm:$0xf0]  ;;  %v3289_v23 = vld [vmem:[#allocation5 + $0xa0] sm:$0xf] }
  0x2b   :  { %v4702_v24 = vld [vmem:[#allocation5 + $0xac] sm:$0xf0]  ;;  %v3318_v25 = vor.u32 %v4705_v20, %v3315_v22  ;;  %v4700_v26 = vld [vmem:[#allocation5 + $0xa4] sm:$0xf]  ;;  %v3291_v27 = vld [vmem:[#allocation5 + $0xb0] sm:$0xf0] }
  0x2c   :  { %v3297_v28 = vld [vmem:[#allocation5 + $0xa8] sm:$0xf]  ;;  %371 = vmatpush.bf16.msra.mxu0 %v3306_v16  ;;  %v3290_v29 = vor.u32 %v4702_v24, %v3289_v23  ;;  %v4703_v30 = vld [vmem:[#allocation5 + $0xb4] sm:$0xf0]  ;;  %v4701_v31 = vld [vmem:[#allocation5 + $0xac] sm:$0xf]  ;;  %v3294_v33 = vor.u32 %v4700_v26, %v3291_v27 }
  0x2d   :  { %v3299_v32 = vld [vmem:[#allocation5 + $0xb8] sm:$0xf0]  ;;  %385 = vmatpush.bf16.msra.mxu1 %v3310_v17  ;;  %v3298_v34 = vor.u32 %v4703_v30, %v3297_v28  ;;  %v3273_v35 = vld [vmem:[#allocation5 + $0x80] sm:$0xf]  ;;  %v4698_v36 = vld [vmem:[#allocation5 + $0x8c] sm:$0xf0] }
  0x2e   :  { %399 = vmatpush.bf16.msra.mxu2 %v3314_v21  ;;  %v4696_v37 = vld [vmem:[#allocation5 + $0x84] sm:$0xf]  ;;  %413 = vmatpush.bf16.msra.mxu3 %v3318_v25  ;;  %v3302_v38 = vor.u32 %v4701_v31, %v3299_v32  ;;  %v3275_v39 = vld [vmem:[#allocation5 + $0x90] sm:$0xf0]  ;;  %v3281_v40 = vld [vmem:[#allocation5 + $0x88] sm:$0xf]  ;;  %v3274_v44 = vor.u32 %v4698_v36, %v3273_v35 }
  0x2f   :  { %v4699_v41 = vld [vmem:[#allocation5 + $0x94] sm:$0xf0]  ;;  %v4697_v42 = vld [vmem:[#allocation5 + $0x8c] sm:$0xf]  ;;  %v3283_v43 = vld [vmem:[#allocation5 + $0x98] sm:$0xf0]  ;;  %v3278_v45 = vor.u32 %v4696_v37, %v3275_v39 }
  0x30   :  { %372 = vmatpush.bf16.msra.mxu0 %v3290_v29  ;;  %v3282_v46 = vor.u32 %v4699_v41, %v3281_v40  ;;  %v3257_v47 = vld [vmem:[#allocation5 + $0x60] sm:$0xf]  ;;  %v4694_v48 = vld [vmem:[#allocation5 + $0x6c] sm:$0xf0]  ;;  %v4692_v49 = vld [vmem:[#allocation5 + $0x64] sm:$0xf]  ;;  %v3286_v50 = vor.u32 %v4697_v42, %v3283_v43 }
  0x31   :  { %386 = vmatpush.bf16.msra.mxu1 %v3294_v33  ;;  %v3259_v51 = vld [vmem:[#allocation5 + $0x70] sm:$0xf0]  ;;  %v3265_v52 = vld [vmem:[#allocation5 + $0x68] sm:$0xf]  ;;  %v4695_v53 = vld [vmem:[#allocation5 + $0x74] sm:$0xf0]  ;;  %v3258_v56 = vor.u32 %v4694_v48, %v3257_v47 }
  0x32   :  { %400 = vmatpush.bf16.msra.mxu2 %v3298_v34  ;;  %414 = vmatpush.bf16.msra.mxu3 %v3302_v38  ;;  %v4693_v54 = vld [vmem:[#allocation5 + $0x6c] sm:$0xf]  ;;  %v3267_v55 = vld [vmem:[#allocation5 + $0x78] sm:$0xf0]  ;;  %v3262_v57 = vor.u32 %v4692_v49, %v3259_v51  ;;  %v3266_v58 = vor.u32 %v4695_v53, %v3265_v52  ;;  %v3241_v59 = vld [vmem:[#allocation5 + $0x40] sm:$0xf] }
  0x33   :  { %v4690_v60 = vld [vmem:[#allocation5 + $0x4c] sm:$0xf0]  ;;  %v4688_v61 = vld [vmem:[#allocation5 + $0x44] sm:$0xf]  ;;  %v3270_v62 = vor.u32 %v4693_v54, %v3267_v55  ;;  %v3243_v63 = vld [vmem:[#allocation5 + $0x50] sm:$0xf0] }
  0x34   :  { %373 = vmatpush.bf16.msra.mxu0 %v3274_v44  ;;  %v3249_v0 = vld [vmem:[#allocation5 + $0x48] sm:$0xf]  ;;  %v4691_v1 = vld [vmem:[#allocation5 + $0x54] sm:$0xf0]  ;;  %v4689_v2 = vld [vmem:[#allocation5 + $0x4c] sm:$0xf]  ;;  %v3242_v4 = vor.u32 %v4690_v60, %v3241_v59  ;;  %v3246_v5 = vor.u32 %v4688_v61, %v3243_v63 }
  0x35   :  { %387 = vmatpush.bf16.msra.mxu1 %v3278_v45  ;;  %v3251_v3 = vld [vmem:[#allocation5 + $0x58] sm:$0xf0]  ;;  %v3250_v6 = vor.u32 %v4691_v1, %v3249_v0  ;;  %v3225_v7 = vld [vmem:[#allocation5 + $0x20] sm:$0xf]  ;;  %v4686_v8 = vld [vmem:[#allocation5 + $0x2c] sm:$0xf0] }
  0x36   :  { %401 = vmatpush.bf16.msra.mxu2 %v3282_v46  ;;  %415 = vmatpush.bf16.msra.mxu3 %v3286_v50  ;;  %v4684_v9 = vld [vmem:[#allocation5 + $0x24] sm:$0xf]  ;;  %v3254_v10 = vor.u32 %v4689_v2, %v3251_v3  ;;  %v3227_v11 = vld [vmem:[#allocation5 + $0x30] sm:$0xf0]  ;;  %v3233_v12 = vld [vmem:[#allocation5 + $0x28] sm:$0xf]  ;;  %v3226_v16 = vor.u32 %v4686_v8, %v3225_v7 }
  0x37   :  { %v4687_v13 = vld [vmem:[#allocation5 + $0x34] sm:$0xf0]  ;;  %v4685_v14 = vld [vmem:[#allocation5 + $0x2c] sm:$0xf]  ;;  %v3235_v15 = vld [vmem:[#allocation5 + $0x38] sm:$0xf0]  ;;  %v3230_v18 = vor.u32 %v4684_v9, %v3227_v11 }
  0x38   :  { %374 = vmatpush.bf16.msra.mxu0 %v3258_v56  ;;  %v3209_v17 = vld [vmem:[#allocation5] sm:$0xf]  ;;  %v3234_v19 = vor.u32 %v4687_v13, %v3233_v12  ;;  %v4682_v20 = vld [vmem:[#allocation5 + $0xc] sm:$0xf0]  ;;  %v4680_v21 = vld [vmem:[#allocation5 + $0x4] sm:$0xf]  ;;  %v3238_v23 = vor.u32 %v4685_v14, %v3235_v15 }
  0x39   :  { %388 = vmatpush.bf16.msra.mxu1 %v3262_v57  ;;  %v3211_v22 = vld [vmem:[#allocation5 + $0x10] sm:$0xf0]  ;;  %v3217_v24 = vld [vmem:[#allocation5 + $0x8] sm:$0xf]  ;;  %v4683_v25 = vld [vmem:[#allocation5 + $0x14] sm:$0xf0]  ;;  %v3210_v30 = vor.u32 %v4682_v20, %v3209_v17 }
  0x3a   :  { %402 = vmatpush.bf16.msra.mxu2 %v3266_v58  ;;  %416 = vmatpush.bf16.msra.mxu3 %v3270_v62  ;;  %v4681_v26 = vld [vmem:[#allocation5 + $0xc] sm:$0xf]  ;;  %v3219_v27 = vld [vmem:[#allocation5 + $0x18] sm:$0xf0]  ;;  %v3449_v28 = vld [vmem:[#allocation8 + $0xe0] sm:$0xf]  ;;  %v3214_v33 = vor.u32 %v4680_v21, %v3211_v22  ;;  %v3218_v34 = vor.u32 %v4683_v25, %v3217_v24 }
  0x3b   :  { %v4742_v29 = vld [vmem:[#allocation8 + $0xec] sm:$0xf0]  ;;  %v3577_v31 = vld [vmem:[#allocation8 + $0x1e0] sm:$0xf]  ;;  %v4679_v35 = vld [vmem:[#allocation2] sm:$0xff]  ;;  %v3222_v36 = vor.u32 %v4681_v26, %v3219_v27  ;;  %s3186_s21 = sshll.u32 %s5506_s11, 4  ;;  %s3187_s21 = int_to_ptr.hbm [resolvable:$true] %s3186_s21 }
  0x3c   :  { %375 = vmatpush.bf16.msra.mxu0 %v3242_v4  ;;  %v4774_v32 = vld [vmem:[#allocation8 + $0x1ec] sm:$0xf0]  ;;  %v3450_v37 = vor.u32 %v4742_v29, %v3449_v28  ;;  %v3433_v38 = vld [vmem:[#allocation8 + $0xc0] sm:$0xf] }
  0x3d   :  { %389 = vmatpush.bf16.msra.mxu1 %v3246_v5  ;;  %v3705_v39 = vld [vmem:[#allocation8 + $0x2e0] sm:$0xf]  ;;  %v4806_v40 = vld [vmem:[#allocation8 + $0x2ec] sm:$0xf0]  ;;  %v3578_v41 = vor.u32 %v4774_v32, %v3577_v31 }
  0x3e   :  { %403 = vmatpush.bf16.msra.mxu2 %v3250_v6  ;;  %417 = vmatpush.bf16.msra.mxu3 %v3254_v10  ;;  %v4738_v42 = vld [vmem:[#allocation8 + $0xcc] sm:$0xf0]  ;;  %v3833_v43 = vld [vmem:[#allocation8 + $0x3e0] sm:$0xf]  ;;  %v3706_v47 = vor.u32 %v4806_v40, %v3705_v39 }
  0x3f   :  { %v4838_v44 = vld [vmem:[#allocation8 + $0x3ec] sm:$0xf0]  ;;  %v3561_v45 = vld [vmem:[#allocation8 + $0x1c0] sm:$0xf]  ;;  %v3434_v48 = vor.u32 %v4738_v42, %v3433_v38 }
  0x40   :  { %376 = vmatpush.bf16.msra.mxu0 %v3226_v16  ;;  %v4770_v46 = vld [vmem:[#allocation8 + $0x1cc] sm:$0xf0]  ;;  %v3834_v49 = vor.u32 %v4838_v44, %v3833_v43  ;;  %v3417_v50 = vld [vmem:[#allocation8 + $0xa0] sm:$0xf] }
  0x41   :  { %390 = vmatpush.bf16.msra.mxu1 %v3230_v18  ;;  %v3689_v51 = vld [vmem:[#allocation8 + $0x2c0] sm:$0xf]  ;;  %v4802_v52 = vld [vmem:[#allocation8 + $0x2cc] sm:$0xf0]  ;;  %v3562_v53 = vor.u32 %v4770_v46, %v3561_v45 }
  0x42   :  { %404 = vmatpush.bf16.msra.mxu2 %v3234_v19  ;;  %418 = vmatpush.bf16.msra.mxu3 %v3238_v23  ;;  %v4734_v54 = vld [vmem:[#allocation8 + $0xac] sm:$0xf0]  ;;  %v3817_v55 = vld [vmem:[#allocation8 + $0x3c0] sm:$0xf]  ;;  %v3690_v59 = vor.u32 %v4802_v52, %v3689_v51 }
  0x43   :  { %v4834_v56 = vld [vmem:[#allocation8 + $0x3cc] sm:$0xf0]  ;;  %v3545_v57 = vld [vmem:[#allocation8 + $0x1a0] sm:$0xf]  ;;  %v3418_v60 = vor.u32 %v4734_v54, %v3417_v50 }
  0x44   :  { %377 = vmatpush.bf16.msra.mxu0 %v3210_v30  ;;  %v4766_v58 = vld [vmem:[#allocation8 + $0x1ac] sm:$0xf0]  ;;  %v3818_v61 = vor.u32 %v4834_v56, %v3817_v55  ;;  %v3401_v62 = vld [vmem:[#allocation8 + $0x80] sm:$0xf]  ;;  %v4740_v55 = vld [vmem:[#allocation8 + $0xe4] sm:$0xf] }
  0x45   :  { %391 = vmatpush.bf16.msra.mxu1 %v3214_v33  ;;  %v3673_v63 = vld [vmem:[#allocation8 + $0x2a0] sm:$0xf]  ;;  %v4798_v0 = vld [vmem:[#allocation8 + $0x2ac] sm:$0xf0]  ;;  %v3546_v1 = vor.u32 %v4766_v58, %v3545_v57  ;;  %v3451_v56 = vld [vmem:[#allocation8 + $0xf0] sm:$0xf0] }
  0x46   :  { %405 = vmatpush.bf16.msra.mxu2 %v3218_v34  ;;  %419 = vmatpush.bf16.msra.mxu3 %v3222_v36  ;;  %v4730_v2 = vld [vmem:[#allocation8 + $0x8c] sm:$0xf0]  ;;  %v3801_v3 = vld [vmem:[#allocation8 + $0x3a0] sm:$0xf]  ;;  %v3674_v7 = vor.u32 %v4798_v0, %v3673_v63  ;;  %v4772_v57 = vld [vmem:[#allocation8 + $0x1e4] sm:$0xf] }
  0x47   :  { %378 = vmatmul.bf16.vlgmr.msra.gmra.mxu0 %v4679_v35  ;;  %v4830_v4 = vld [vmem:[#allocation8 + $0x3ac] sm:$0xf0]  ;;  %v3529_v5 = vld [vmem:[#allocation8 + $0x180] sm:$0xf]  ;;  %v3402_v8 = vor.u32 %v4730_v2, %v3401_v62  ;;  %v3579_v58 = vld [vmem:[#allocation8 + $0x1f0] sm:$0xf0] }
  0x48   :  { %1216 = vmatpush.bf16.msrb.mxu0 %v3450_v37  ;;  %392 = vmatmul.bf16.vlgmr.msra.gmra.mxu1 %v4679_v35  ;;  %v4762_v6 = vld [vmem:[#allocation8 + $0x18c] sm:$0xf0]  ;;  %v3802_v9 = vor.u32 %v4830_v4, %v3801_v3  ;;  %v3385_v10 = vld [vmem:[#allocation8 + $0x60] sm:$0xf]  ;;  %v4736_v62 = vld [vmem:[#allocation8 + $0xc4] sm:$0xf]  ;;  %v3454_v3 = vor.u32 %v4740_v55, %v3451_v56 }
  0x49   :  { %1230 = vmatpush.bf16.msrb.mxu1 %v3578_v41  ;;  %406 = vmatmul.bf16.vlgmr.msra.gmra.mxu2 %v4679_v35  ;;  %v3657_v11 = vld [vmem:[#allocation8 + $0x280] sm:$0xf]  ;;  %v4794_v12 = vld [vmem:[#allocation8 + $0x28c] sm:$0xf0]  ;;  %v3530_v13 = vor.u32 %v4762_v6, %v3529_v5  ;;  %v4804_v5 = vld [vmem:[#allocation8 + $0x2e4] sm:$0xf] }
  0x4a   :  { %420 = vmatmul.bf16.vlgmr.msra.gmra.mxu3 %v4679_v35  ;;  %1244 = vmatpush.bf16.msrb.mxu2 %v3706_v47  ;;  %v4726_v14 = vld [vmem:[#allocation8 + $0x6c] sm:$0xf0]  ;;  %v3785_v15 = vld [vmem:[#allocation8 + $0x380] sm:$0xf]  ;;  %v3658_v19 = vor.u32 %v4794_v12, %v3657_v11  ;;  %v3707_v6 = vld [vmem:[#allocation8 + $0x2f0] sm:$0xf0] }
  0x4b   :  { %1258 = vmatpush.bf16.msrb.mxu3 %v3834_v49  ;;  %v4826_v16 = vld [vmem:[#allocation8 + $0x38c] sm:$0xf0]  ;;  %v3513_v17 = vld [vmem:[#allocation8 + $0x160] sm:$0xf]  ;;  %v3386_v20 = vor.u32 %v4726_v14, %v3385_v10  ;;  %v3835_v10 = vld [vmem:[#allocation8 + $0x3f0] sm:$0xf0] }
  0x4c   :  { %1217 = vmatpush.bf16.msrb.mxu0 %v3434_v48  ;;  %v4758_v18 = vld [vmem:[#allocation8 + $0x16c] sm:$0xf0]  ;;  %v3786_v21 = vor.u32 %v4826_v16, %v3785_v15  ;;  %v3369_v22 = vld [vmem:[#allocation8 + $0x40] sm:$0xf]  ;;  %v4768_v11 = vld [vmem:[#allocation8 + $0x1c4] sm:$0xf]  ;;  %v3710_v15 = vor.u32 %v4804_v5, %v3707_v6 }
  0x4d   :  { %1231 = vmatpush.bf16.msrb.mxu1 %v3562_v53  ;;  %v3641_v23 = vld [vmem:[#allocation8 + $0x260] sm:$0xf]  ;;  %v4790_v24 = vld [vmem:[#allocation8 + $0x26c] sm:$0xf0]  ;;  %v3514_v25 = vor.u32 %v4758_v18, %v3513_v17  ;;  %v3563_v12 = vld [vmem:[#allocation8 + $0x1d0] sm:$0xf0] }
  0x4e   :  { %1245 = vmatpush.bf16.msrb.mxu2 %v3690_v59  ;;  %v4722_v26 = vld [vmem:[#allocation8 + $0x4c] sm:$0xf0]  ;;  %v3769_v27 = vld [vmem:[#allocation8 + $0x360] sm:$0xf]  ;;  %v3642_v31 = vor.u32 %v4790_v24, %v3641_v23  ;;  %v4732_v18 = vld [vmem:[#allocation8 + $0xa4] sm:$0xf] }
  0x4f   :  { %1259 = vmatpush.bf16.msrb.mxu3 %v3818_v61  ;;  %v4822_v28 = vld [vmem:[#allocation8 + $0x36c] sm:$0xf0]  ;;  %v3497_v29 = vld [vmem:[#allocation8 + $0x140] sm:$0xf]  ;;  %v3370_v32 = vor.u32 %v4722_v26, %v3369_v22  ;;  %v3419_v22 = vld [vmem:[#allocation8 + $0xb0] sm:$0xf0] }
  0x50   :  { %1218 = vmatpush.bf16.msrb.mxu0 %v3418_v60  ;;  %v4754_v30 = vld [vmem:[#allocation8 + $0x14c] sm:$0xf0]  ;;  %v3770_v33 = vor.u32 %v4822_v28, %v3769_v27  ;;  %v3353_v34 = vld [vmem:[#allocation8 + $0x20] sm:$0xf]  ;;  %v4832_v23 = vld [vmem:[#allocation8 + $0x3c4] sm:$0xf]  ;;  %v3422_v28 = vor.u32 %v4732_v18, %v3419_v22 }
  0x51   :  { %1232 = vmatpush.bf16.msrb.mxu1 %v3546_v1  ;;  %v3625_v35 = vld [vmem:[#allocation8 + $0x240] sm:$0xf]  ;;  %v4786_v36 = vld [vmem:[#allocation8 + $0x24c] sm:$0xf0]  ;;  %v3498_v37 = vor.u32 %v4754_v30, %v3497_v29  ;;  %v3819_v24 = vld [vmem:[#allocation8 + $0x3d0] sm:$0xf0] }
  0x52   :  { %1246 = vmatpush.bf16.msrb.mxu2 %v3674_v7  ;;  %v4718_v38 = vld [vmem:[#allocation8 + $0x2c] sm:$0xf0]  ;;  %v3753_v39 = vld [vmem:[#allocation8 + $0x340] sm:$0xf]  ;;  %v3626_v43 = vor.u32 %v4786_v36, %v3625_v35  ;;  %v3582_v7 = vor.u32 %v4772_v57, %v3579_v58  ;;  %v3547_v26 = vld [vmem:[#allocation8 + $0x1b0] sm:$0xf0]  ;;  %v3822_v29 = vor.u32 %v4832_v23, %v3819_v24 }
  0x53   :  { %1260 = vmatpush.bf16.msrb.mxu3 %v3802_v9  ;;  %v4818_v40 = vld [vmem:[#allocation8 + $0x34c] sm:$0xf0]  ;;  %v3481_v41 = vld [vmem:[#allocation8 + $0x120] sm:$0xf]  ;;  %v3354_v45 = vor.u32 %v4718_v38, %v3353_v34  ;;  %v4836_v9 = vld [vmem:[#allocation8 + $0x3e4] sm:$0xf] }
  0x54   :  { %1219 = vmatpush.bf16.msrb.mxu0 %v3402_v8  ;;  %v4750_v42 = vld [vmem:[#allocation8 + $0x12c] sm:$0xf0]  ;;  %v3337_v44 = vld [vmem:[#allocation8] sm:$0xf]  ;;  %v3754_v46 = vor.u32 %v4818_v40, %v3753_v39  ;;  %v3435_v8 = vld [vmem:[#allocation8 + $0xd0] sm:$0xf0]  ;;  %v3838_v17 = vor.u32 %v4836_v9, %v3835_v10 }
  0x55   :  { %1233 = vmatpush.bf16.msrb.mxu1 %v3530_v13  ;;  %v4714_v47 = vld [vmem:[#allocation8 + $0xc] sm:$0xf0]  ;;  %v3609_v48 = vld [vmem:[#allocation8 + $0x220] sm:$0xf]  ;;  %v3482_v50 = vor.u32 %v4750_v42, %v3481_v41  ;;  %v3438_v16 = vor.u32 %v4736_v62, %v3435_v8  ;;  %v3531_v34 = vld [vmem:[#allocation8 + $0x190] sm:$0xf0] }
  0x56   :  { %1247 = vmatpush.bf16.msrb.mxu2 %v3658_v19  ;;  %v4782_v49 = vld [vmem:[#allocation8 + $0x22c] sm:$0xf0]  ;;  %v3465_v51 = vld [vmem:[#allocation8 + $0x100] sm:$0xf]  ;;  %v3338_v60 = vor.u32 %v4714_v47, %v3337_v44  ;;  %v4800_v19 = vld [vmem:[#allocation8 + $0x2c4] sm:$0xf] }
  0x57   :  { %1261 = vmatpush.bf16.msrb.mxu3 %v3786_v21  ;;  %v3737_v52 = vld [vmem:[#allocation8 + $0x320] sm:$0xf]  ;;  %v4814_v53 = vld [vmem:[#allocation8 + $0x32c] sm:$0xf0]  ;;  %v3610_v59 = vor.u32 %v4782_v49, %v3609_v48  ;;  %v3566_v21 = vor.u32 %v4768_v11, %v3563_v12  ;;  %v3675_v38 = vld [vmem:[#allocation8 + $0x2b0] sm:$0xf0] }
  0x58   :  { %1220 = vmatpush.bf16.msrb.mxu0 %v3386_v20  ;;  %v4746_v54 = vld [vmem:[#allocation8 + $0x10c] sm:$0xf0]  ;;  %v3738_v61 = vor.u32 %v4814_v53, %v3737_v52  ;;  %v3593_v63 = vld [vmem:[#allocation8 + $0x200] sm:$0xf]  ;;  %v3691_v20 = vld [vmem:[#allocation8 + $0x2d0] sm:$0xf0] }
  0x59   :  { %1234 = vmatpush.bf16.msrb.mxu1 %v3514_v25  ;;  %v4778_v0 = vld [vmem:[#allocation8 + $0x20c] sm:$0xf0]  ;;  %v3721_v1 = vld [vmem:[#allocation8 + $0x300] sm:$0xf]  ;;  %v3466_v2 = vor.u32 %v4746_v54, %v3465_v51  ;;  %v4764_v25 = vld [vmem:[#allocation8 + $0x1a4] sm:$0xf]  ;;  %v3694_v27 = vor.u32 %v4800_v19, %v3691_v20 }
  0x5a   :  { %1248 = vmatpush.bf16.msrb.mxu2 %v3642_v31  ;;  %v4810_v4 = vld [vmem:[#allocation8 + $0x30c] sm:$0xf0]  ;;  %v3594_v13 = vor.u32 %v4778_v0, %v3593_v63  ;;  %v3550_v30 = vor.u32 %v4764_v25, %v3547_v26  ;;  %v4728_v31 = vld [vmem:[#allocation8 + $0x84] sm:$0xf]  ;;  %v3803_v41 = vld [vmem:[#allocation8 + $0x3b0] sm:$0xf0] }
  0x5b   :  { %1262 = vmatpush.bf16.msrb.mxu3 %v3770_v33  ;;  %v3722_v14 = vor.u32 %v4810_v4, %v3721_v1  ;;  %v4760_v33 = vld [vmem:[#allocation8 + $0x184] sm:$0xf]  ;;  %v3387_v44 = vld [vmem:[#allocation8 + $0x70] sm:$0xf0] }
  0x5c   :  { %1221 = vmatpush.bf16.msrb.mxu0 %v3370_v32  ;;  %v3403_v32 = vld [vmem:[#allocation8 + $0x90] sm:$0xf0]  ;;  %v3534_v36 = vor.u32 %v4760_v33, %v3531_v34  ;;  %v4828_v39 = vld [vmem:[#allocation8 + $0x3a4] sm:$0xf]  ;;  %v194_v33 = vld [vmem:[#allocation7] sm:$0xf] }
  0x5d   :  { %1235 = vmatpush.bf16.msrb.mxu1 %v3498_v37  ;;  %v3406_v35 = vor.u32 %v4728_v31, %v3403_v32  ;;  %v4796_v37 = vld [vmem:[#allocation8 + $0x2a4] sm:$0xf]  ;;  %v3806_v42 = vor.u32 %v4828_v39, %v3803_v41  ;;  %v3515_v47 = vld [vmem:[#allocation8 + $0x170] sm:$0xf0] }
  0x5e   :  { %1249 = vmatpush.bf16.msrb.mxu2 %v3626_v43  ;;  %v3678_v40 = vor.u32 %v4796_v37, %v3675_v38  ;;  %v4724_v43 = vld [vmem:[#allocation8 + $0x64] sm:$0xf]  ;;  %v3787_v53 = vld [vmem:[#allocation8 + $0x390] sm:$0xf0]  ;;  %v197_v37 = vperm.slane %v194_v33, 1 }
  0x5f   :  { %1263 = vmatpush.bf16.msrb.mxu3 %v3754_v46  ;;  %v3390_v46 = vor.u32 %v4724_v43, %v3387_v44  ;;  %v4792_v49 = vld [vmem:[#allocation8 + $0x284] sm:$0xf]  ;;  %v3371_v56 = vld [vmem:[#allocation8 + $0x50] sm:$0xf0] }
  0x60   :  { %1222 = vmatpush.bf16.msrb.mxu0 %v3354_v45  ;;  %v4756_v45 = vld [vmem:[#allocation8 + $0x164] sm:$0xf]  ;;  %v3643_v62 = vld [vmem:[#allocation8 + $0x270] sm:$0xf0] }
  0x61   :  { %1236 = vmatpush.bf16.msrb.mxu1 %v3482_v50  ;;  %v3518_v48 = vor.u32 %v4756_v45, %v3515_v47  ;;  %v3659_v50 = vld [vmem:[#allocation8 + $0x290] sm:$0xf0]  ;;  %v4824_v52 = vld [vmem:[#allocation8 + $0x384] sm:$0xf]  ;;  %v4743_v47 = vld [vmem:[#allocation8 + $0xf4] sm:$0xf0] }
  0x62   :  { %1250 = vmatpush.bf16.msrb.mxu2 %v3610_v59  ;;  %v3662_v51 = vor.u32 %v4792_v49, %v3659_v50  ;;  %v3790_v54 = vor.u32 %v4824_v52, %v3787_v53  ;;  %v4720_v55 = vld [vmem:[#allocation8 + $0x44] sm:$0xf]  ;;  %v3499_v59 = vld [vmem:[#allocation8 + $0x150] sm:$0xf0]  ;;  %v198_v49 = vperm.slane %v194_v33, 2  ;;  %v199_v53 = vperm.slane %v194_v33, 3 }
  0x63   :  { %1264 = vmatpush.bf16.msrb.mxu3 %v3738_v61  ;;  %v4752_v57 = vld [vmem:[#allocation8 + $0x144] sm:$0xf]  ;;  %v3374_v58 = vor.u32 %v4720_v55, %v3371_v56  ;;  %v3771_v1 = vld [vmem:[#allocation8 + $0x370] sm:$0xf0]  ;;  %v4775_v52 = vld [vmem:[#allocation8 + $0x1f4] sm:$0xf0] }
  0x64   :  { %1223 = vmatpush.bf16.msrb.mxu0 %v3338_v60  ;;  %v3502_v60 = vor.u32 %v4752_v57, %v3499_v59  ;;  %v4788_v61 = vld [vmem:[#allocation8 + $0x264] sm:$0xf]  ;;  %v3355_v4 = vld [vmem:[#allocation8 + $0x30] sm:$0xf0]  ;;  %v3441_v59 = vld [vmem:[#allocation8 + $0xc8] sm:$0xf] }
  0x65   :  { %1237 = vmatpush.bf16.msrb.mxu1 %v3466_v2  ;;  %v4820_v63 = vld [vmem:[#allocation8 + $0x364] sm:$0xf]  ;;  %v3646_v0 = vor.u32 %v4788_v61, %v3643_v62  ;;  %v3627_v10 = vld [vmem:[#allocation8 + $0x250] sm:$0xf0] }
  0x66   :  { %1251 = vmatpush.bf16.msrb.mxu2 %v3594_v13  ;;  %v3774_v2 = vor.u32 %v4820_v63, %v3771_v1  ;;  %v4748_v6 = vld [vmem:[#allocation8 + $0x124] sm:$0xf]  ;;  %v3755_v13 = vld [vmem:[#allocation8 + $0x350] sm:$0xf0]  ;;  %v3569_v63 = vld [vmem:[#allocation8 + $0x1c8] sm:$0xf] }
  0x67   :  { %1265 = vmatpush.bf16.msrb.mxu3 %v3722_v14  ;;  %v4784_v9 = vld [vmem:[#allocation8 + $0x244] sm:$0xf]  ;;  %v3467_v19 = vld [vmem:[#allocation8 + $0x110] sm:$0xf0] }
  0x68   :  { %1272 = vmatpush.bf16.msra.mxu0 %v3454_v3  ;;  %v4716_v3 = vld [vmem:[#allocation8 + $0x24] sm:$0xf]  ;;  %v3630_v12 = vor.u32 %v4784_v9, %v3627_v10  ;;  %v3611_v22 = vld [vmem:[#allocation8 + $0x230] sm:$0xf0] }
  0x69   :  { %1286 = vmatpush.bf16.msra.mxu1 %v3582_v7  ;;  %v3358_v5 = vor.u32 %v4716_v3, %v3355_v4  ;;  %v3483_v7 = vld [vmem:[#allocation8 + $0x130] sm:$0xf0]  ;;  %v4816_v11 = vld [vmem:[#allocation8 + $0x344] sm:$0xf] }
  0x6a   :  { %1300 = vmatpush.bf16.msra.mxu2 %v3710_v15  ;;  %v3486_v8 = vor.u32 %v4748_v6, %v3483_v7  ;;  %v3758_v14 = vor.u32 %v4816_v11, %v3755_v13  ;;  %v4712_v15 = vld [vmem:[#allocation8 + $0x4] sm:$0xf]  ;;  %v3739_v24 = vld [vmem:[#allocation8 + $0x330] sm:$0xf0]  ;;  %v3713_v6 = vld [vmem:[#allocation8 + $0x2e8] sm:$0xf] }
  0x6b   :  { %1314 = vmatpush.bf16.msra.mxu3 %v3838_v17  ;;  %v4744_v17 = vld [vmem:[#allocation8 + $0x104] sm:$0xf]  ;;  %v3723_v31 = vld [vmem:[#allocation8 + $0x310] sm:$0xf0]  ;;  %v4807_v7 = vld [vmem:[#allocation8 + $0x2f4] sm:$0xf0] }
  0x6c   :  { %1273 = vmatpush.bf16.msra.mxu0 %v3438_v16  ;;  %v3339_v16 = vld [vmem:[#allocation8 + $0x10] sm:$0xf0]  ;;  %v3470_v20 = vor.u32 %v4744_v17, %v3467_v19  ;;  %v4812_v23 = vld [vmem:[#allocation8 + $0x324] sm:$0xf]  ;;  %v4839_v11 = vld [vmem:[#allocation8 + $0x3f4] sm:$0xf0] }
  0x6d   :  { %1287 = vmatpush.bf16.msra.mxu1 %v3566_v21  ;;  %v3342_v18 = vor.u32 %v4712_v15, %v3339_v16  ;;  %v4780_v21 = vld [vmem:[#allocation8 + $0x224] sm:$0xf]  ;;  %v3742_v26 = vor.u32 %v4812_v23, %v3739_v24  ;;  %v4735_v13 = vld [vmem:[#allocation8 + $0xb4] sm:$0xf0]  ;;  %v3553_v16 = vld [vmem:[#allocation8 + $0x1a8] sm:$0xf] }
  0x6e   :  { %1301 = vmatpush.bf16.msra.mxu2 %v3694_v27  ;;  %v3614_v25 = vor.u32 %v4780_v21, %v3611_v22  ;;  %v4776_v27 = vld [vmem:[#allocation8 + $0x204] sm:$0xf]  ;;  %v4767_v17 = vld [vmem:[#allocation8 + $0x1b4] sm:$0xf0]  ;;  %v3697_v24 = vld [vmem:[#allocation8 + $0x2c8] sm:$0xf] }
  0x6f   :  { %1315 = vmatpush.bf16.msra.mxu3 %v3822_v29 }
  0x70   :  { %1274 = vmatpush.bf16.msra.mxu0 %v3422_v28  ;;  %v3595_v28 = vld [vmem:[#allocation8 + $0x210] sm:$0xf0] }
  0x71   :  { %1288 = vmatpush.bf16.msra.mxu1 %v3550_v30  ;;  %v3598_v29 = vor.u32 %v4776_v27, %v3595_v28  ;;  %v4808_v30 = vld [vmem:[#allocation8 + $0x304] sm:$0xf]  ;;  %v3554_v28 = vor.u32 %v4767_v17, %v3553_v16  ;;  %v3345_v16 = vld [vmem:[#allocation8 + $0x8] sm:$0xf]  ;;  %v4715_v17 = vld [vmem:[#allocation8 + $0x14] sm:$0xf0] }
  0x72   :  { %1302 = vmatpush.bf16.msra.mxu2 %v3678_v40  ;;  %v3726_v32 = vor.u32 %v4808_v30, %v3723_v31  ;;  %v3409_v30 = vld [vmem:[#allocation8 + $0x88] sm:$0xf]  ;;  %v4731_v31 = vld [vmem:[#allocation8 + $0x94] sm:$0xf0] }
  0x73   :  { %1316 = vmatpush.bf16.msra.mxu3 %v3806_v42 }
  0x74   :  { %1275 = vmatpush.bf16.msra.mxu0 %v3406_v35  ;;  %v196_v35 = vperm.slane %v194_v33, 0  ;;  %v4763_v33 = vld [vmem:[#allocation8 + $0x194] sm:$0xf0] }
  0x75   :  { %1289 = vmatpush.bf16.msra.mxu1 %v3534_v36 }
  0x76   :  { %1303 = vmatpush.bf16.msra.mxu2 %v3662_v51  ;;  %v3585_v51 = vld [vmem:[#allocation8 + $0x1e8] sm:$0xf] }
  0x77   :  { %1317 = vmatpush.bf16.msra.mxu3 %v3790_v54 }
  0x78   :  { %1276 = vmatpush.bf16.msra.mxu0 %v3390_v46  ;;  %v3457_v46 = vld [vmem:[#allocation8 + $0xe8] sm:$0xf] }
  0x79   :  { %1290 = vmatpush.bf16.msra.mxu1 %v3518_v48  ;;  %v3458_v56 = vor.u32 %v4743_v47, %v3457_v46 }
  0x7a   :  { %1304 = vmatpush.bf16.msra.mxu2 %v3646_v0  ;;  %v4771_v0 = vld [vmem:[#allocation8 + $0x1d4] sm:$0xf0] }
  0x7b   :  { %1318 = vmatpush.bf16.msra.mxu3 %v3774_v2  ;;  %v3570_v10 = vor.u32 %v4771_v0, %v3569_v63  ;;  %v4791_v63 = vld [vmem:[#allocation8 + $0x274] sm:$0xf0] }
  0x7c   :  { %1277 = vmatpush.bf16.msra.mxu0 %v3374_v58  ;;  %v3586_v58 = vor.u32 %v4775_v52, %v3585_v51  ;;  %v3793_v52 = vld [vmem:[#allocation8 + $0x388] sm:$0xf] }
  0x7d   :  { %1291 = vmatpush.bf16.msra.mxu1 %v3502_v60  ;;  %v4739_v60 = vld [vmem:[#allocation8 + $0xd4] sm:$0xf0] }
  0x7e   :  { %1305 = vmatpush.bf16.msra.mxu2 %v3630_v12  ;;  %v3425_v12 = vld [vmem:[#allocation8 + $0xa8] sm:$0xf] }
  0x7f   :  { %1319 = vmatpush.bf16.msra.mxu3 %v3758_v14  ;;  %v3426_v23 = vor.u32 %v4735_v13, %v3425_v12  ;;  %v3761_v12 = vld [vmem:[#allocation8 + $0x348] sm:$0xf] }
  0x80   :  { %1278 = vmatpush.bf16.msra.mxu0 %v3358_v5  ;;  %v3442_v5 = vor.u32 %v4739_v60, %v3441_v59 }
  0x81   :  { %1292 = vmatpush.bf16.msra.mxu1 %v3486_v8  ;;  %v3841_v8 = vld [vmem:[#allocation8 + $0x3e8] sm:$0xf] }
  0x82   :  { %1306 = vmatpush.bf16.msra.mxu2 %v3614_v25  ;;  %v3842_v22 = vor.u32 %v4839_v11, %v3841_v8  ;;  %v4803_v25 = vld [vmem:[#allocation8 + $0x2d4] sm:$0xf0] }
  0x83   :  { %1320 = vmatpush.bf16.msra.mxu3 %v3742_v26  ;;  %v3825_v26 = vld [vmem:[#allocation8 + $0x3c8] sm:$0xf]  ;;  %v4787_v11 = vld [vmem:[#allocation8 + $0x254] sm:$0xf0] }
  0x84   :  { %1279 = vmatpush.bf16.msra.mxu0 %v3342_v18 }
  0x85   :  { %1293 = vmatpush.bf16.msra.mxu1 %v3470_v20  ;;  %v3714_v20 = vor.u32 %v4807_v7, %v3713_v6  ;;  %v3489_v6 = vld [vmem:[#allocation8 + $0x128] sm:$0xf]  ;;  %v4751_v7 = vld [vmem:[#allocation8 + $0x134] sm:$0xf0] }
  0x86   :  { %1307 = vmatpush.bf16.msra.mxu2 %v3598_v29  ;;  %v4835_v29 = vld [vmem:[#allocation8 + $0x3d4] sm:$0xf0] }
  0x87   :  { %1321 = vmatpush.bf16.msra.mxu3 %v3726_v32  ;;  %v3537_v32 = vld [vmem:[#allocation8 + $0x188] sm:$0xf] }
  0xc4   :  { %v379_v34 = vpop.f32.mrf.mxu0 }
  0xc5   :  { %v393_v36 = vpop.f32.mrf.mxu1  ;;  %v380_v38 = vadd.f32 %v379_v34, %v196_v35  ;;  %v3698_v34 = vor.u32 %v4803_v25, %v3697_v24  ;;  %v4773_v24 = vld [vmem:[#allocation8 + $0x1ec] sm:$0xf]  ;;  %v3587_v25 = vld [vmem:[#allocation8 + $0x1f8] sm:$0xf0] }
  0xc6   :  { %v394_v39 = vadd.f32 %v393_v36, %v197_v37  ;;  %v3410_v36 = vor.u32 %v4731_v31, %v3409_v30  ;;  %v3346_v30 = vor.u32 %v4715_v17, %v3345_v16  ;;  %v4725_v16 = vld [vmem:[#allocation8 + $0x6c] sm:$0xf]  ;;  %v3395_v17 = vld [vmem:[#allocation8 + $0x78] sm:$0xf0] }
  0xc7   :  { %v426_v43 = vmax.f32 %v380_v38, 0.0  ;;  %v4799_v38 = vld [vmem:[#allocation8 + $0x2b4] sm:$0xf0] }
  0xc8   :  { %v427_v48 = vmax.f32 %v394_v39, 0.0  ;;  %v3538_v39 = vor.u32 %v4763_v33, %v3537_v32  ;;  %v3745_v32 = vld [vmem:[#allocation8 + $0x328] sm:$0xf]  ;;  %v4815_v33 = vld [vmem:[#allocation8 + $0x334] sm:$0xf0] }
  0xcc   :  { %v407_v40 = vpop.f32.mrf.mxu2  ;;  %v381_v42 = vpop.f32.mrf.mxu0 }
  0xcd   :  { %v421_v41 = vpop.f32.mrf.mxu3  ;;  %v382_v44 = vadd.f32 %v381_v42, %v196_v35  ;;  %v395_v45 = vpop.f32.mrf.mxu1  ;;  %v408_v61 = vadd.f32 %v407_v40, %v198_v49  ;;  %v3826_v35 = vor.u32 %v4835_v29, %v3825_v26  ;;  %v3809_v40 = vld [vmem:[#allocation8 + $0x3a8] sm:$0xf]  ;;  %v4783_v29 = vld [vmem:[#allocation8 + $0x234] sm:$0xf0] }
  0xce   :  { %v396_v50 = vadd.f32 %v395_v45, %v197_v37  ;;  %v422_v1 = vadd.f32 %v421_v41, %v199_v53  ;;  %v3681_v37 = vld [vmem:[#allocation8 + $0x2a8] sm:$0xf]  ;;  %v4831_v41 = vld [vmem:[#allocation8 + $0x3b4] sm:$0xf0] }
  0xcf   :  { %v430_v54 = vmax.f32 %v382_v44, 0.0  ;;  %v428_v14 = vmax.f32 %v408_v61, 0.0  ;;  %v3393_v42 = vld [vmem:[#allocation8 + $0x68] sm:$0xf]  ;;  %v4759_v45 = vld [vmem:[#allocation8 + $0x174] sm:$0xf0]  ;;  %v3682_v46 = vor.u32 %v4799_v38, %v3681_v37  ;;  %v3810_v47 = vor.u32 %v4831_v41, %v3809_v40 }
  0xd0   :  { %v431_v55 = vmax.f32 %v396_v50, 0.0  ;;  %v429_v18 = vmax.f32 %v422_v1, 0.0  ;;  %v3521_v44 = vld [vmem:[#allocation8 + $0x168] sm:$0xf]  ;;  %v3443_v38 = vld [vmem:[#allocation8 + $0xd8] sm:$0xf0]  ;;  %v3746_v41 = vor.u32 %v4815_v33, %v3745_v32 }
  0xd1   :  { %v5408_v57 = vpack.c.bf16 %v430_v54, %v426_v43  ;;  %v4727_v43 = vld [vmem:[#allocation8 + $0x74] sm:$0xf0]  ;;  %v3522_v51 = vor.u32 %v4759_v45, %v3521_v44  ;;  %v3377_v54 = vld [vmem:[#allocation8 + $0x48] sm:$0xf]  ;;  %v3571_v40 = vld [vmem:[#allocation8 + $0x1d8] sm:$0xf0] }
  0xd2   :  { %v5410_v62 = vpack.c.bf16 %v431_v55, %v427_v48  ;;  %v3665_v48 = vld [vmem:[#allocation8 + $0x288] sm:$0xf]  ;;  %v3394_v50 = vor.u32 %v4727_v43, %v3393_v42  ;;  %v4723_v55 = vld [vmem:[#allocation8 + $0x54] sm:$0xf0]  ;;  %v4753_v32 = vld [vmem:[#allocation8 + $0x14c] sm:$0xf] }
  0xd3   :  { %1224 = vmatmul.bf16.vlgmr.msrb.gmra.mxu0 %v5408_v57  ;;  %v3649_v61 = vld [vmem:[#allocation8 + $0x268] sm:$0xf]  ;;  %v3378_v0 = vor.u32 %v4723_v55, %v3377_v54  ;;  %v4779_v43 = vld [vmem:[#allocation8 + $0x214] sm:$0xf0]  ;;  %v3427_v54 = vld [vmem:[#allocation8 + $0xb8] sm:$0xf0] }
  0xd4   :  { %v409_v2 = vpop.f32.mrf.mxu2  ;;  %1238 = vmatmul.bf16.vlgmr.msrb.gmra.mxu1 %v5410_v62  ;;  %1328 = vmatpush.bf16.msrb.mxu0 %v3458_v56  ;;  %v3505_v56 = vld [vmem:[#allocation8 + $0x148] sm:$0xf]  ;;  %v3650_v8 = vor.u32 %v4791_v63, %v3649_v61  ;;  %v4811_v45 = vld [vmem:[#allocation8 + $0x314] sm:$0xf0]  ;;  %v4765_v55 = vld [vmem:[#allocation8 + $0x1ac] sm:$0xf] }
  0xd5   :  { %v410_v3 = vadd.f32 %v409_v2, %v198_v49  ;;  %v423_v4 = vpop.f32.mrf.mxu3  ;;  %1342 = vmatpush.bf16.msrb.mxu1 %v3586_v58  ;;  %v4795_v49 = vld [vmem:[#allocation8 + $0x294] sm:$0xf0]  ;;  %v3777_v2 = vld [vmem:[#allocation8 + $0x368] sm:$0xf]  ;;  %v4801_v61 = vld [vmem:[#allocation8 + $0x2cc] sm:$0xf] }
  0xd6   :  { %v424_v9 = vadd.f32 %v423_v4, %v199_v53  ;;  %v4827_v53 = vld [vmem:[#allocation8 + $0x394] sm:$0xf0]  ;;  %v3666_v59 = vor.u32 %v4795_v49, %v3665_v48  ;;  %v3361_v4 = vld [vmem:[#allocation8 + $0x28] sm:$0xf]  ;;  %v3699_v63 = vld [vmem:[#allocation8 + $0x2d8] sm:$0xf0] }
  0xd7   :  { %v432_v15 = vmax.f32 %v410_v3, 0.0  ;;  %v4755_v58 = vld [vmem:[#allocation8 + $0x154] sm:$0xf0]  ;;  %v3794_v60 = vor.u32 %v4827_v53, %v3793_v52  ;;  %v3601_v42 = vld [vmem:[#allocation8 + $0x208] sm:$0xf] }
  0xd8   :  { %v433_v19 = vmax.f32 %v424_v9, 0.0  ;;  %1329 = vmatpush.bf16.msrb.mxu0 %v3442_v5  ;;  %v3506_v1 = vor.u32 %v4755_v58, %v3505_v56  ;;  %v4823_v3 = vld [vmem:[#allocation8 + $0x374] sm:$0xf0]  ;;  %v3729_v44 = vld [vmem:[#allocation8 + $0x308] sm:$0xf]  ;;  %v3602_v53 = vor.u32 %v4779_v43, %v3601_v42 }
  0xd9   :  { %v5414_v21 = vpack.c.bf16 %v432_v15, %v428_v14  ;;  %1343 = vmatpush.bf16.msrb.mxu1 %v3570_v10  ;;  %v4719_v5 = vld [vmem:[#allocation8 + $0x34] sm:$0xf0]  ;;  %v3778_v9 = vor.u32 %v4823_v3, %v3777_v2  ;;  %v3633_v10 = vld [vmem:[#allocation8 + $0x248] sm:$0xf]  ;;  %v3490_v14 = vor.u32 %v4751_v7, %v3489_v6  ;;  %v4733_v52 = vld [vmem:[#allocation8 + $0xac] sm:$0xf]  ;;  %v3730_v58 = vor.u32 %v4811_v45, %v3729_v44 }
  0xda   :  { %v5416_v27 = vpack.c.bf16 %v433_v19, %v429_v18  ;;  %v3362_v13 = vor.u32 %v4719_v5, %v3361_v4  ;;  %v4819_v15 = vld [vmem:[#allocation8 + $0x354] sm:$0xf0]  ;;  %v3473_v18 = vld [vmem:[#allocation8 + $0x108] sm:$0xf]  ;;  %v3555_v56 = vld [vmem:[#allocation8 + $0x1b8] sm:$0xf0] }
  0xdb   :  { %1252 = vmatmul.bf16.vlgmr.msrb.gmra.mxu2 %v5414_v21  ;;  %v4747_v19 = vld [vmem:[#allocation8 + $0x114] sm:$0xf0]  ;;  %v3762_v26 = vor.u32 %v4819_v15, %v3761_v12  ;;  %v4833_v2 = vld [vmem:[#allocation8 + $0x3cc] sm:$0xf]  ;;  %v3827_v3 = vld [vmem:[#allocation8 + $0x3d8] sm:$0xf0] }
  0xdc   :  { %1266 = vmatmul.bf16.vlgmr.msrb.gmra.mxu3 %v5416_v27  ;;  %1356 = vmatpush.bf16.msrb.mxu2 %v3714_v20  ;;  %v4741_v20 = vld [vmem:[#allocation8 + $0xec] sm:$0xf]  ;;  %v3474_v31 = vor.u32 %v4747_v19, %v3473_v18  ;;  %v3411_v5 = vld [vmem:[#allocation8 + $0x98] sm:$0xf0] }
  0xdd   :  { %1370 = vmatpush.bf16.msrb.mxu3 %v3842_v22  ;;  %1330 = vmatpush.bf16.msrb.mxu0 %v3426_v23  ;;  %v3634_v22 = vor.u32 %v4787_v11, %v3633_v10  ;;  %v3459_v23 = vld [vmem:[#allocation8 + $0xf8] sm:$0xf0]  ;;  %v4729_v4 = vld [vmem:[#allocation8 + $0x8c] sm:$0xf] }
  0xde   :  { %1344 = vmatpush.bf16.msrb.mxu1 %v3554_v28  ;;  %v3617_v28 = vld [vmem:[#allocation8 + $0x228] sm:$0xf]  ;;  %v4761_v6 = vld [vmem:[#allocation8 + $0x18c] sm:$0xf]  ;;  %v3539_v7 = vld [vmem:[#allocation8 + $0x198] sm:$0xf0]  ;;  %v3414_v12 = vor.u32 %v4729_v4, %v3411_v5 }
  0xdf   :  { %v3618_v37 = vor.u32 %v4783_v29, %v3617_v28  ;;  %v4797_v10 = vld [vmem:[#allocation8 + $0x2ac] sm:$0xf]  ;;  %v3683_v11 = vld [vmem:[#allocation8 + $0x2b8] sm:$0xf0] }
  0xe0   :  { %1357 = vmatpush.bf16.msrb.mxu2 %v3698_v34  ;;  %v3462_v34 = vor.u32 %v4741_v20, %v3459_v23  ;;  %v3811_v15 = vld [vmem:[#allocation8 + $0x3b8] sm:$0xf0]  ;;  %v4757_v18 = vld [vmem:[#allocation8 + $0x16c] sm:$0xf]  ;;  %v3686_v20 = vor.u32 %v4797_v10, %v3683_v11 }
  0xe1   :  { %1371 = vmatpush.bf16.msrb.mxu3 %v3826_v35  ;;  %1331 = vmatpush.bf16.msrb.mxu0 %v3410_v36  ;;  %v3590_v35 = vor.u32 %v4773_v24, %v3587_v25  ;;  %v4737_v36 = vld [vmem:[#allocation8 + $0xcc] sm:$0xf]  ;;  %v3523_v19 = vld [vmem:[#allocation8 + $0x178] sm:$0xf0]  ;;  %v3398_v25 = vor.u32 %v4725_v16, %v3395_v17 }
  0xe2   :  { %1345 = vmatpush.bf16.msrb.mxu1 %v3538_v39  ;;  %v4769_v39 = vld [vmem:[#allocation8 + $0x1cc] sm:$0xf]  ;;  %v3446_v48 = vor.u32 %v4737_v36, %v3443_v38  ;;  %v3667_v24 = vld [vmem:[#allocation8 + $0x298] sm:$0xf0] }
  0xe3   :  { %1280 = vmatmul.bf16.vlgmr.msra.gmra.mxu0 %v5408_v57  ;;  %v3574_v49 = vor.u32 %v4769_v39, %v3571_v40  ;;  %v4793_v23 = vld [vmem:[#allocation8 + $0x28c] sm:$0xf]  ;;  %v3795_v29 = vld [vmem:[#allocation8 + $0x398] sm:$0xf0] }
  0xe4   :  { %1358 = vmatpush.bf16.msrb.mxu2 %v3682_v46  ;;  %1294 = vmatmul.bf16.vlgmr.msra.gmra.mxu1 %v5410_v62  ;;  %v4805_v46 = vld [vmem:[#allocation8 + $0x2ec] sm:$0xf]  ;;  %v3507_v33 = vld [vmem:[#allocation8 + $0x158] sm:$0xf0] }
  0xe5   :  { %1372 = vmatpush.bf16.msrb.mxu3 %v3810_v47  ;;  %1332 = vmatpush.bf16.msrb.mxu0 %v3394_v50  ;;  %v3715_v47 = vld [vmem:[#allocation8 + $0x2f8] sm:$0xf0]  ;;  %v4837_v50 = vld [vmem:[#allocation8 + $0x3ec] sm:$0xf]  ;;  %v3510_v39 = vor.u32 %v4753_v32, %v3507_v33  ;;  %v4858_v32 = vld [vmem:[#allocation11 + $0x8c] sm:$0xf0] }
  0xe6   :  { %1346 = vmatpush.bf16.msrb.mxu1 %v3522_v51  ;;  %v3843_v51 = vld [vmem:[#allocation8 + $0x3f8] sm:$0xf0]  ;;  %v4825_v28 = vld [vmem:[#allocation8 + $0x38c] sm:$0xf] }
  0xe7   :  { %v4789_v36 = vld [vmem:[#allocation8 + $0x26c] sm:$0xf]  ;;  %v3363_v43 = vld [vmem:[#allocation8 + $0x38] sm:$0xf0] }
  0xe8   :  { %1359 = vmatpush.bf16.msrb.mxu2 %v3666_v59  ;;  %v3718_v59 = vor.u32 %v4805_v46, %v3715_v47  ;;  %v4821_v40 = vld [vmem:[#allocation8 + $0x36c] sm:$0xf]  ;;  %v3491_v45 = vld [vmem:[#allocation8 + $0x138] sm:$0xf0] }
  0xe9   :  { %1373 = vmatpush.bf16.msrb.mxu3 %v3794_v60  ;;  %1333 = vmatpush.bf16.msrb.mxu0 %v3378_v0  ;;  %v3846_v60 = vor.u32 %v4837_v50, %v3843_v51  ;;  %v3430_v0 = vor.u32 %v4733_v52, %v3427_v54  ;;  %v4717_v42 = vld [vmem:[#allocation8 + $0x2c] sm:$0xf]  ;;  %v3603_v17 = vld [vmem:[#allocation8 + $0x218] sm:$0xf0] }
  0xea   :  { %1347 = vmatpush.bf16.msrb.mxu1 %v3506_v1  ;;  %v3558_v1 = vor.u32 %v4765_v55, %v3555_v56  ;;  %v4749_v44 = vld [vmem:[#allocation8 + $0x12c] sm:$0xf]  ;;  %v3366_v51 = vor.u32 %v4717_v42, %v3363_v43  ;;  %v3347_v55 = vld [vmem:[#allocation8 + $0x18] sm:$0xf0]  ;;  %v3865_v42 = vld [vmem:[#allocation11 + $0x20] sm:$0xf] }
  0xeb   :  { %1308 = vmatmul.bf16.vlgmr.msra.gmra.mxu2 %v5414_v21  ;;  %v4817_v50 = vld [vmem:[#allocation8 + $0x34c] sm:$0xf]  ;;  %v3494_v52 = vor.u32 %v4749_v44, %v3491_v45  ;;  %v4846_v43 = vld [vmem:[#allocation11 + $0x2c] sm:$0xf0] }
  0xec   :  { %1322 = vmatmul.bf16.vlgmr.msra.gmra.mxu3 %v5416_v27  ;;  %1360 = vmatpush.bf16.msrb.mxu2 %v3650_v8  ;;  %v3702_v8 = vor.u32 %v4801_v61, %v3699_v63  ;;  %v4713_v54 = vld [vmem:[#allocation8 + $0xc] sm:$0xf]  ;;  %v4870_v61 = vld [vmem:[#allocation11 + $0xec] sm:$0xf0]  ;;  %v4089_v63 = vld [vmem:[#allocation11 + $0x1e0] sm:$0xf]  ;;  %v3866_v44 = vor.u32 %v4846_v43, %v3865_v42 }
  0xed   :  { %1374 = vmatpush.bf16.msrb.mxu3 %v3778_v9  ;;  %1334 = vmatpush.bf16.msrb.mxu0 %v3362_v13  ;;  %v3830_v9 = vor.u32 %v4833_v2, %v3827_v3  ;;  %v3542_v13 = vor.u32 %v4761_v6, %v3539_v7  ;;  %v4745_v56 = vld [vmem:[#allocation8 + $0x10c] sm:$0xf]  ;;  %v3619_v3 = vld [vmem:[#allocation8 + $0x238] sm:$0xf0]  ;;  %v3350_v4 = vor.u32 %v4713_v54, %v3347_v55  ;;  %v4842_v45 = vld [vmem:[#allocation11 + $0xc] sm:$0xf0] }
  0xee   :  { %1348 = vmatpush.bf16.msrb.mxu1 %v3490_v14  ;;  %v4829_v14 = vld [vmem:[#allocation8 + $0x3ac] sm:$0xf]  ;;  %v3747_v7 = vld [vmem:[#allocation8 + $0x338] sm:$0xf0]  ;;  %v4864_v54 = vld [vmem:[#allocation11 + $0xc4] sm:$0xf] }
  0xef   :  { %v4781_v2 = vld [vmem:[#allocation8 + $0x22c] sm:$0xf]  ;;  %v3947_v55 = vld [vmem:[#allocation11 + $0xd0] sm:$0xf0] }
  0xf0   :  { %1361 = vmatpush.bf16.msrb.mxu2 %v3634_v22  ;;  %v3814_v22 = vor.u32 %v4829_v14, %v3811_v15  ;;  %v4813_v6 = vld [vmem:[#allocation8 + $0x32c] sm:$0xf]  ;;  %v3622_v11 = vor.u32 %v4781_v2, %v3619_v3  ;;  %v4898_v14 = vld [vmem:[#allocation11 + $0x1cc] sm:$0xf0]  ;;  %v4860_v2 = vld [vmem:[#allocation11 + $0xa4] sm:$0xf] }
  0xf1   :  { %1375 = vmatpush.bf16.msrb.mxu3 %v3762_v26  ;;  %1335 = vmatpush.bf16.msrb.mxu0 %v3346_v30  ;;  %v3526_v26 = vor.u32 %v4757_v18, %v3523_v19  ;;  %v4721_v30 = vld [vmem:[#allocation8 + $0x4c] sm:$0xf]  ;;  %v3750_v15 = vor.u32 %v4813_v6, %v3747_v7  ;;  %v3731_v19 = vld [vmem:[#allocation8 + $0x318] sm:$0xf0]  ;;  %v3931_v3 = vld [vmem:[#allocation11 + $0xb0] sm:$0xf0] }
  0xf2   :  { %1349 = vmatpush.bf16.msrb.mxu1 %v3474_v31  ;;  %v3379_v31 = vld [vmem:[#allocation8 + $0x58] sm:$0xf0]  ;;  %v4777_v16 = vld [vmem:[#allocation8 + $0x20c] sm:$0xf]  ;;  %v4878_v6 = vld [vmem:[#allocation11 + $0x12c] sm:$0xf0] }
  0xf3   :  { %v3382_v38 = vor.u32 %v4721_v30, %v3379_v31  ;;  %v4809_v18 = vld [vmem:[#allocation8 + $0x30c] sm:$0xf]  ;;  %v3913_v31 = vld [vmem:[#allocation11 + $0x80] sm:$0xf]  ;;  %v4059_v42 = vld [vmem:[#allocation11 + $0x1b0] sm:$0xf0] }
  0xf4   :  { %1362 = vmatpush.bf16.msrb.mxu2 %v3618_v37  ;;  %1336 = vmatmul.bf16.vlgmr.msrb.gmra.mxu0 %v5408_v57  ;;  %v3651_v37 = vld [vmem:[#allocation8 + $0x278] sm:$0xf0]  ;;  %v4185_v7 = vld [vmem:[#allocation11 + $0x2a0] sm:$0xf] }
  0xf5   :  { %1384 = vmatpush.bf16.msra.mxu0 %v3462_v34  ;;  %1376 = vmatpush.bf16.msrb.mxu3 %v3746_v41  ;;  %v3670_v34 = vor.u32 %v4793_v23, %v3667_v24  ;;  %v3779_v41 = vld [vmem:[#allocation8 + $0x378] sm:$0xf0]  ;;  %v3654_v46 = vor.u32 %v4789_v36, %v3651_v37  ;;  %v3606_v23 = vor.u32 %v4777_v16, %v3603_v17  ;;  %v3929_v24 = vld [vmem:[#allocation11 + $0xa0] sm:$0xf]  ;;  %v4854_v37 = vld [vmem:[#allocation11 + $0x6c] sm:$0xf0] }
  0xf6   :  { %1398 = vmatpush.bf16.msra.mxu1 %v3590_v35  ;;  %v3798_v35 = vor.u32 %v4825_v28, %v3795_v29  ;;  %v3782_v47 = vor.u32 %v4821_v40, %v3779_v41  ;;  %v4057_v28 = vld [vmem:[#allocation11 + $0x1a0] sm:$0xf]  ;;  %v4894_v29 = vld [vmem:[#allocation11 + $0x1ac] sm:$0xf0]  ;;  %v3914_v36 = vor.u32 %v4858_v32, %v3913_v31  ;;  %v4848_v31 = vld [vmem:[#allocation11 + $0x44] sm:$0xf] }
  0xf7   :  { %1350 = vmatmul.bf16.vlgmr.msrb.gmra.mxu1 %v5410_v62  ;;  %v4058_v33 = vor.u32 %v4894_v29, %v4057_v28  ;;  %v4850_v40 = vld [vmem:[#allocation11 + $0x4c] sm:$0xf0]  ;;  %v4169_v16 = vld [vmem:[#allocation11 + $0x280] sm:$0xf]  ;;  %v3883_v32 = vld [vmem:[#allocation11 + $0x50] sm:$0xf0] }
  0xf8   :  { %1363 = vmatpush.bf16.msrb.mxu2 %v3602_v53  ;;  %v3763_v53 = vld [vmem:[#allocation8 + $0x358] sm:$0xf0]  ;;  %v4153_v28 = vld [vmem:[#allocation11 + $0x260] sm:$0xf]  ;;  %v4918_v29 = vld [vmem:[#allocation11 + $0x26c] sm:$0xf0] }
  0xf9   :  { %1385 = vmatpush.bf16.msra.mxu0 %v3446_v48  ;;  %1377 = vmatpush.bf16.msrb.mxu3 %v3730_v58  ;;  %v4785_v48 = vld [vmem:[#allocation8 + $0x24c] sm:$0xf]  ;;  %v3475_v58 = vld [vmem:[#allocation8 + $0x118] sm:$0xf0] }
  0xfa   :  { %1399 = vmatpush.bf16.msra.mxu1 %v3574_v49  ;;  %v3635_v49 = vld [vmem:[#allocation8 + $0x258] sm:$0xf0]  ;;  %v3478_v5 = vor.u32 %v4745_v56, %v3475_v58  ;;  %v3950_v58 = vor.u32 %v4864_v54, %v3947_v55 }
  0xfb   :  { %1364 = vmatmul.bf16.vlgmr.msrb.gmra.mxu2 %v5414_v21 }
  0xfc   :  { %1412 = vmatpush.bf16.msra.mxu2 %v3718_v59  ;;  %1378 = vmatmul.bf16.vlgmr.msrb.gmra.mxu3 %v5416_v27  ;;  %v3961_v59 = vld [vmem:[#allocation11 + $0xe0] sm:$0xf] }
  0xfd   :  { %1426 = vmatpush.bf16.msra.mxu3 %v3846_v60  ;;  %1386 = vmatpush.bf16.msra.mxu0 %v3430_v0  ;;  %v3638_v60 = vor.u32 %v4785_v48, %v3635_v49  ;;  %v4902_v0 = vld [vmem:[#allocation11 + $0x1ec] sm:$0xf0]  ;;  %v4025_v49 = vld [vmem:[#allocation11 + $0x160] sm:$0xf] }
  0xfe   :  { %1400 = vmatpush.bf16.msra.mxu1 %v3558_v1  ;;  %v3766_v1 = vor.u32 %v4817_v50, %v3763_v53  ;;  %v4090_v10 = vor.u32 %v4902_v0, %v4089_v63  ;;  %v4886_v50 = vld [vmem:[#allocation11 + $0x16c] sm:$0xf0] }
  0xff   :  { %v4934_v53 = vld [vmem:[#allocation11 + $0x2ec] sm:$0xf0] }
 0x100   :  { %1413 = vmatpush.bf16.msra.mxu2 %v3702_v8  ;;  %v3962_v8 = vor.u32 %v4870_v61, %v3961_v59  ;;  %v4009_v59 = vld [vmem:[#allocation11 + $0x140] sm:$0xf]  ;;  %v4930_v0 = vld [vmem:[#allocation11 + $0x2cc] sm:$0xf0] }
 0x101   :  { %1427 = vmatpush.bf16.msra.mxu3 %v3830_v9  ;;  %1387 = vmatpush.bf16.msra.mxu0 %v3414_v12  ;;  %v3945_v9 = vld [vmem:[#allocation11 + $0xc0] sm:$0xf]  ;;  %v4866_v12 = vld [vmem:[#allocation11 + $0xcc] sm:$0xf0] }
 0x102   :  { %1401 = vmatpush.bf16.msra.mxu1 %v3542_v13  ;;  %v4073_v13 = vld [vmem:[#allocation11 + $0x1c0] sm:$0xf] }
 0x103   :  { %v4201_v61 = vld [vmem:[#allocation11 + $0x2c0] sm:$0xf] }
 0x104   :  { %1414 = vmatpush.bf16.msra.mxu2 %v3686_v20  ;;  %v3946_v20 = vor.u32 %v4866_v12, %v3945_v9  ;;  %v4926_v9 = vld [vmem:[#allocation11 + $0x2ac] sm:$0xf0] }
 0x105   :  { %1428 = vmatpush.bf16.msra.mxu3 %v3814_v22  ;;  %1388 = vmatpush.bf16.msra.mxu0 %v3398_v25  ;;  %v4074_v22 = vor.u32 %v4898_v14, %v4073_v13  ;;  %v4862_v25 = vld [vmem:[#allocation11 + $0xac] sm:$0xf0]  ;;  %v4186_v12 = vor.u32 %v4926_v9, %v4185_v7  ;;  %v3977_v14 = vld [vmem:[#allocation11 + $0x100] sm:$0xf]  ;;  %v4880_v7 = vld [vmem:[#allocation11 + $0x144] sm:$0xf] }
 0x106   :  { %1402 = vmatpush.bf16.msra.mxu1 %v3526_v26  ;;  %v3734_v26 = vor.u32 %v4809_v18, %v3731_v19  ;;  %v3930_v30 = vor.u32 %v4862_v25, %v3929_v24  ;;  %v4922_v18 = vld [vmem:[#allocation11 + $0x28c] sm:$0xf0]  ;;  %v4852_v19 = vld [vmem:[#allocation11 + $0x64] sm:$0xf]  ;;  %v4091_v25 = vld [vmem:[#allocation11 + $0x1f0] sm:$0xf0] }
 0x107   :  { %v4900_v24 = vld [vmem:[#allocation11 + $0x1e4] sm:$0xf] }
 0x108   :  { %1415 = vmatpush.bf16.msra.mxu2 %v3670_v34  ;;  %v4041_v34 = vld [vmem:[#allocation11 + $0x180] sm:$0xf]  ;;  %v4928_v9 = vld [vmem:[#allocation11 + $0x2c4] sm:$0xf] }
 0x109   :  { %1429 = vmatpush.bf16.msra.mxu3 %v3798_v35  ;;  %1389 = vmatpush.bf16.msra.mxu0 %v3382_v38  ;;  %v4890_v35 = vld [vmem:[#allocation11 + $0x18c] sm:$0xf0] }
 0x10a   :  { %1403 = vmatpush.bf16.msra.mxu1 %v3510_v39  ;;  %v3881_v39 = vld [vmem:[#allocation11 + $0x40] sm:$0xf] }
 0x10b   :  { %v3882_v41 = vor.u32 %v4850_v40, %v3881_v39  ;;  %v3867_v39 = vld [vmem:[#allocation11 + $0x30] sm:$0xf0]  ;;  %v4892_v40 = vld [vmem:[#allocation11 + $0x1a4] sm:$0xf] }
 0x10c   :  { %1416 = vmatpush.bf16.msra.mxu2 %v3654_v46  ;;  %v4062_v43 = vor.u32 %v4892_v40, %v4059_v42 }
 0x10d   :  { %1430 = vmatpush.bf16.msra.mxu3 %v3782_v47  ;;  %1390 = vmatpush.bf16.msra.mxu0 %v3366_v51  ;;  %v3963_v47 = vld [vmem:[#allocation11 + $0xf0] sm:$0xf0]  ;;  %v4217_v51 = vld [vmem:[#allocation11 + $0x2e0] sm:$0xf] }
 0x10e   :  { %1404 = vmatpush.bf16.msra.mxu1 %v3494_v52  ;;  %v4026_v52 = vor.u32 %v4886_v50, %v4025_v49  ;;  %v4218_v56 = vor.u32 %v4934_v53, %v4217_v51  ;;  %v4043_v49 = vld [vmem:[#allocation11 + $0x190] sm:$0xf0]  ;;  %v4105_v51 = vld [vmem:[#allocation11 + $0x200] sm:$0xf] }
 0x10f   :  { %v4345_v53 = vld [vmem:[#allocation11 + $0x3e0] sm:$0xf] }
 0x110   :  { %1417 = vmatpush.bf16.msra.mxu2 %v3638_v60  ;;  %v4882_v60 = vld [vmem:[#allocation11 + $0x14c] sm:$0xf0] }
 0x111   :  { %1431 = vmatpush.bf16.msra.mxu3 %v3766_v1  ;;  %1391 = vmatpush.bf16.msra.mxu0 %v3350_v4  ;;  %v4010_v63 = vor.u32 %v4882_v60, %v4009_v59  ;;  %v4202_v1 = vor.u32 %v4930_v0, %v4201_v61  ;;  %v3934_v4 = vor.u32 %v4860_v2, %v3931_v3  ;;  %v4027_v59 = vld [vmem:[#allocation11 + $0x170] sm:$0xf0]  ;;  %v5432_v3 = vld [vmem:[#allocation10] sm:$0xf] }
 0x112   :  { %1405 = vmatpush.bf16.msra.mxu1 %v3478_v5  ;;  %v3993_v5 = vld [vmem:[#allocation11 + $0x120] sm:$0xf]  ;;  %v4219_v0 = vld [vmem:[#allocation11 + $0x2f0] sm:$0xf0] }
 0x114   :  { %1418 = vmatpush.bf16.msra.mxu2 %v3622_v11  ;;  %1392 = vmatmul.bf16.vlgmr.msra.gmra.mxu0 %v5408_v57  ;;  %v3897_v57 = vld [vmem:[#allocation11 + $0x60] sm:$0xf]  ;;  %v3915_v11 = vld [vmem:[#allocation11 + $0x90] sm:$0xf0] }
 0x115   :  { %2230 = vmatpush.bf16.msrb.mxu0 %v3962_v8  ;;  %1432 = vmatpush.bf16.msra.mxu3 %v3750_v15  ;;  %v3898_v38 = vor.u32 %v4854_v37, %v3897_v57  ;;  %v3994_v8 = vor.u32 %v4878_v6, %v3993_v5  ;;  %v4874_v15 = vld [vmem:[#allocation11 + $0x10c] sm:$0xf0]  ;;  %v4137_v57 = vld [vmem:[#allocation11 + $0x240] sm:$0xf] }
 0x116   :  { %2244 = vmatpush.bf16.msrb.mxu1 %v4090_v10  ;;  %v4856_v10 = vld [vmem:[#allocation11 + $0x84] sm:$0xf]  ;;  %v3978_v17 = vor.u32 %v4874_v15, %v3977_v14  ;;  %v4914_v37 = vld [vmem:[#allocation11 + $0x24c] sm:$0xf0]  ;;  %v4313_v14 = vld [vmem:[#allocation11 + $0x3a0] sm:$0xf] }
 0x117   :  { %1406 = vmatmul.bf16.vlgmr.msra.gmra.mxu1 %v5410_v62  ;;  %v4042_v62 = vor.u32 %v4890_v35, %v4041_v34  ;;  %v3918_v13 = vor.u32 %v4856_v10, %v3915_v11  ;;  %v3886_v34 = vor.u32 %v4848_v31, %v3883_v32  ;;  %v4075_v35 = vld [vmem:[#allocation11 + $0x1d0] sm:$0xf0]  ;;  %v4962_v5 = vld [vmem:[#allocation11 + $0x3cc] sm:$0xf0]  ;;  %v4872_v31 = vld [vmem:[#allocation11 + $0x104] sm:$0xf] }
 0x118   :  { %1419 = vmatpush.bf16.msra.mxu2 %v3606_v23  ;;  %v4203_v11 = vld [vmem:[#allocation11 + $0x2d0] sm:$0xf0]  ;;  %v4958_v15 = vld [vmem:[#allocation11 + $0x3ac] sm:$0xf0] }
 0x119   :  { %2231 = vmatpush.bf16.msrb.mxu0 %v3946_v20  ;;  %1433 = vmatpush.bf16.msra.mxu3 %v3734_v26  ;;  %v3899_v20 = vld [vmem:[#allocation11 + $0x70] sm:$0xf0]  ;;  %v4094_v26 = vor.u32 %v4900_v24, %v4091_v25  ;;  %v4297_v25 = vld [vmem:[#allocation11 + $0x380] sm:$0xf] }
 0x11a   :  { %2245 = vmatpush.bf16.msrb.mxu1 %v4074_v22  ;;  %v4170_v22 = vor.u32 %v4922_v18, %v4169_v16  ;;  %v3902_v23 = vor.u32 %v4852_v19, %v3899_v20  ;;  %v4876_v18 = vld [vmem:[#allocation11 + $0x124] sm:$0xf]  ;;  %v3995_v19 = vld [vmem:[#allocation11 + $0x130] sm:$0xf0] }
 0x11b   :  { %1420 = vmatmul.bf16.vlgmr.msra.gmra.mxu2 %v5414_v21  ;;  %v3849_v21 = vld [vmem:[#allocation11] sm:$0xf]  ;;  %v4924_v20 = vld [vmem:[#allocation11 + $0x2a4] sm:$0xf]  ;;  %v3979_v32 = vld [vmem:[#allocation11 + $0x110] sm:$0xf0] }
 0x11c   :  { %1434 = vmatmul.bf16.vlgmr.msra.gmra.mxu3 %v5416_v27  ;;  %v3850_v46 = vor.u32 %v4842_v45, %v3849_v21  ;;  %v4868_v27 = vld [vmem:[#allocation11 + $0xe4] sm:$0xf]  ;;  %2258 = vmatpush.bf16.msrb.mxu2 %v4218_v56  ;;  %v4910_v21 = vld [vmem:[#allocation11 + $0x22c] sm:$0xf0] }
 0x11d   :  { %2232 = vmatpush.bf16.msrb.mxu0 %v3930_v30  ;;  %v3966_v48 = vor.u32 %v4868_v27, %v3963_v47  ;;  %v4154_v30 = vor.u32 %v4918_v29, %v4153_v28  ;;  %v3851_v27 = vld [vmem:[#allocation11 + $0x10] sm:$0xf0]  ;;  %v4888_v47 = vld [vmem:[#allocation11 + $0x184] sm:$0xf]  ;;  %v4966_v56 = vld [vmem:[#allocation11 + $0x3ec] sm:$0xf0] }
 0x11e   :  { %2246 = vmatpush.bf16.msrb.mxu1 %v4058_v33  ;;  %v4896_v33 = vld [vmem:[#allocation11 + $0x1c4] sm:$0xf]  ;;  %v4046_v50 = vor.u32 %v4888_v47, %v4043_v49  ;;  %v4346_v60 = vor.u32 %v4966_v56, %v4345_v53 }
 0x11f   :  { %v4912_v49 = vld [vmem:[#allocation11 + $0x244] sm:$0xf] }
 0x120   :  { %2259 = vmatpush.bf16.msrb.mxu2 %v4202_v1  ;;  %2272 = vmatpush.bf16.msrb.mxu3 %v4346_v60  ;;  %v4249_v60 = vld [vmem:[#allocation11 + $0x320] sm:$0xf] }
 0x121   :  { %2233 = vmatpush.bf16.msrb.mxu0 %v3914_v36  ;;  %v4078_v36 = vor.u32 %v4896_v33, %v4075_v35  ;;  %v4920_v33 = vld [vmem:[#allocation11 + $0x284] sm:$0xf]  ;;  %v3982_v35 = vor.u32 %v4872_v31, %v3979_v32  ;;  %v4863_v32 = vld [vmem:[#allocation11 + $0xb4] sm:$0xf0] }
 0x122   :  { %2247 = vmatpush.bf16.msrb.mxu1 %v4042_v62  ;;  %v4138_v62 = vor.u32 %v4914_v37, %v4137_v57 }
 0x124   :  { %2260 = vmatpush.bf16.msrb.mxu2 %v4186_v12  ;;  %v4206_v12 = vor.u32 %v4928_v9, %v4203_v11  ;;  %v3953_v9 = vld [vmem:[#allocation11 + $0xc8] sm:$0xf]  ;;  %v4867_v11 = vld [vmem:[#allocation11 + $0xd4] sm:$0xf0] }
 0x125   :  { %2234 = vmatpush.bf16.msrb.mxu0 %v3898_v38  ;;  %v4844_v38 = vld [vmem:[#allocation11 + $0x24] sm:$0xf] }
 0x126   :  { %2248 = vmatpush.bf16.msrb.mxu1 %v4026_v52  ;;  %v4906_v52 = vld [vmem:[#allocation11 + $0x20c] sm:$0xf0] }
 0x127   :  { %v4106_v55 = vor.u32 %v4906_v52, %v4105_v51 }
 0x128   :  { %2261 = vmatpush.bf16.msrb.mxu2 %v4170_v22  ;;  %v3998_v22 = vor.u32 %v4876_v18, %v3995_v19  ;;  %v4107_v18 = vld [vmem:[#allocation11 + $0x210] sm:$0xf0]  ;;  %v4964_v19 = vld [vmem:[#allocation11 + $0x3e4] sm:$0xf] }
 0x129   :  { %2235 = vmatpush.bf16.msrb.mxu0 %v3882_v41  ;;  %v3870_v41 = vor.u32 %v4844_v38, %v3867_v39  ;;  %v4950_v38 = vld [vmem:[#allocation11 + $0x36c] sm:$0xf0] }
 0x12a   :  { %2249 = vmatpush.bf16.msrb.mxu1 %v4010_v63  ;;  %v4932_v63 = vld [vmem:[#allocation11 + $0x2e4] sm:$0xf] }
 0x12b   :  { %v4222_v2 = vor.u32 %v4932_v63, %v4219_v0  ;;  %v4871_v0 = vld [vmem:[#allocation11 + $0xf4] sm:$0xf0] }
 0x12c   :  { %2262 = vmatpush.bf16.msrb.mxu2 %v4154_v30 }
 0x12d   :  { %2236 = vmatpush.bf16.msrb.mxu0 %v3866_v44  ;;  %v4121_v44 = vld [vmem:[#allocation11 + $0x220] sm:$0xf] }
 0x12e   :  { %2250 = vmatpush.bf16.msrb.mxu1 %v3994_v8  ;;  %v4122_v45 = vor.u32 %v4910_v21, %v4121_v44  ;;  %v4011_v8 = vld [vmem:[#allocation11 + $0x150] sm:$0xf0] }
 0x12f   :  { %v4014_v10 = vor.u32 %v4880_v7, %v4011_v8  ;;  %v4155_v44 = vld [vmem:[#allocation11 + $0x270] sm:$0xf0] }
 0x130   :  { %2263 = vmatpush.bf16.msrb.mxu2 %v4138_v62  ;;  %v4281_v62 = vld [vmem:[#allocation11 + $0x360] sm:$0xf] }
 0x131   :  { %2237 = vmatpush.bf16.msrb.mxu0 %v3850_v46  ;;  %v4840_v46 = vld [vmem:[#allocation11 + $0x4] sm:$0xf]  ;;  %v4282_v42 = vor.u32 %v4950_v38, %v4281_v62  ;;  %v3921_v62 = vld [vmem:[#allocation11 + $0x88] sm:$0xf] }
 0x132   :  { %2251 = vmatpush.bf16.msrb.mxu1 %v3978_v17  ;;  %v4314_v17 = vor.u32 %v4958_v15, %v4313_v14 }
 0x134   :  { %2264 = vmatpush.bf16.msrb.mxu2 %v4122_v45 }
 0x135   :  { %2286 = vmatpush.bf16.msra.mxu0 %v3966_v48  ;;  %v3854_v48 = vor.u32 %v4840_v46, %v3851_v27  ;;  %v4265_v46 = vld [vmem:[#allocation11 + $0x340] sm:$0xf]  ;;  %v4946_v27 = vld [vmem:[#allocation11 + $0x34c] sm:$0xf0] }
 0x136   :  { %2300 = vmatpush.bf16.msra.mxu1 %v4094_v26  ;;  %v4954_v26 = vld [vmem:[#allocation11 + $0x38c] sm:$0xf0] }
 0x137   :  { %v4298_v30 = vor.u32 %v4954_v26, %v4297_v25  ;;  %v3954_v26 = vor.u32 %v4867_v11, %v3953_v9 }
 0x138   :  { %2265 = vmatpush.bf16.msrb.mxu2 %v4106_v55 }
 0x139   :  { %2287 = vmatpush.bf16.msra.mxu0 %v3950_v58  ;;  %v4884_v58 = vld [vmem:[#allocation11 + $0x164] sm:$0xf] }
 0x13a   :  { %2301 = vmatpush.bf16.msra.mxu1 %v4078_v36  ;;  %v4030_v61 = vor.u32 %v4884_v58, %v4027_v59  ;;  %v4171_v36 = vld [vmem:[#allocation11 + $0x290] sm:$0xf0]  ;;  %v3969_v59 = vld [vmem:[#allocation11 + $0xe8] sm:$0xf] }
 0x13b   :  { %v4174_v37 = vor.u32 %v4920_v33, %v4171_v36  ;;  %v4960_v33 = vld [vmem:[#allocation11 + $0x3c4] sm:$0xf] }
 0x13c   :  { %2314 = vmatpush.bf16.msra.mxu2 %v4222_v2  ;;  %v4908_v2 = vld [vmem:[#allocation11 + $0x224] sm:$0xf] }
 0x13d   :  { %2288 = vmatpush.bf16.msra.mxu0 %v3934_v4  ;;  %v4329_v4 = vld [vmem:[#allocation11 + $0x3c0] sm:$0xf] }
 0x13e   :  { %2302 = vmatpush.bf16.msra.mxu1 %v4062_v43  ;;  %v4330_v6 = vor.u32 %v4962_v5, %v4329_v4  ;;  %v4916_v43 = vld [vmem:[#allocation11 + $0x264] sm:$0xf]  ;;  %v4123_v4 = vld [vmem:[#allocation11 + $0x230] sm:$0xf0] }
 0x13f   :  { %v4158_v21 = vor.u32 %v4916_v43, %v4155_v44 }
 0x140   :  { %2273 = vmatpush.bf16.msrb.mxu3 %v4330_v6  ;;  %2315 = vmatpush.bf16.msra.mxu2 %v4206_v12  ;;  %v4126_v6 = vor.u32 %v4908_v2, %v4123_v4  ;;  %v4233_v12 = vld [vmem:[#allocation11 + $0x300] sm:$0xf]  ;;  %v4899_v2 = vld [vmem:[#allocation11 + $0x1d4] sm:$0xf0]  ;;  %v4948_v4 = vld [vmem:[#allocation11 + $0x364] sm:$0xf] }
 0x141   :  { %2289 = vmatpush.bf16.msra.mxu0 %v3918_v13  ;;  %v568_v13 = vperm.slane %v5432_v3, 0 }
 0x142   :  { %2303 = vmatpush.bf16.msra.mxu1 %v4046_v50  ;;  %v4139_v50 = vld [vmem:[#allocation11 + $0x250] sm:$0xf0] }
 0x143   :  { %v4142_v52 = vor.u32 %v4912_v49, %v4139_v50  ;;  %v4903_v50 = vld [vmem:[#allocation11 + $0x1f4] sm:$0xf0] }
 0x144   :  { %2274 = vmatpush.bf16.msrb.mxu3 %v4314_v17  ;;  %v4904_v17 = vld [vmem:[#allocation11 + $0x204] sm:$0xf] }
 0x145   :  { %2290 = vmatpush.bf16.msra.mxu0 %v3902_v23  ;;  %v4187_v23 = vld [vmem:[#allocation11 + $0x2b0] sm:$0xf0] }
 0x146   :  { %2304 = vmatpush.bf16.msra.mxu1 %v4030_v61  ;;  %v4190_v24 = vor.u32 %v4924_v20, %v4187_v23  ;;  %v4942_v61 = vld [vmem:[#allocation11 + $0x32c] sm:$0xf0]  ;;  %v4347_v23 = vld [vmem:[#allocation11 + $0x3f0] sm:$0xf0] }
 0x147   :  { %v4350_v25 = vor.u32 %v4964_v19, %v4347_v23  ;;  %v4267_v19 = vld [vmem:[#allocation11 + $0x350] sm:$0xf0] }
 0x148   :  { %2316 = vmatpush.bf16.msra.mxu2 %v4190_v24  ;;  %2275 = vmatpush.bf16.msrb.mxu3 %v4298_v30 }
 0x149   :  { %2291 = vmatpush.bf16.msra.mxu0 %v3886_v34 }
 0x14a   :  { %2305 = vmatpush.bf16.msra.mxu1 %v4014_v10  ;;  %v3970_v10 = vor.u32 %v4871_v0, %v3969_v59  ;;  %v4081_v0 = vld [vmem:[#allocation11 + $0x1c8] sm:$0xf] }
 0x14c   :  { %2317 = vmatpush.bf16.msra.mxu2 %v4174_v37  ;;  %2276 = vmatpush.bf16.msrb.mxu3 %v4282_v42 }
 0x14d   :  { %2292 = vmatpush.bf16.msra.mxu0 %v3870_v41 }
 0x14e   :  { %2306 = vmatpush.bf16.msra.mxu1 %v3998_v22  ;;  %v4110_v22 = vor.u32 %v4904_v17, %v4107_v18  ;;  %v4895_v17 = vld [vmem:[#allocation11 + $0x1b4] sm:$0xf0]  ;;  %v4944_v18 = vld [vmem:[#allocation11 + $0x344] sm:$0xf] }
 0x14f   :  { %v4270_v23 = vor.u32 %v4944_v18, %v4267_v19  ;;  %v3985_v19 = vld [vmem:[#allocation11 + $0x108] sm:$0xf] }
 0x150   :  { %v1225_v54 = vpop.f32.mrf.mxu0  ;;  %2318 = vmatpush.bf16.msra.mxu2 %v4158_v21 }
 0x151   :  { %2293 = vmatpush.bf16.msra.mxu0 %v3854_v48  ;;  %v1239_v1 = vpop.f32.mrf.mxu1  ;;  %v1226_v28 = vadd.f32 %v1225_v54, %v568_v13  ;;  %v4266_v48 = vor.u32 %v4946_v27, %v4265_v46  ;;  %v569_v54 = vperm.slane %v5432_v3, 1  ;;  %v3905_v27 = vld [vmem:[#allocation11 + $0x68] sm:$0xf] }
 0x152   :  { %2307 = vmatpush.bf16.msra.mxu1 %v3982_v35 }
 0x153   :  { %v1240_v39 = vadd.f32 %v1239_v1, %v1226_v28  ;;  %2277 = vmatpush.bf16.msrb.mxu3 %v4266_v48  ;;  %v4250_v1 = vor.u32 %v4942_v61, %v4249_v60  ;;  %v3937_v28 = vld [vmem:[#allocation11 + $0xa8] sm:$0xf] }
 0x154   :  { %2319 = vmatpush.bf16.msra.mxu2 %v4142_v52  ;;  %v3938_v37 = vor.u32 %v4863_v32, %v3937_v28  ;;  %v4097_v48 = vld [vmem:[#allocation11 + $0x1e8] sm:$0xf]  ;;  %v4299_v52 = vld [vmem:[#allocation11 + $0x390] sm:$0xf0]  ;;  %v4891_v32 = vld [vmem:[#allocation11 + $0x194] sm:$0xf0] }
 0x155   :  { %v4098_v60 = vor.u32 %v4903_v50, %v4097_v48  ;;  %v3889_v61 = vld [vmem:[#allocation11 + $0x48] sm:$0xf]  ;;  %v4935_v48 = vld [vmem:[#allocation11 + $0x2f4] sm:$0xf0]  ;;  %v3955_v50 = vld [vmem:[#allocation11 + $0xd8] sm:$0xf0] }
 0x156   :  { %v3857_v28 = vld [vmem:[#allocation11 + $0x8] sm:$0xf] }
 0x157   :  { %2278 = vmatpush.bf16.msrb.mxu3 %v4250_v1 }
 0x158   :  { %v1227_v16 = vpop.f32.mrf.mxu0  ;;  %2320 = vmatpush.bf16.msra.mxu2 %v4126_v6 }
 0x159   :  { %v1241_v29 = vpop.f32.mrf.mxu1  ;;  %v1228_v40 = vadd.f32 %v1227_v16, %v568_v13  ;;  %v4938_v13 = vld [vmem:[#allocation11 + $0x30c] sm:$0xf0] }
 0x15a   :  { %v4234_v16 = vor.u32 %v4938_v13, %v4233_v12  ;;  %v4082_v12 = vor.u32 %v4899_v2, %v4081_v0  ;;  %v3873_v13 = vld [vmem:[#allocation11 + $0x28] sm:$0xf]  ;;  %v4861_v0 = vld [vmem:[#allocation11 + $0xac] sm:$0xf]  ;;  %v3939_v2 = vld [vmem:[#allocation11 + $0xb8] sm:$0xf0] }
 0x15b   :  { %v1242_v47 = vadd.f32 %v1241_v29, %v1228_v40  ;;  %v4956_v40 = vld [vmem:[#allocation11 + $0x3a4] sm:$0xf] }
 0x15c   :  { %2279 = vmatpush.bf16.msrb.mxu3 %v4234_v16  ;;  %2321 = vmatpush.bf16.msra.mxu2 %v4110_v22  ;;  %v4065_v16 = vld [vmem:[#allocation11 + $0x1a8] sm:$0xf] }
 0x15e   :  { %v1253_v34 = vpop.f32.mrf.mxu2 }
 0x15f   :  { %v1267_v57 = vpop.f32.mrf.mxu3  ;;  %v1254_v45 = vadd.f32 %v1253_v34, %v1240_v39  ;;  %v4331_v34 = vld [vmem:[#allocation11 + $0x3d0] sm:$0xf0]  ;;  %v4859_v39 = vld [vmem:[#allocation11 + $0x94] sm:$0xf0] }
 0x160   :  { %v1281_v41 = vpop.f32.mrf.mxu0  ;;  %2328 = vmatpush.bf16.msra.mxu3 %v4350_v25  ;;  %v4334_v35 = vor.u32 %v4960_v33, %v4331_v34  ;;  %v3922_v46 = vor.u32 %v4859_v39, %v3921_v62  ;;  %v4940_v33 = vld [vmem:[#allocation11 + $0x324] sm:$0xf]  ;;  %v4251_v34 = vld [vmem:[#allocation11 + $0x330] sm:$0xf0] }
 0x161   :  { %v1268_v53 = vadd.f32 %v1267_v57, %v1254_v45  ;;  %v1295_v55 = vpop.f32.mrf.mxu1  ;;  %v1282_v14 = vadd.f32 %v1281_v41, %v569_v54  ;;  %v4315_v41 = vld [vmem:[#allocation11 + $0x3b0] sm:$0xf0] }
 0x162   :  { %v4318_v43 = vor.u32 %v4956_v40, %v4315_v41 }
 0x163   :  { %v1440_v7 = vmax.f32 %v1268_v53, 0.0  ;;  %v1296_v29 = vadd.f32 %v1295_v55, %v1282_v14  ;;  %v570_v53 = vperm.slane %v5432_v3, 2  ;;  %v4847_v14 = vld [vmem:[#allocation11 + $0x34] sm:$0xf0] }
 0x164   :  { %2329 = vmatpush.bf16.msra.mxu3 %v4334_v35  ;;  %v3874_v25 = vor.u32 %v4847_v14, %v3873_v13  ;;  %v3923_v13 = vld [vmem:[#allocation11 + $0x98] sm:$0xf0]  ;;  %v571_v14 = vperm.slane %v5432_v3, 3 }
 0x166   :  { %v1255_v51 = vpop.f32.mrf.mxu2 }
 0x167   :  { %v1256_v56 = vadd.f32 %v1255_v51, %v1242_v47  ;;  %v1269_v58 = vpop.f32.mrf.mxu3  ;;  %v4855_v47 = vld [vmem:[#allocation11 + $0x74] sm:$0xf0]  ;;  %v4952_v51 = vld [vmem:[#allocation11 + $0x384] sm:$0xf] }
 0x168   :  { %v1283_v5 = vpop.f32.mrf.mxu0  ;;  %2330 = vmatpush.bf16.msra.mxu3 %v4318_v43  ;;  %v3906_v59 = vor.u32 %v4855_v47, %v3905_v27  ;;  %v4887_v43 = vld [vmem:[#allocation11 + $0x174] sm:$0xf0]  ;;  %v4235_v27 = vld [vmem:[#allocation11 + $0x310] sm:$0xf0] }
 0x169   :  { %v1270_v63 = vadd.f32 %v1269_v58, %v1256_v56  ;;  %v1284_v30 = vadd.f32 %v1283_v5, %v569_v54  ;;  %v1297_v31 = vpop.f32.mrf.mxu1  ;;  %v4302_v54 = vor.u32 %v4952_v51, %v4299_v52  ;;  %v4283_v5 = vld [vmem:[#allocation11 + $0x370] sm:$0xf0] }
 0x16b   :  { %v1444_v8 = vmax.f32 %v1270_v63, 0.0  ;;  %v1298_v38 = vadd.f32 %v1297_v31, %v1284_v30  ;;  %v4851_v63 = vld [vmem:[#allocation11 + $0x54] sm:$0xf0]  ;;  %v4049_v30 = vld [vmem:[#allocation11 + $0x188] sm:$0xf] }
 0x16c   :  { %2331 = vmatpush.bf16.msra.mxu3 %v4302_v54  ;;  %v3890_v11 = vor.u32 %v4851_v63, %v3889_v61  ;;  %v4050_v41 = vor.u32 %v4891_v32, %v4049_v30  ;;  %v4931_v63 = vld [vmem:[#allocation11 + $0x2d4] sm:$0xf0]  ;;  %v4161_v32 = vld [vmem:[#allocation11 + $0x268] sm:$0xf] }
 0x16d   :  { %v5436_v15 = vpack.c.bf16 %v1444_v8, %v1440_v7  ;;  %v4286_v8 = vor.u32 %v4948_v4, %v4283_v5 }
 0x16e   :  { %v1309_v20 = vpop.f32.mrf.mxu2 }
 0x16f   :  { %v1323_v24 = vpop.f32.mrf.mxu3  ;;  %2238 = vmatmul.bf16.vlgmr.msrb.gmra.mxu0 %v5436_v15  ;;  %v1310_v36 = vadd.f32 %v1309_v20, %v1296_v29  ;;  %v4843_v29 = vld [vmem:[#allocation11 + $0x14] sm:$0xf0] }
 0x170   :  { %2342 = vmatpush.bf16.msrb.mxu0 %v3970_v10  ;;  %2332 = vmatpush.bf16.msra.mxu3 %v4286_v8  ;;  %v4001_v8 = vld [vmem:[#allocation11 + $0x128] sm:$0xf] }
 0x171   :  { %v1337_v57 = vpop.f32.mrf.mxu0  ;;  %v1324_v44 = vadd.f32 %v1323_v24, %v1310_v36  ;;  %v4869_v36 = vld [vmem:[#allocation11 + $0xec] sm:$0xf] }
 0x172   :  { %v1338_v6 = vadd.f32 %v1337_v57, %v570_v53  ;;  %v3971_v57 = vld [vmem:[#allocation11 + $0xf8] sm:$0xf0] }
 0x173   :  { %v1441_v55 = vmax.f32 %v1324_v44, 0.0 }
 0x174   :  { %2343 = vmatpush.bf16.msrb.mxu0 %v3954_v26  ;;  %v1351_v56 = vpop.f32.mrf.mxu1  ;;  %v4066_v26 = vor.u32 %v4895_v17, %v4065_v16  ;;  %2333 = vmatpush.bf16.msra.mxu3 %v4270_v23  ;;  %v4923_v23 = vld [vmem:[#allocation11 + $0x294] sm:$0xf0] }
 0x175   :  { %v1352_v20 = vadd.f32 %v1351_v56, %v1338_v6 }
 0x176   :  { %v1311_v42 = vpop.f32.mrf.mxu2 }
 0x177   :  { %v1312_v21 = vadd.f32 %v1311_v42, %v1298_v38  ;;  %v1325_v45 = vpop.f32.mrf.mxu3  ;;  %v3858_v38 = vor.u32 %v4843_v29, %v3857_v28  ;;  %v4033_v42 = vld [vmem:[#allocation11 + $0x168] sm:$0xf]  ;;  %v4901_v28 = vld [vmem:[#allocation11 + $0x1ec] sm:$0xf]  ;;  %v4099_v29 = vld [vmem:[#allocation11 + $0x1f8] sm:$0xf0] }
 0x178   :  { %2344 = vmatpush.bf16.msrb.mxu0 %v3938_v37  ;;  %v4254_v37 = vor.u32 %v4940_v33, %v4251_v34  ;;  %v4034_v54 = vor.u32 %v4887_v43, %v4033_v42  ;;  %v4102_v34 = vor.u32 %v4901_v28, %v4099_v29  ;;  %v4145_v43 = vld [vmem:[#allocation11 + $0x248] sm:$0xf] }
 0x179   :  { %v1326_v49 = vadd.f32 %v1325_v45, %v1312_v21  ;;  %v1339_v7 = vpop.f32.mrf.mxu0  ;;  %v3974_v21 = vor.u32 %v4869_v36, %v3971_v57  ;;  %v4225_v45 = vld [vmem:[#allocation11 + $0x2e8] sm:$0xf]  ;;  %v4849_v36 = vld [vmem:[#allocation11 + $0x4c] sm:$0xf]  ;;  %v3891_v57 = vld [vmem:[#allocation11 + $0x58] sm:$0xf0] }
 0x17a   :  { %v1340_v22 = vadd.f32 %v1339_v7, %v570_v53  ;;  %2334 = vmatpush.bf16.msra.mxu3 %v4254_v37  ;;  %v3942_v7 = vor.u32 %v4861_v0, %v3939_v2  ;;  %v3894_v42 = vor.u32 %v4849_v36, %v3891_v57  ;;  %v4889_v0 = vld [vmem:[#allocation11 + $0x18c] sm:$0xf]  ;;  %v4051_v2 = vld [vmem:[#allocation11 + $0x198] sm:$0xf0]  ;;  %v4337_v29 = vld [vmem:[#allocation11 + $0x3c8] sm:$0xf] }
 0x17b   :  { %v1445_v58 = vmax.f32 %v1326_v49, 0.0  ;;  %v4865_v49 = vld [vmem:[#allocation11 + $0xcc] sm:$0xf]  ;;  %v4321_v57 = vld [vmem:[#allocation11 + $0x3a8] sm:$0xf] }
 0x17c   :  { %2345 = vmatpush.bf16.msrb.mxu0 %v3922_v46  ;;  %v1353_v31 = vpop.f32.mrf.mxu1  ;;  %v4936_v46 = vld [vmem:[#allocation11 + $0x304] sm:$0xf]  ;;  %v3958_v56 = vor.u32 %v4865_v49, %v3955_v50  ;;  %v4067_v49 = vld [vmem:[#allocation11 + $0x1b8] sm:$0xf0] }
 0x17d   :  { %v5440_v1 = vpack.c.bf16 %v1445_v58, %v1441_v55  ;;  %v1354_v35 = vadd.f32 %v1353_v31, %v1340_v22  ;;  %v4238_v51 = vor.u32 %v4936_v46, %v4235_v27  ;;  %v4226_v55 = vor.u32 %v4935_v48, %v4225_v45  ;;  %v4017_v58 = vld [vmem:[#allocation11 + $0x148] sm:$0xf]  ;;  %v4915_v46 = vld [vmem:[#allocation11 + $0x254] sm:$0xf0]  ;;  %v4845_v27 = vld [vmem:[#allocation11 + $0x2c] sm:$0xf] }
 0x17e   :  { %v1365_v9 = vpop.f32.mrf.mxu2  ;;  %v4177_v22 = vld [vmem:[#allocation11 + $0x288] sm:$0xf]  ;;  %v4893_v48 = vld [vmem:[#allocation11 + $0x1ac] sm:$0xf] }
 0x17f   :  { %v1379_v10 = vpop.f32.mrf.mxu3  ;;  %2252 = vmatmul.bf16.vlgmr.msrb.gmra.mxu1 %v5440_v1  ;;  %2294 = vmatmul.bf16.vlgmr.msra.gmra.mxu0 %v5436_v15  ;;  %v1366_v24 = vadd.f32 %v1365_v9, %v1352_v20  ;;  %v4879_v9 = vld [vmem:[#allocation11 + $0x134] sm:$0xf0]  ;;  %v4178_v3 = vor.u32 %v4923_v23, %v4177_v22 }
 0x180   :  { %2346 = vmatpush.bf16.msrb.mxu0 %v3906_v59  ;;  %2356 = vmatpush.bf16.msrb.mxu1 %v4098_v60  ;;  %v4883_v59 = vld [vmem:[#allocation11 + $0x154] sm:$0xf0]  ;;  %v4209_v60 = vld [vmem:[#allocation11 + $0x2c8] sm:$0xf]  ;;  %v4002_v16 = vor.u32 %v4879_v9, %v4001_v8 }
 0x181   :  { %v1380_v39 = vadd.f32 %v1379_v10, %v1366_v24  ;;  %2335 = vmatpush.bf16.msra.mxu3 %v4238_v51  ;;  %v4018_v4 = vor.u32 %v4883_v59, %v4017_v58  ;;  %v4210_v6 = vor.u32 %v4931_v63, %v4209_v60  ;;  %v4193_v10 = vld [vmem:[#allocation11 + $0x2a8] sm:$0xf]  ;;  %v4875_v20 = vld [vmem:[#allocation11 + $0x114] sm:$0xf0]  ;;  %v4853_v24 = vld [vmem:[#allocation11 + $0x6c] sm:$0xf] }
 0x182   :  { %v3986_v30 = vor.u32 %v4875_v20, %v3985_v19  ;;  %v4911_v58 = vld [vmem:[#allocation11 + $0x234] sm:$0xf0]  ;;  %v4841_v59 = vld [vmem:[#allocation11 + $0xc] sm:$0xf]  ;;  %v3859_v60 = vld [vmem:[#allocation11 + $0x18] sm:$0xf0] }
 0x183   :  { %v1442_v52 = vmax.f32 %v1380_v39, 0.0  ;;  %v4083_v39 = vld [vmem:[#allocation11 + $0x1d8] sm:$0xf0]  ;;  %v3862_v8 = vor.u32 %v4841_v59, %v3859_v60  ;;  %v4113_v9 = vld [vmem:[#allocation11 + $0x208] sm:$0xf] }
 0x184   :  { %2347 = vmatpush.bf16.msrb.mxu0 %v3890_v11  ;;  %2357 = vmatpush.bf16.msrb.mxu1 %v4082_v12  ;;  %v4927_v11 = vld [vmem:[#allocation11 + $0x2b4] sm:$0xf0]  ;;  %v4857_v12 = vld [vmem:[#allocation11 + $0x8c] sm:$0xf]  ;;  %v4227_v19 = vld [vmem:[#allocation11 + $0x2f8] sm:$0xf0] }
 0x185   :  { %v4194_v17 = vor.u32 %v4927_v11, %v4193_v10  ;;  %v3926_v18 = vor.u32 %v4857_v12, %v3923_v13  ;;  %v4907_v10 = vld [vmem:[#allocation11 + $0x214] sm:$0xf0]  ;;  %v4054_v12 = vor.u32 %v4889_v0, %v4051_v2  ;;  %v4353_v13 = vld [vmem:[#allocation11 + $0x3e8] sm:$0xf]  ;;  %v4913_v59 = vld [vmem:[#allocation11 + $0x24c] sm:$0xf] }
 0x186   :  { %v1367_v62 = vpop.f32.mrf.mxu2  ;;  %v4114_v23 = vor.u32 %v4907_v10, %v4113_v9  ;;  %v4147_v60 = vld [vmem:[#allocation11 + $0x258] sm:$0xf0]  ;;  %v4257_v2 = vld [vmem:[#allocation11 + $0x328] sm:$0xf]  ;;  %v4939_v10 = vld [vmem:[#allocation11 + $0x314] sm:$0xf0] }
 0x187   :  { %v1368_v40 = vadd.f32 %v1367_v62, %v1354_v35  ;;  %v1381_v44 = vpop.f32.mrf.mxu3  ;;  %v4919_v35 = vld [vmem:[#allocation11 + $0x274] sm:$0xf0]  ;;  %v4150_v0 = vor.u32 %v4913_v59, %v4147_v60  ;;  %v4241_v9 = vld [vmem:[#allocation11 + $0x308] sm:$0xf]  ;;  %v4369_v59 = vld [vmem:[#allocation13 + $0x10] sm:$0xf] }
 0x188   :  { %2348 = vmatpush.bf16.msrb.mxu0 %v3874_v25  ;;  %2358 = vmatpush.bf16.msrb.mxu1 %v4066_v26  ;;  %v3907_v25 = vld [vmem:[#allocation11 + $0x78] sm:$0xf0]  ;;  %v4971_v60 = vld [vmem:[#allocation13 + $0x14] sm:$0xf0] }
 0x189   :  { %v1382_v47 = vadd.f32 %v1381_v44, %v1368_v40  ;;  %v3910_v31 = vor.u32 %v4853_v24, %v3907_v25 }
 0x18b   :  { %v1446_v53 = vmax.f32 %v1382_v47, 0.0  ;;  %v3875_v47 = vld [vmem:[#allocation11 + $0x38] sm:$0xf0] }
 0x18c   :  { %2349 = vmatpush.bf16.msrb.mxu0 %v3858_v38  ;;  %2359 = vmatpush.bf16.msrb.mxu1 %v4050_v41  ;;  %v4897_v38 = vld [vmem:[#allocation11 + $0x1cc] sm:$0xf]  ;;  %v4162_v41 = vor.u32 %v4919_v35, %v4161_v32 }
 0x18d   :  { %v5444_v61 = vpack.c.bf16 %v1446_v53, %v1442_v52  ;;  %v4086_v45 = vor.u32 %v4897_v38, %v4083_v39  ;;  %v4146_v52 = vor.u32 %v4915_v46, %v4145_v43  ;;  %v3878_v53 = vor.u32 %v4845_v27, %v3875_v47  ;;  %v4929_v32 = vld [vmem:[#allocation11 + $0x2cc] sm:$0xf]  ;;  %v4003_v38 = vld [vmem:[#allocation11 + $0x138] sm:$0xf0]  ;;  %v4305_v43 = vld [vmem:[#allocation11 + $0x388] sm:$0xf] }
 0x18e   :  { %v4925_v39 = vld [vmem:[#allocation11 + $0x2ac] sm:$0xf]  ;;  %v4179_v27 = vld [vmem:[#allocation11 + $0x298] sm:$0xf0] }
 0x18f   :  { %2308 = vmatmul.bf16.vlgmr.msra.gmra.mxu1 %v5440_v1  ;;  %2350 = vmatmul.bf16.vlgmr.msrb.gmra.mxu0 %v5436_v15  ;;  %v4921_v46 = vld [vmem:[#allocation11 + $0x28c] sm:$0xf] }
 0x190   :  { %2398 = vmatpush.bf16.msra.mxu0 %v3974_v21  ;;  %2266 = vmatmul.bf16.vlgmr.msrb.gmra.mxu2 %v5444_v61 }
 0x191   :  { %2360 = vmatpush.bf16.msrb.mxu1 %v4034_v54  ;;  %v1393_v5 = vpop.f32.mrf.mxu0  ;;  %2370 = vmatpush.bf16.msrb.mxu2 %v4226_v55  ;;  %v4129_v54 = vld [vmem:[#allocation11 + $0x228] sm:$0xf] }
 0x192   :  { %v1394_v33 = vadd.f32 %v1393_v5, %v571_v14 }
 0x194   :  { %2399 = vmatpush.bf16.msra.mxu0 %v3958_v56  ;;  %v1407_v26 = vpop.f32.mrf.mxu1  ;;  %v4070_v56 = vor.u32 %v4893_v48, %v4067_v49  ;;  %v4182_v49 = vor.u32 %v4921_v46, %v4179_v27  ;;  %v4977_v46 = vld [vmem:[#allocation13 + $0x44] sm:$0xf0] }
 0x195   :  { %2361 = vmatpush.bf16.msrb.mxu1 %v4018_v4  ;;  %2371 = vmatpush.bf16.msrb.mxu2 %v4210_v6  ;;  %v1408_v44 = vadd.f32 %v1407_v26, %v1394_v33  ;;  %v4211_v33 = vld [vmem:[#allocation11 + $0x2d8] sm:$0xf0] }
 0x196   :  { %v4214_v36 = vor.u32 %v4929_v32, %v4211_v33  ;;  %v4945_v32 = vld [vmem:[#allocation11 + $0x34c] sm:$0xf]  ;;  %v4275_v33 = vld [vmem:[#allocation11 + $0x358] sm:$0xf0] }
 0x198   :  { %2400 = vmatpush.bf16.msra.mxu0 %v3942_v7  ;;  %v4130_v7 = vor.u32 %v4911_v58, %v4129_v54  ;;  %v4947_v58 = vld [vmem:[#allocation11 + $0x354] sm:$0xf0] }
 0x199   :  { %2362 = vmatpush.bf16.msrb.mxu1 %v4002_v16  ;;  %2372 = vmatpush.bf16.msrb.mxu2 %v4194_v17  ;;  %v1395_v37 = vpop.f32.mrf.mxu0  ;;  %v4885_v16 = vld [vmem:[#allocation11 + $0x16c] sm:$0xf]  ;;  %v4035_v17 = vld [vmem:[#allocation11 + $0x178] sm:$0xf0] }
 0x19a   :  { %v1396_v21 = vadd.f32 %v1395_v37, %v571_v14  ;;  %v4967_v14 = vld [vmem:[#allocation11 + $0x3f4] sm:$0xf0]  ;;  %v4038_v26 = vor.u32 %v4885_v16, %v4035_v17  ;;  %v4242_v16 = vor.u32 %v4939_v10, %v4241_v9  ;;  %v4993_v9 = vld [vmem:[#allocation13 + $0xc4] sm:$0xf0]  ;;  %v4982_v10 = vld [vmem:[#allocation13 + $0x74] sm:$0xf] }
 0x19b   :  { %v4354_v24 = vor.u32 %v4967_v14, %v4353_v13  ;;  %v4959_v37 = vld [vmem:[#allocation11 + $0x3b4] sm:$0xf0]  ;;  %v4965_v13 = vld [vmem:[#allocation11 + $0x3ec] sm:$0xf]  ;;  %v4355_v14 = vld [vmem:[#allocation11 + $0x3f8] sm:$0xf0] }
 0x19c   :  { %2401 = vmatpush.bf16.msra.mxu0 %v3926_v18  ;;  %v1409_v51 = vpop.f32.mrf.mxu1  ;;  %v4933_v18 = vld [vmem:[#allocation11 + $0x2ec] sm:$0xf]  ;;  %v4358_v17 = vor.u32 %v4965_v13, %v4355_v14  ;;  %v4449_v14 = vld [vmem:[#allocation13 + $0xb0] sm:$0xf] }
 0x19d   :  { %2363 = vmatpush.bf16.msrb.mxu1 %v3986_v30  ;;  %2373 = vmatpush.bf16.msrb.mxu2 %v4178_v3  ;;  %v1410_v55 = vadd.f32 %v1409_v51, %v1396_v21  ;;  %v4230_v28 = vor.u32 %v4933_v18, %v4227_v19  ;;  %v4963_v30 = vld [vmem:[#allocation11 + $0x3d4] sm:$0xf0]  ;;  %v4881_v3 = vld [vmem:[#allocation11 + $0x14c] sm:$0xf]  ;;  %v4339_v19 = vld [vmem:[#allocation11 + $0x3d8] sm:$0xf0] }
 0x19e   :  { %v1421_v62 = vpop.f32.mrf.mxu2  ;;  %v4873_v21 = vld [vmem:[#allocation11 + $0x10c] sm:$0xf]  ;;  %v4951_v51 = vld [vmem:[#allocation11 + $0x374] sm:$0xf0] }
 0x19f   :  { %v1435_v40 = vpop.f32.mrf.mxu3  ;;  %v1422_v50 = vadd.f32 %v1421_v62, %v1408_v44  ;;  %v4877_v62 = vld [vmem:[#allocation11 + $0x12c] sm:$0xf]  ;;  %v4955_v44 = vld [vmem:[#allocation11 + $0x394] sm:$0xf0] }
 0x1a0   :  { %2402 = vmatpush.bf16.msra.mxu0 %v3910_v31  ;;  %2364 = vmatmul.bf16.vlgmr.msrb.gmra.mxu1 %v5440_v1  ;;  %v4019_v31 = vld [vmem:[#allocation11 + $0x158] sm:$0xf0]  ;;  %v4306_v47 = vor.u32 %v4955_v44, %v4305_v43  ;;  %v4961_v18 = vld [vmem:[#allocation11 + $0x3cc] sm:$0xf]  ;;  %v4401_v43 = vld [vmem:[#allocation13 + $0x50] sm:$0xf] }
 0x1a1   :  { %2412 = vmatpush.bf16.msra.mxu1 %v4102_v34  ;;  %2322 = vmatmul.bf16.vlgmr.msra.gmra.mxu2 %v5444_v61  ;;  %v1436_v4 = vadd.f32 %v1435_v40, %v1422_v50  ;;  %v4338_v34 = vor.u32 %v4963_v30, %v4337_v29  ;;  %v4022_v35 = vor.u32 %v4881_v3, %v4019_v31  ;;  %v4195_v40 = vld [vmem:[#allocation11 + $0x2b8] sm:$0xf0]  ;;  %v4289_v50 = vld [vmem:[#allocation11 + $0x368] sm:$0xf]  ;;  %v4949_v30 = vld [vmem:[#allocation11 + $0x36c] sm:$0xf] }
 0x1a2   :  { %2374 = vmatpush.bf16.msrb.mxu2 %v4162_v41  ;;  %v4322_v41 = vor.u32 %v4959_v37, %v4321_v57  ;;  %v4290_v54 = vor.u32 %v4951_v51, %v4289_v50  ;;  %v4291_v3 = vld [vmem:[#allocation11 + $0x378] sm:$0xf0]  ;;  %v4937_v37 = vld [vmem:[#allocation11 + $0x30c] sm:$0xf]  ;;  %v4979_v44 = vld [vmem:[#allocation13 + $0x54] sm:$0xf0] }
 0x1a3   :  { %v1443_v20 = vmax.f32 %v1436_v4, 0.0  ;;  %v4943_v4 = vld [vmem:[#allocation11 + $0x334] sm:$0xf0]  ;;  %v4294_v31 = vor.u32 %v4949_v30, %v4291_v3  ;;  %v5013_v30 = vld [vmem:[#allocation13 + $0x164] sm:$0xf0] }
 0x1a4   :  { %2403 = vmatpush.bf16.msra.mxu0 %v3894_v42  ;;  %v4198_v42 = vor.u32 %v4925_v39, %v4195_v40  ;;  %v4983_v39 = vld [vmem:[#allocation13 + $0x74] sm:$0xf0]  ;;  %v4978_v3 = vld [vmem:[#allocation13 + $0x54] sm:$0xf] }
 0x1a5   :  { %2413 = vmatpush.bf16.msra.mxu1 %v4086_v45  ;;  %v3987_v45 = vld [vmem:[#allocation11 + $0x118] sm:$0xf0]  ;;  %v4999_v50 = vld [vmem:[#allocation13 + $0xf4] sm:$0xf0] }
 0x1a6   :  { %v1423_v63 = vpop.f32.mrf.mxu2  ;;  %2375 = vmatpush.bf16.msrb.mxu2 %v4146_v52  ;;  %v3990_v48 = vor.u32 %v4873_v21, %v3987_v45  ;;  %v4917_v52 = vld [vmem:[#allocation11 + $0x26c] sm:$0xf]  ;;  %v4402_v21 = vor.u32 %v4979_v44, %v4401_v43  ;;  %v4393_v45 = vld [vmem:[#allocation13 + $0x40] sm:$0xf]  ;;  %v5009_v44 = vld [vmem:[#allocation13 + $0x144] sm:$0xf0] }
 0x1a7   :  { %v1424_v5 = vadd.f32 %v1423_v63, %v1410_v55  ;;  %v1437_v6 = vpop.f32.mrf.mxu3  ;;  %v4394_v27 = vor.u32 %v4977_v46, %v4393_v45  ;;  %v4387_v45 = vld [vmem:[#allocation13 + $0x38] sm:$0xf0] }
 0x1a8   :  { %2404 = vmatpush.bf16.msra.mxu0 %v3878_v53  ;;  %v4163_v53 = vld [vmem:[#allocation11 + $0x278] sm:$0xf0] }
 0x1a9   :  { %v1438_v11 = vadd.f32 %v1437_v6, %v1424_v5  ;;  %2414 = vmatpush.bf16.msra.mxu1 %v4070_v56  ;;  %v4166_v55 = vor.u32 %v4917_v52, %v4163_v53  ;;  %v4273_v56 = vld [vmem:[#allocation11 + $0x348] sm:$0xf]  ;;  %v4909_v5 = vld [vmem:[#allocation11 + $0x22c] sm:$0xf]  ;;  %v4131_v6 = vld [vmem:[#allocation11 + $0x238] sm:$0xf0] }
 0x1aa   :  { %2376 = vmatpush.bf16.msrb.mxu2 %v4130_v7  ;;  %v4274_v63 = vor.u32 %v4947_v58, %v4273_v56  ;;  %v4258_v7 = vor.u32 %v4943_v4, %v4257_v2  ;;  %v4377_v52 = vld [vmem:[#allocation13 + $0x20] sm:$0xf]  ;;  %v4973_v53 = vld [vmem:[#allocation13 + $0x24] sm:$0xf0]  ;;  %v4995_v2 = vld [vmem:[#allocation13 + $0xd4] sm:$0xf0] }
 0x1ab   :  { %v1447_v22 = vmax.f32 %v1438_v11, 0.0  ;;  %v4905_v11 = vld [vmem:[#allocation11 + $0x20c] sm:$0xf]  ;;  %v4997_v56 = vld [vmem:[#allocation13 + $0xe4] sm:$0xf0] }
 0x1ac   :  { %2405 = vmatpush.bf16.msra.mxu0 %v3862_v8  ;;  %v4134_v8 = vor.u32 %v4909_v5, %v4131_v6  ;;  %v4361_v5 = vld [vmem:[#allocation13] sm:$0xf]  ;;  %v4969_v6 = vld [vmem:[#allocation13 + $0x4] sm:$0xf0] }
 0x1ad   :  { %v5452_v25 = vpack.c.bf16 %v1447_v22, %v1443_v20  ;;  %2415 = vmatpush.bf16.msra.mxu1 %v4054_v12  ;;  %v4115_v12 = vld [vmem:[#allocation11 + $0x218] sm:$0xf0]  ;;  %v4342_v20 = vor.u32 %v4961_v18, %v4339_v19  ;;  %v4957_v22 = vld [vmem:[#allocation11 + $0x3ac] sm:$0xf]  ;;  %v5015_v18 = vld [vmem:[#allocation13 + $0x174] sm:$0xf0] }
 0x1ae   :  { %2377 = vmatpush.bf16.msrb.mxu2 %v4114_v23  ;;  %v4323_v23 = vld [vmem:[#allocation11 + $0x3b8] sm:$0xf0]  ;;  %v4980_v19 = vld [vmem:[#allocation13 + $0x64] sm:$0xf] }
 0x1af   :  { %2280 = vmatmul.bf16.vlgmr.msrb.gmra.mxu3 %v5452_v25  ;;  %2406 = vmatmul.bf16.vlgmr.msra.gmra.mxu0 %v5436_v15  ;;  %v4006_v15 = vor.u32 %v4877_v62, %v4003_v38  ;;  %v4417_v38 = vld [vmem:[#allocation13 + $0x70] sm:$0xf] }
 0x1b0   :  { %2384 = vmatpush.bf16.msrb.mxu3 %v4354_v24  ;;  %v4326_v24 = vor.u32 %v4957_v22, %v4323_v23  ;;  %v4418_v40 = vor.u32 %v4983_v39, %v4417_v38 }
 0x1b1   :  { %2416 = vmatpush.bf16.msra.mxu1 %v4038_v26  ;;  %2378 = vmatmul.bf16.vlgmr.msrb.gmra.mxu2 %v5444_v61  ;;  %v4953_v26 = vld [vmem:[#allocation11 + $0x38c] sm:$0xf] }
 0x1b2   :  { %2426 = vmatpush.bf16.msra.mxu2 %v4230_v28  ;;  %v4307_v28 = vld [vmem:[#allocation11 + $0x398] sm:$0xf0]  ;;  %2856 = vmatpush.bf16.msrb.mxu0 %v4418_v40  ;;  %v4425_v40 = vld [vmem:[#allocation13 + $0x80] sm:$0xf] }
 0x1b3   :  { %v4310_v29 = vor.u32 %v4953_v26, %v4307_v28  ;;  %v4989_v26 = vld [vmem:[#allocation13 + $0xa4] sm:$0xf0]  ;;  %v4537_v28 = vld [vmem:[#allocation13 + $0x160] sm:$0xf] }
 0x1b4   :  { %2385 = vmatpush.bf16.msrb.mxu3 %v4338_v34  ;;  %v4278_v34 = vor.u32 %v4945_v32, %v4275_v33  ;;  %v4538_v32 = vor.u32 %v5013_v30, %v4537_v28  ;;  %v5001_v28 = vld [vmem:[#allocation13 + $0x104] sm:$0xf0] }
 0x1b5   :  { %2417 = vmatpush.bf16.msra.mxu1 %v4022_v35  ;;  %v4941_v35 = vld [vmem:[#allocation11 + $0x32c] sm:$0xf] }
 0x1b6   :  { %2427 = vmatpush.bf16.msra.mxu2 %v4214_v36  ;;  %v4259_v36 = vld [vmem:[#allocation11 + $0x338] sm:$0xf0] }
 0x1b7   :  { %v4262_v57 = vor.u32 %v4941_v35, %v4259_v36  ;;  %v4987_v35 = vld [vmem:[#allocation13 + $0x94] sm:$0xf0]  ;;  %v4529_v36 = vld [vmem:[#allocation13 + $0x150] sm:$0xf] }
 0x1b8   :  { %2386 = vmatpush.bf16.msrb.mxu3 %v4322_v41  ;;  %v4409_v41 = vld [vmem:[#allocation13 + $0x60] sm:$0xf] }
 0x1b9   :  { %2418 = vmatpush.bf16.msra.mxu1 %v4006_v15  ;;  %v4981_v15 = vld [vmem:[#allocation13 + $0x64] sm:$0xf0] }
 0x1ba   :  { %2428 = vmatpush.bf16.msra.mxu2 %v4198_v42  ;;  %v4410_v42 = vor.u32 %v4981_v15, %v4409_v41  ;;  %v4985_v41 = vld [vmem:[#allocation13 + $0x84] sm:$0xf0]  ;;  %v4521_v15 = vld [vmem:[#allocation13 + $0x140] sm:$0xf] }
 0x1bb   :  { %v4426_v43 = vor.u32 %v4985_v41, %v4425_v40  ;;  %v4522_v46 = vor.u32 %v5009_v44, %v4521_v15  ;;  %v4988_v41 = vld [vmem:[#allocation13 + $0xa4] sm:$0xf]  ;;  %v4443_v15 = vld [vmem:[#allocation13 + $0xa8] sm:$0xf0] }
 0x1bc   :  { %2387 = vmatpush.bf16.msrb.mxu3 %v4306_v47  ;;  %2857 = vmatpush.bf16.msrb.mxu0 %v4410_v42  ;;  %v4385_v47 = vld [vmem:[#allocation13 + $0x30] sm:$0xf] }
 0x1bd   :  { %2419 = vmatpush.bf16.msra.mxu1 %v3990_v48  ;;  %v4975_v48 = vld [vmem:[#allocation13 + $0x34] sm:$0xf0] }
 0x1be   :  { %2429 = vmatpush.bf16.msra.mxu2 %v4182_v49  ;;  %v4481_v49 = vld [vmem:[#allocation13 + $0xf0] sm:$0xf] }
 0x1bf   :  { %2336 = vmatmul.bf16.vlgmr.msra.gmra.mxu3 %v5452_v25  ;;  %v4482_v51 = vor.u32 %v4999_v50, %v4481_v49 }
 0x1c0   :  { %2388 = vmatpush.bf16.msrb.mxu3 %v4290_v54  ;;  %2420 = vmatmul.bf16.vlgmr.msra.gmra.mxu1 %v5440_v1  ;;  %v4118_v1 = vor.u32 %v4905_v11, %v4115_v12  ;;  %v4473_v54 = vld [vmem:[#allocation13 + $0xe0] sm:$0xf]  ;;  %v4419_v11 = vld [vmem:[#allocation13 + $0x78] sm:$0xf0] }
 0x1c1   :  { %2858 = vmatpush.bf16.msrb.mxu0 %v4402_v21  ;;  %2870 = vmatpush.bf16.msrb.mxu1 %v4482_v51  ;;  %v4474_v58 = vor.u32 %v4997_v56, %v4473_v54  ;;  %v4422_v13 = vor.u32 %v4982_v10, %v4419_v11  ;;  %v4974_v21 = vld [vmem:[#allocation13 + $0x34] sm:$0xf]  ;;  %v5007_v51 = vld [vmem:[#allocation13 + $0x134] sm:$0xf0]  ;;  %v4972_v54 = vld [vmem:[#allocation13 + $0x24] sm:$0xf] }
 0x1c2   :  { %2430 = vmatpush.bf16.msra.mxu2 %v4166_v55  ;;  %v4378_v55 = vor.u32 %v4973_v53, %v4377_v52  ;;  %v4996_v56 = vld [vmem:[#allocation13 + $0xe4] sm:$0xf]  ;;  %v5471_v11 = vld [vmem:[%s5501_s6] sm:$0xf] }
 0x1c4   :  { %2389 = vmatpush.bf16.msrb.mxu3 %v4274_v63  ;;  %v4465_v63 = vld [vmem:[#allocation13 + $0xd0] sm:$0xf] }
 0x1c5   :  { %2859 = vmatpush.bf16.msrb.mxu0 %v4394_v27  ;;  %2871 = vmatpush.bf16.msrb.mxu1 %v4474_v58  ;;  %v4466_v4 = vor.u32 %v4995_v2, %v4465_v63  ;;  %v4390_v27 = vor.u32 %v4974_v21, %v4387_v45  ;;  %v4505_v63 = vld [vmem:[#allocation13 + $0x120] sm:$0xf]  ;;  %v4446_v45 = vor.u32 %v4988_v41, %v4443_v15 }
 0x1c6   :  { %2431 = vmatpush.bf16.msra.mxu2 %v4150_v0  ;;  %v4370_v0 = vor.u32 %v4971_v60, %v4369_v59  ;;  %v4475_v59 = vld [vmem:[#allocation13 + $0xe8] sm:$0xf0] }
 0x1c7   :  { %v4478_v60 = vor.u32 %v4996_v56, %v4475_v59  ;;  %v5010_v56 = vld [vmem:[#allocation13 + $0x154] sm:$0xf] }
 0x1c8   :  { %2390 = vmatpush.bf16.msrb.mxu3 %v4258_v7  ;;  %v4457_v7 = vld [vmem:[#allocation13 + $0xc0] sm:$0xf] }
 0x1c9   :  { %2872 = vmatpush.bf16.msrb.mxu1 %v4466_v4  ;;  %v4458_v12 = vor.u32 %v4993_v9, %v4457_v7  ;;  %v4970_v4 = vld [vmem:[#allocation13 + $0x14] sm:$0xf] }
 0x1ca   :  { %2432 = vmatpush.bf16.msra.mxu2 %v4134_v8  ;;  %v4362_v8 = vor.u32 %v4969_v6, %v4361_v5  ;;  %v4371_v5 = vld [vmem:[#allocation13 + $0x18] sm:$0xf0]  ;;  %v4994_v6 = vld [vmem:[#allocation13 + $0xd4] sm:$0xf] }
 0x1cb   :  { %v4374_v7 = vor.u32 %v4970_v4, %v4371_v5  ;;  %v4585_v4 = vld [vmem:[#allocation13 + $0x1c0] sm:$0xf]  ;;  %v5025_v5 = vld [vmem:[#allocation13 + $0x1c4] sm:$0xf0] }
 0x1cc   :  { %2391 = vmatpush.bf16.msrb.mxu3 %v4242_v16  ;;  %v4991_v16 = vld [vmem:[#allocation13 + $0xb4] sm:$0xf0] }
 0x1cd   :  { %2873 = vmatpush.bf16.msrb.mxu1 %v4458_v12  ;;  %v4497_v12 = vld [vmem:[#allocation13 + $0x110] sm:$0xf] }
 0x1ce   :  { %2433 = vmatpush.bf16.msra.mxu2 %v4118_v1  ;;  %v4545_v1 = vld [vmem:[#allocation13 + $0x170] sm:$0xf] }
 0x1cf   :  { %2392 = vmatmul.bf16.vlgmr.msrb.gmra.mxu3 %v5452_v25  ;;  %v4546_v22 = vor.u32 %v5015_v18, %v4545_v1  ;;  %v4968_v1 = vld [vmem:[#allocation13 + $0x4] sm:$0xf] }
 0x1d0   :  { %2440 = vmatpush.bf16.msra.mxu3 %v4358_v17  ;;  %v4450_v17 = vor.u32 %v4991_v16, %v4449_v14  ;;  %v4992_v18 = vld [vmem:[#allocation13 + $0xc4] sm:$0xf] }
 0x1d1   :  { %2434 = vmatmul.bf16.vlgmr.msra.gmra.mxu2 %v5444_v61  ;;  %v4243_v61 = vld [vmem:[#allocation11 + $0x318] sm:$0xf0] }
 0x1d2   :  { %v4246_v62 = vor.u32 %v4937_v37, %v4243_v61  ;;  %2874 = vmatpush.bf16.msrb.mxu1 %v4450_v17  ;;  %2884 = vmatpush.bf16.msrb.mxu2 %v4546_v22  ;;  %v5011_v37 = vld [vmem:[#allocation13 + $0x154] sm:$0xf0]  ;;  %v4976_v61 = vld [vmem:[#allocation13 + $0x44] sm:$0xf]  ;;  %v4363_v17 = vld [vmem:[#allocation13 + $0x8] sm:$0xf0] }
 0x1d3   :  { %v4530_v38 = vor.u32 %v5011_v37, %v4529_v36  ;;  %v1582_v22 = vperm.slane %v5471_v11, 0  ;;  %v4547_v36 = vld [vmem:[#allocation13 + $0x178] sm:$0xf0] }
 0x1d4   :  { %2441 = vmatpush.bf16.msra.mxu3 %v4342_v20  ;;  %v4411_v20 = vld [vmem:[#allocation13 + $0x68] sm:$0xf0] }
 0x1d5   :  { %v4414_v23 = vor.u32 %v4980_v19, %v4411_v20  ;;  %v4366_v19 = vor.u32 %v4968_v1, %v4363_v17  ;;  %v4459_v20 = vld [vmem:[#allocation13 + $0xc8] sm:$0xf0]  ;;  %v1583_v1 = vperm.slane %v5471_v11, 1 }
 0x1d6   :  { %2885 = vmatpush.bf16.msrb.mxu2 %v4538_v32  ;;  %v4451_v32 = vld [vmem:[#allocation13 + $0xb8] sm:$0xf0] }
 0x1d8   :  { %2442 = vmatpush.bf16.msra.mxu3 %v4326_v24  ;;  %v4441_v24 = vld [vmem:[#allocation13 + $0xa0] sm:$0xf] }
 0x1da   :  { %2886 = vmatpush.bf16.msrb.mxu2 %v4530_v38  ;;  %v5029_v38 = vld [vmem:[#allocation13 + $0x1e4] sm:$0xf0] }
 0x1dc   :  { %2443 = vmatpush.bf16.msra.mxu3 %v4310_v29  ;;  %v4442_v29 = vor.u32 %v4989_v26, %v4441_v24  ;;  %v4462_v24 = vor.u32 %v4992_v18, %v4459_v20  ;;  %v4489_v26 = vld [vmem:[#allocation13 + $0x100] sm:$0xf]  ;;  %v4577_v18 = vld [vmem:[#allocation13 + $0x1b0] sm:$0xf] }
 0x1dd   :  { %v4490_v30 = vor.u32 %v5001_v28, %v4489_v26  ;;  %v4569_v28 = vld [vmem:[#allocation13 + $0x1a0] sm:$0xf] }
 0x1de   :  { %2875 = vmatpush.bf16.msrb.mxu1 %v4442_v29  ;;  %2887 = vmatpush.bf16.msrb.mxu2 %v4522_v46  ;;  %v4609_v29 = vld [vmem:[#allocation13 + $0x1f0] sm:$0xf]  ;;  %v4539_v46 = vld [vmem:[#allocation13 + $0x168] sm:$0xf0] }
 0x1e0   :  { %2444 = vmatpush.bf16.msra.mxu3 %v4294_v31  ;;  %v4403_v31 = vld [vmem:[#allocation13 + $0x58] sm:$0xf0] }
 0x1e1   :  { %v4406_v33 = vor.u32 %v4978_v3, %v4403_v31  ;;  %v5031_v3 = vld [vmem:[#allocation13 + $0x1f4] sm:$0xf0]  ;;  %v4990_v31 = vld [vmem:[#allocation13 + $0xb4] sm:$0xf] }
 0x1e4   :  { %2445 = vmatpush.bf16.msra.mxu3 %v4278_v34  ;;  %v4433_v34 = vld [vmem:[#allocation13 + $0x90] sm:$0xf] }
 0x1e8   :  { %2446 = vmatpush.bf16.msra.mxu3 %v4262_v57  ;;  %v4434_v57 = vor.u32 %v4987_v35, %v4433_v34  ;;  %v4454_v34 = vor.u32 %v4990_v31, %v4451_v32  ;;  %v5014_v35 = vld [vmem:[#allocation13 + $0x174] sm:$0xf]  ;;  %v4507_v32 = vld [vmem:[#allocation13 + $0x128] sm:$0xf0] }
 0x1e9   :  { %v4550_v37 = vor.u32 %v5014_v35, %v4547_v36  ;;  %v4561_v36 = vld [vmem:[#allocation13 + $0x190] sm:$0xf] }
 0x1ea   :  { %2876 = vmatpush.bf16.msrb.mxu1 %v4434_v57 }
 0x1ec   :  { %2447 = vmatpush.bf16.msra.mxu3 %v4246_v62  ;;  %v4395_v62 = vld [vmem:[#allocation13 + $0x48] sm:$0xf0]  ;;  %v5462_v42 = vpop.f32.mrf.mxu0 }
 0x1ed   :  { %v4398_v39 = vor.u32 %v4976_v61, %v4395_v62  ;;  %v2240_v61 = vadd.f32 %v5462_v42, %v1582_v22  ;;  %v4601_v62 = vld [vmem:[#allocation13 + $0x1e0] sm:$0xf] }
 0x1ee   :  { %2877 = vmatpush.bf16.msrb.mxu1 %v4426_v43  ;;  %v4602_v40 = vor.u32 %v5029_v38, %v4601_v62  ;;  %v5012_v43 = vld [vmem:[#allocation13 + $0x164] sm:$0xf]  ;;  %v5002_v62 = vld [vmem:[#allocation13 + $0x114] sm:$0xf]  ;;  %v4499_v38 = vld [vmem:[#allocation13 + $0x118] sm:$0xf0] }
 0x1ef   :  { %2448 = vmatmul.bf16.vlgmr.msra.gmra.mxu3 %v5452_v25  ;;  %v4386_v25 = vor.u32 %v4975_v48, %v4385_v47  ;;  %v4998_v47 = vld [vmem:[#allocation13 + $0xf4] sm:$0xf]  ;;  %v4483_v48 = vld [vmem:[#allocation13 + $0xf8] sm:$0xf0]  ;;  %v4542_v42 = vor.u32 %v5012_v43, %v4539_v46 }
 0x1f0   :  { %v4486_v50 = vor.u32 %v4998_v47, %v4483_v48  ;;  %v5027_v48 = vld [vmem:[#allocation13 + $0x1d4] sm:$0xf0] }
 0x1f1   :  { %2860 = vmatpush.bf16.msrb.mxu0 %v4386_v25  ;;  %v4513_v25 = vld [vmem:[#allocation13 + $0x130] sm:$0xf] }
 0x1f2   :  { %2926 = vmatpush.bf16.msra.mxu1 %v4486_v50  ;;  %v4514_v53 = vor.u32 %v5007_v51, %v4513_v25 }
 0x1f4   :  { %2888 = vmatpush.bf16.msrb.mxu2 %v4514_v53  ;;  %v2241_v9 = vpop.f32.mrf.mxu0 }
 0x1f5   :  { %2861 = vmatpush.bf16.msrb.mxu0 %v4378_v55  ;;  %v4379_v55 = vld [vmem:[#allocation13 + $0x28] sm:$0xf0]  ;;  %v2242_v44 = vadd.f32 %v2241_v9, %v1582_v22 }
 0x1f6   :  { %v4382_v58 = vor.u32 %v4972_v54, %v4379_v55  ;;  %2927 = vmatpush.bf16.msra.mxu1 %v4478_v60  ;;  %v4986_v54 = vld [vmem:[#allocation13 + $0x94] sm:$0xf]  ;;  %v4435_v55 = vld [vmem:[#allocation13 + $0x98] sm:$0xf0] }
 0x1f7   :  { %v4531_v60 = vld [vmem:[#allocation13 + $0x158] sm:$0xf0] }
 0x1f9   :  { %2862 = vmatpush.bf16.msrb.mxu0 %v4370_v0  ;;  %v5005_v0 = vld [vmem:[#allocation13 + $0x124] sm:$0xf0] }
 0x1fa   :  { %v4506_v2 = vor.u32 %v5005_v0, %v4505_v63  ;;  %v4534_v0 = vor.u32 %v5010_v56, %v4531_v60 }
 0x1fc   :  { %v5464_v49 = vpop.f32.mrf.mxu1  ;;  %2889 = vmatpush.bf16.msrb.mxu2 %v4506_v2 }
 0x1fd   :  { %2863 = vmatpush.bf16.msrb.mxu0 %v4362_v8  ;;  %v4467_v8 = vld [vmem:[#allocation13 + $0xd8] sm:$0xf0]  ;;  %v2254_v21 = vadd.f32 %v5464_v49, %v2240_v61  ;;  %v4438_v49 = vor.u32 %v4986_v54, %v4435_v55  ;;  %v5030_v54 = vld [vmem:[#allocation13 + $0x1f4] sm:$0xf] }
 0x1fe   :  { %v4470_v10 = vor.u32 %v4994_v6, %v4467_v8  ;;  %v4984_v6 = vld [vmem:[#allocation13 + $0x84] sm:$0xf] }
 0x1ff   :  { %v5008_v8 = vld [vmem:[#allocation13 + $0x144] sm:$0xf] }
 0x200   :  { %2928 = vmatpush.bf16.msra.mxu1 %v4470_v10 }
 0x201   :  { %2912 = vmatpush.bf16.msra.mxu0 %v4422_v13  ;;  %v5003_v13 = vld [vmem:[#allocation13 + $0x114] sm:$0xf0] }
 0x202   :  { %v4498_v16 = vor.u32 %v5003_v13, %v4497_v12  ;;  %v4523_v13 = vld [vmem:[#allocation13 + $0x148] sm:$0xf0] }
 0x204   :  { %v2255_v14 = vpop.f32.mrf.mxu1  ;;  %2890 = vmatpush.bf16.msrb.mxu2 %v4498_v16  ;;  %2929 = vmatpush.bf16.msra.mxu1 %v4462_v24  ;;  %v4526_v16 = vor.u32 %v5008_v8, %v4523_v13  ;;  %v4515_v24 = vld [vmem:[#allocation13 + $0x138] sm:$0xf0] }
 0x205   :  { %2913 = vmatpush.bf16.msra.mxu0 %v4414_v23  ;;  %v2256_v50 = vadd.f32 %v2255_v14, %v2242_v44  ;;  %v4502_v44 = vor.u32 %v5002_v62, %v4499_v38  ;;  %v4595_v8 = vld [vmem:[#allocation13 + $0x1d8] sm:$0xf0] }
 0x208   :  { %2891 = vmatpush.bf16.msrb.mxu2 %v4490_v30  ;;  %2930 = vmatpush.bf16.msra.mxu1 %v4454_v34  ;;  %v5004_v30 = vld [vmem:[#allocation13 + $0x124] sm:$0xf] }
 0x209   :  { %2914 = vmatpush.bf16.msra.mxu0 %v4406_v33  ;;  %v4610_v33 = vor.u32 %v5031_v3, %v4609_v29  ;;  %v5021_v29 = vld [vmem:[#allocation13 + $0x1a4] sm:$0xf0]  ;;  %v4510_v35 = vor.u32 %v5004_v30, %v4507_v32 }
 0x20a   :  { %v4570_v34 = vor.u32 %v5021_v29, %v4569_v28 }
 0x20b   :  { %2898 = vmatpush.bf16.msrb.mxu3 %v4610_v33 }
 0x20c   :  { %2940 = vmatpush.bf16.msra.mxu2 %v4550_v37  ;;  %v2309_v47 = vpop.f32.mrf.mxu1  ;;  %2931 = vmatpush.bf16.msra.mxu1 %v4446_v45  ;;  %v5017_v45 = vld [vmem:[#allocation13 + $0x184] sm:$0xf0] }
 0x20d   :  { %2915 = vmatpush.bf16.msra.mxu0 %v4398_v39  ;;  %v5475_v39 = vpop.f32.mrf.mxu0 }
 0x20e   :  { %v2296_v33 = vadd.f32 %v5475_v39, %v1583_v1 }
 0x20f   :  { %2899 = vmatpush.bf16.msrb.mxu3 %v4602_v40 }
 0x210   :  { %2941 = vmatpush.bf16.msra.mxu2 %v4542_v42  ;;  %2932 = vmatpush.bf16.msra.mxu1 %v4438_v49  ;;  %v2310_v61 = vadd.f32 %v2309_v47, %v2296_v33  ;;  %v5000_v47 = vld [vmem:[#allocation13 + $0x104] sm:$0xf]  ;;  %v1584_v49 = vperm.slane %v5471_v11, 2 }
 0x211   :  { %2916 = vmatpush.bf16.msra.mxu0 %v4390_v27  ;;  %v4593_v27 = vld [vmem:[#allocation13 + $0x1d0] sm:$0xf] }
 0x212   :  { %v4594_v51 = vor.u32 %v5027_v48, %v4593_v27 }
 0x213   :  { %v5466_v52 = vpop.f32.mrf.mxu2 }
 0x214   :  { %v2268_v25 = vadd.f32 %v5466_v52, %v2254_v21  ;;  %2900 = vmatpush.bf16.msrb.mxu3 %v4594_v51  ;;  %2942 = vmatpush.bf16.msra.mxu2 %v4534_v0  ;;  %v4586_v52 = vor.u32 %v5025_v5, %v4585_v4  ;;  %v2311_v20 = vpop.f32.mrf.mxu1  ;;  %v4553_v21 = vld [vmem:[#allocation13 + $0x180] sm:$0xf]  ;;  %v4491_v51 = vld [vmem:[#allocation13 + $0x108] sm:$0xf0] }
 0x215   :  { %2917 = vmatpush.bf16.msra.mxu0 %v4382_v58  ;;  %v2297_v14 = vpop.f32.mrf.mxu0  ;;  %v4494_v56 = vor.u32 %v5000_v47, %v4491_v51  ;;  %v4603_v0 = vld [vmem:[#allocation13 + $0x1e8] sm:$0xf0] }
 0x216   :  { %v2298_v37 = vadd.f32 %v2297_v14, %v1583_v1  ;;  %v5024_v1 = vld [vmem:[#allocation13 + $0x1c4] sm:$0xf] }
 0x218   :  { %2901 = vmatpush.bf16.msrb.mxu3 %v4586_v52  ;;  %2943 = vmatpush.bf16.msra.mxu2 %v4526_v16  ;;  %v2312_v40 = vadd.f32 %v2311_v20, %v2298_v37  ;;  %v5016_v37 = vld [vmem:[#allocation13 + $0x184] sm:$0xf] }
 0x219   :  { %2918 = vmatpush.bf16.msra.mxu0 %v4374_v7  ;;  %v4427_v7 = vld [vmem:[#allocation13 + $0x88] sm:$0xf0] }
 0x21a   :  { %v4430_v12 = vor.u32 %v4984_v6, %v4427_v7  ;;  %v5026_v7 = vld [vmem:[#allocation13 + $0x1d4] sm:$0xf] }
 0x21b   :  { %v2269_v23 = vpop.f32.mrf.mxu2 }
 0x21c   :  { %v2270_v58 = vadd.f32 %v2269_v23, %v2256_v50  ;;  %2933 = vmatpush.bf16.msra.mxu1 %v4430_v12  ;;  %v5006_v23 = vld [vmem:[#allocation13 + $0x134] sm:$0xf]  ;;  %v4554_v50 = vor.u32 %v5017_v45, %v4553_v21  ;;  %v4598_v12 = vor.u32 %v5026_v7, %v4595_v8 }
 0x21d   :  { %2919 = vmatpush.bf16.msra.mxu0 %v4366_v19  ;;  %v5023_v19 = vld [vmem:[#allocation13 + $0x1b4] sm:$0xf0]  ;;  %v4518_v26 = vor.u32 %v5006_v23, %v4515_v24  ;;  %v2351_v43 = vpop.f32.mrf.mxu0  ;;  %v2365_v27 = vpop.f32.mrf.mxu1  ;;  %v5022_v24 = vld [vmem:[#allocation13 + $0x1b4] sm:$0xf] }
 0x21e   :  { %v4578_v22 = vor.u32 %v5023_v19, %v4577_v18  ;;  %v2352_v52 = vadd.f32 %v2351_v43, %v1584_v49  ;;  %v4587_v18 = vld [vmem:[#allocation13 + $0x1c8] sm:$0xf0]  ;;  %v5042_v7 = vld [vmem:[#allocation14 + $0x50] sm:$0xff] }
 0x21f   :  { %2944 = vmatpush.bf16.msra.mxu2 %v4518_v26  ;;  %v4579_v26 = vld [vmem:[#allocation13 + $0x1b8] sm:$0xf0] }
 0x220   :  { %2902 = vmatpush.bf16.msrb.mxu3 %v4578_v22  ;;  %v4582_v30 = vor.u32 %v5022_v24, %v4579_v26 }
 0x223   :  { %2945 = vmatpush.bf16.msra.mxu2 %v4510_v35  ;;  %v4563_v35 = vld [vmem:[#allocation13 + $0x198] sm:$0xf0] }
 0x224   :  { %v2323_v53 = vpop.f32.mrf.mxu2  ;;  %2903 = vmatpush.bf16.msrb.mxu3 %v4570_v34  ;;  %v5018_v34 = vld [vmem:[#allocation13 + $0x194] sm:$0xf] }
 0x225   :  { %v2324_v41 = vadd.f32 %v2323_v53, %v2310_v61  ;;  %v2353_v4 = vpop.f32.mrf.mxu0  ;;  %v2367_v6 = vpop.f32.mrf.mxu1  ;;  %v4555_v61 = vld [vmem:[#allocation13 + $0x188] sm:$0xf0] }
 0x226   :  { %v4558_v38 = vor.u32 %v5016_v37, %v4555_v61 }
 0x227   :  { %2946 = vmatpush.bf16.msra.mxu2 %v4502_v44 }
 0x22b   :  { %2947 = vmatpush.bf16.msra.mxu2 %v4494_v56  ;;  %v5037_v56 = vld [vmem:[#allocation14 + $0x28] sm:$0xff] }
 0x22c   :  { %v2325_v3 = vpop.f32.mrf.mxu2 }
 0x22d   :  { %v2326_v39 = vadd.f32 %v2325_v3, %v2312_v40  ;;  %v5020_v3 = vld [vmem:[#allocation13 + $0x1a4] sm:$0xf] }
 0x232   :  { %v2281_v57 = vpop.f32.mrf.mxu3 }
 0x233   :  { %v2282_v59 = vadd.f32 %v2281_v57, %v2268_v25  ;;  %v5019_v57 = vld [vmem:[#allocation13 + $0x194] sm:$0xf0] }
 0x234   :  { %v4562_v15 = vor.u32 %v5019_v57, %v4561_v36  ;;  %v2379_v25 = vpop.f32.mrf.mxu2  ;;  %v4566_v36 = vor.u32 %v5018_v34, %v4563_v35  ;;  %v2407_v57 = vpop.f32.mrf.mxu0 }
 0x235   :  { %v2454_v9 = vmax.f32 %v2282_v59, 0.0 }
 0x236   :  { %2904 = vmatpush.bf16.msrb.mxu3 %v4562_v15 }
 0x23a   :  { %v2283_v63 = vpop.f32.mrf.mxu3  ;;  %2905 = vmatpush.bf16.msrb.mxu3 %v4554_v50 }
 0x23b   :  { %v2284_v2 = vadd.f32 %v2283_v63, %v2270_v58  ;;  %v4611_v58 = vld [vmem:[#allocation13 + $0x1f8] sm:$0xf0]  ;;  %v5028_v63 = vld [vmem:[#allocation13 + $0x1e4] sm:$0xf] }
 0x23c   :  { %v4614_v59 = vor.u32 %v5030_v54, %v4611_v58  ;;  %v2381_v13 = vpop.f32.mrf.mxu2  ;;  %v2409_v15 = vpop.f32.mrf.mxu0  ;;  %v5036_v58 = vld [vmem:[#allocation14 + $0x20] sm:$0xff] }
 0x23d   :  { %v2458_v10 = vmax.f32 %v2284_v2, 0.0  ;;  %v4606_v2 = vor.u32 %v5028_v63, %v4603_v0  ;;  %v2421_v62 = vpop.f32.mrf.mxu1  ;;  %v5046_v63 = vld [vmem:[#allocation14 + $0x70] sm:$0xff]  ;;  %v5033_v0 = vld [vmem:[#allocation14 + $0x8] sm:$0xff] }
 0x23e   :  { %2954 = vmatpush.bf16.msra.mxu3 %v4614_v59  ;;  %v5035_v59 = vld [vmem:[#allocation14 + $0x18] sm:$0xff] }
 0x23f   :  { %v2462_v17 = vpack.c.bf16 %v2458_v10, %v2454_v9  ;;  %v2354_v9 = vadd.f32 %v2353_v4, %v1584_v49  ;;  %v2366_v10 = vadd.f32 %v2365_v27, %v2352_v52  ;;  %v5047_v49 = vld [vmem:[#allocation14 + $0x78] sm:$0xff]  ;;  %v5032_v4 = vld [vmem:[#allocation14] sm:$0xff] }
 0x240   :  { %v5043_v52 = vld [vmem:[#allocation14 + $0x58] sm:$0xff] }
 0x241   :  { %2864 = vmatmul.bf16.vlgmr.msrb.gmra.mxu0 %v2462_v17  ;;  %v2368_v14 = vadd.f32 %v2367_v6, %v2354_v9  ;;  %v2380_v16 = vadd.f32 %v2379_v25, %v2366_v10  ;;  %v5041_v10 = vld [vmem:[#allocation14 + $0x48] sm:$0xff] }
 0x242   :  { %v2337_v31 = vpop.f32.mrf.mxu3  ;;  %2955 = vmatpush.bf16.msra.mxu3 %v4606_v2  ;;  %v5045_v2 = vld [vmem:[#allocation14 + $0x68] sm:$0xff] }
 0x243   :  { %v2338_v46 = vadd.f32 %v2337_v31, %v2324_v41  ;;  %v2382_v19 = vadd.f32 %v2381_v13, %v2368_v14  ;;  %v4571_v31 = vld [vmem:[#allocation13 + $0x1a8] sm:$0xf0]  ;;  %v1585_v41 = vperm.slane %v5471_v11, 3  ;;  %v5039_v11 = vld [vmem:[#allocation14 + $0x38] sm:$0xff]  ;;  %v5040_v13 = vld [vmem:[#allocation14 + $0x40] sm:$0xff] }
 0x244   :  { %v4574_v33 = vor.u32 %v5020_v3, %v4571_v31  ;;  %3106 = vmatpush.bf16.msrb.mxu0 %v5039_v11 }
 0x245   :  { %v2455_v53 = vmax.f32 %v2338_v46, 0.0  ;;  %v2408_v44 = vadd.f32 %v2407_v57, %v1585_v41  ;;  %v2423_v21 = vpop.f32.mrf.mxu1  ;;  %v2410_v45 = vadd.f32 %v2409_v15, %v1585_v41 }
 0x246   :  { %2956 = vmatpush.bf16.msra.mxu3 %v4598_v12  ;;  %v2530_v12 = vld [vmem:[%s5503_s8] sm:$0x3] }
 0x247   :  { %v2424_v27 = vadd.f32 %v2423_v21, %v2410_v45  ;;  %v2533_v35 = vperm.slane %v2530_v12, 1 }
 0x24a   :  { %v2339_v42 = vpop.f32.mrf.mxu3 }
 0x24b   :  { %v2340_v48 = vadd.f32 %v2339_v42, %v2326_v39  ;;  %v2422_v39 = vadd.f32 %v2421_v62, %v2408_v44 }
 0x24d   :  { %v2459_v55 = vmax.f32 %v2340_v48, 0.0 }
 0x24f   :  { %v2463_v60 = vpack.c.bf16 %v2459_v55, %v2455_v53  ;;  %v5038_v55 = vld [vmem:[#allocation14 + $0x30] sm:$0xff] }
 0x250   :  { %3107 = vmatpush.bf16.msrb.mxu0 %v5038_v55 }
 0x251   :  { %2878 = vmatmul.bf16.vlgmr.msrb.gmra.mxu1 %v2463_v60  ;;  %2920 = vmatmul.bf16.vlgmr.msra.gmra.mxu0 %v2462_v17  ;;  %v4590_v17 = vor.u32 %v5024_v1, %v4587_v18 }
 0x252   :  { %v2393_v5 = vpop.f32.mrf.mxu3  ;;  %3120 = vmatpush.bf16.msrb.mxu1 %v5047_v49 }
 0x253   :  { %v2394_v20 = vadd.f32 %v2393_v5, %v2380_v16  ;;  %2957 = vmatpush.bf16.msra.mxu3 %v4590_v17  ;;  %v5044_v5 = vld [vmem:[#allocation14 + $0x60] sm:$0xff]  ;;  %v2532_v16 = vperm.slane %v2530_v12, 0 }
 0x254   :  { %v2435_v40 = vpop.f32.mrf.mxu2  ;;  %3108 = vmatpush.bf16.msrb.mxu0 %v5037_v56 }
 0x255   :  { %v2456_v28 = vmax.f32 %v2394_v20, 0.0  ;;  %v2436_v42 = vadd.f32 %v2435_v40, %v2422_v39 }
 0x256   :  { %3121 = vmatpush.bf16.msrb.mxu1 %v5046_v63 }
 0x257   :  { %2958 = vmatpush.bf16.msra.mxu3 %v4582_v30 }
 0x258   :  { %3109 = vmatpush.bf16.msrb.mxu0 %v5036_v58 }
 0x25a   :  { %v2395_v22 = vpop.f32.mrf.mxu3  ;;  %3122 = vmatpush.bf16.msrb.mxu1 %v5045_v2 }
 0x25b   :  { %v2396_v23 = vadd.f32 %v2395_v22, %v2382_v19  ;;  %2959 = vmatpush.bf16.msra.mxu3 %v4574_v33 }
 0x25c   :  { %v2437_v46 = vpop.f32.mrf.mxu2  ;;  %3110 = vmatpush.bf16.msrb.mxu0 %v5035_v59 }
 0x25d   :  { %v2460_v29 = vmax.f32 %v2396_v23, 0.0  ;;  %v2438_v48 = vadd.f32 %v2437_v46, %v2424_v27 }
 0x25e   :  { %3123 = vmatpush.bf16.msrb.mxu1 %v5044_v5 }
 0x25f   :  { %v2464_v32 = vpack.c.bf16 %v2460_v29, %v2456_v28  ;;  %2960 = vmatpush.bf16.msra.mxu3 %v4566_v36 }
 0x261   :  { %2892 = vmatmul.bf16.vlgmr.msrb.gmra.mxu2 %v2464_v32  ;;  %2934 = vmatmul.bf16.vlgmr.msra.gmra.mxu1 %v2463_v60  ;;  %v5034_v60 = vld [vmem:[#allocation14 + $0x10] sm:$0xff] }
 0x262   :  { %3111 = vmatpush.bf16.msrb.mxu0 %v5034_v60  ;;  %3124 = vmatpush.bf16.msrb.mxu1 %v5043_v52 }
 0x263   :  { %2961 = vmatpush.bf16.msra.mxu3 %v4558_v38 }
 0x266   :  { %3112 = vmatpush.bf16.msrb.mxu0 %v5033_v0  ;;  %3125 = vmatpush.bf16.msrb.mxu1 %v5042_v7 }
 0x26a   :  { %3113 = vmatpush.bf16.msrb.mxu0 %v5032_v4  ;;  %3126 = vmatpush.bf16.msrb.mxu1 %v5041_v10 }
 0x26e   :  { %3127 = vmatpush.bf16.msrb.mxu1 %v5040_v13 }
 0x271   :  { %2948 = vmatmul.bf16.vlgmr.msra.gmra.mxu2 %v2464_v32 }
 0x272   :  { %v2449_v43 = vpop.f32.mrf.mxu3 }
 0x273   :  { %v2450_v50 = vadd.f32 %v2449_v43, %v2436_v42 }
 0x275   :  { %v2457_v51 = vmax.f32 %v2450_v50, 0.0  ;;  %v5063_v50 = vld [vmem:[%s5505_s10] ss:$0 sm:$0xff]  ;;  %s5314_s10 = smov [#allocation16]  }
 0x276   :  { %s3184_s19 = sshll.u32 %s5314_s10, 4  ;;  %s3185_s19 = int_to_ptr.vmem [resolvable:$true] %s3184_s19 }
 0x27a   :  { %v2451_v25 = vpop.f32.mrf.mxu3 }
 0x27b   :  { %v2452_v47 = vadd.f32 %v2451_v25, %v2438_v48 }
 0x27d   :  { %v2461_v54 = vmax.f32 %v2452_v47, 0.0 }
 0x27f   :  { %v2465_v53 = vpack.c.bf16 %v2461_v54, %v2457_v51 }
 0x281   :  { %2906 = vmatmul.bf16.vlgmr.msrb.gmra.mxu3 %v2465_v53 }
 0x291   :  { %2962 = vmatmul.bf16.vlgmr.msra.gmra.mxu3 %v2465_v53 }
 0x2be   :  { %v2865_v6 = vpop.f32.mrf.mxu0 }
 0x2bf   :  { %v2866_v20 = vadd.f32 %v2865_v6, %v2532_v16 }
 0x2c6   :  { %v2867_v14 = vpop.f32.mrf.mxu0 }
 0x2c7   :  { %v2868_v17 = vadd.f32 %v2867_v14, %v2532_v16 }
 0x2ce   :  { %v2879_v8 = vpop.f32.mrf.mxu1  ;;  %v2921_v26 = vpop.f32.mrf.mxu0 }
 0x2cf   :  { %v2880_v22 = vadd.f32 %v2879_v8, %v2866_v20  ;;  %v2922_v61 = vadd.f32 %v2921_v26, %v2533_v35 }
 0x2d6   :  { %v2881_v1 = vpop.f32.mrf.mxu1  ;;  %v2923_v57 = vpop.f32.mrf.mxu0 }
 0x2d7   :  { %v2882_v23 = vadd.f32 %v2881_v1, %v2868_v17  ;;  %v2924_v38 = vadd.f32 %v2923_v57, %v2533_v35 }
 0x2de   :  { %v2935_v30 = vpop.f32.mrf.mxu1 }
 0x2df   :  { %v2936_v40 = vadd.f32 %v2935_v30, %v2922_v61 }
 0x2e4   :  { %v2893_v9 = vpop.f32.mrf.mxu2 }
 0x2e5   :  { %v2894_v24 = vadd.f32 %v2893_v9, %v2880_v22 }
 0x2e6   :  { %v2937_v62 = vpop.f32.mrf.mxu1 }
 0x2e7   :  { %v2938_v15 = vadd.f32 %v2937_v62, %v2924_v38 }
 0x2ec   :  { %v2895_v18 = vpop.f32.mrf.mxu2 }
 0x2ed   :  { %v2896_v28 = vadd.f32 %v2895_v18, %v2882_v23 }
 0x2f4   :  { %v2949_v32 = vpop.f32.mrf.mxu2 }
 0x2f5   :  { %v2950_v43 = vadd.f32 %v2949_v32, %v2936_v40 }
 0x2fc   :  { %v2951_v41 = vpop.f32.mrf.mxu2 }
 0x2fd   :  { %v2952_v44 = vadd.f32 %v2951_v41, %v2938_v15 }
 0x304   :  { %v2907_v19 = vpop.f32.mrf.mxu3 }
 0x305   :  { %v2908_v29 = vadd.f32 %v2907_v19, %v2894_v24 }
 0x307   :  { %v2968_v33 = vmax.f32 %v2908_v29, 0.0 }
 0x30c   :  { %v2909_v3 = vpop.f32.mrf.mxu3 }
 0x30d   :  { %v2910_v31 = vadd.f32 %v2909_v3, %v2896_v28 }
 0x30f   :  { %v2970_v34 = vmax.f32 %v2910_v31, 0.0 }
 0x311   :  { %v2972_v36 = vpack.c.bf16 %v2970_v34, %v2968_v33 }
 0x313   :  { %3114 = vmatmul.bf16.vlgmr.msrb.gmra.mxu0 %v2972_v36 }
 0x314   :  { %v2963_v37 = vpop.f32.mrf.mxu3 }
 0x315   :  { %v2964_v21 = vadd.f32 %v2963_v37, %v2950_v43 }
 0x317   :  { %v2969_v46 = vmax.f32 %v2964_v21, 0.0 }
 0x31c   :  { %v2965_v45 = vpop.f32.mrf.mxu3 }
 0x31d   :  { %v2966_v39 = vadd.f32 %v2965_v45, %v2952_v44 }
 0x31f   :  { %v2971_v27 = vmax.f32 %v2966_v39, 0.0 }
 0x321   :  { %v2973_v42 = vpack.c.bf16 %v2971_v27, %v2969_v46 }
 0x323   :  { %3128 = vmatmul.bf16.vlgmr.msrb.gmra.mxu1 %v2973_v42 }
 0x390   :  { %v3115_v48 = vpop.f32.mrf.mxu0 }
 0x391   :  { %v3116_v25 = vadd.f32 %v5063_v50, %v3115_v48 }
 0x398   :  { %v3117_v54 = vpop.f32.mrf.mxu0 }
 0x399   :  { %v3118_v53 = vadd.f32 %v5063_v50, %v3117_v54 }
 0x3a0   :  { %v3129_v47 = vpop.f32.mrf.mxu1 }
 0x3a1   :  { %v3130_v51 = vadd.f32 %v3129_v47, %v3116_v25 }
 0x3a3   :  { %3134 = vmax.xlane.f32.xlu0 %v3130_v51 }
 0x3a8   :  { %v3131_v11 = vpop.f32.mrf.mxu1 }
 0x3a9   :  { %v3132_v55 = vadd.f32 %v3131_v11, %v3118_v53 }
 0x3ab   :  { %3136 = vmax.xlane.f32.xlu0 %v3132_v55 }
 0x416   :  { %v3135_v56 = vpop.xlane.xlu0 %3134 }
 0x417   :  { %v3138_v58 = vsub.f32 %v3130_v51, %v3135_v56 }
 0x419   :  { %v3140_v59 = vmul.f32 1.442695, %v3138_v58 }
 0x41b   :  { %5064 = vpow2.f32 %v3140_v59 }
 0x41e   :  { %v3137_v49 = vpop.xlane.xlu0 %3136 }
 0x41f   :  { %v3139_v60 = vsub.f32 %v3132_v55, %v3137_v49 }
 0x421   :  { %v5065_v63 = vpop.eup %5064  ;;  %v3142_v0 = vmul.f32 1.442695, %v3139_v60 }
 0x422   :  { %3144 = vadd.xlane.f32.xlu1 %v5065_v63 }
 0x423   :  { %5066 = vpow2.f32 %v3142_v0 }
 0x429   :  { %v5067_v2 = vpop.eup %5066 }
 0x42a   :  { %3146 = vadd.xlane.f32.xlu1 %v5067_v2 }
 0x495   :  { %v3145_v4 = vpop.xlane.xlu1 %3144 }
 0x496   :  { %5068 = vrcp.f32 %v3145_v4  ;;  %v3159_v8 = vand.u32 2147483648, %v3145_v4  ;;  %v3157_v10 = vand.u32 2147483647, %v3145_v4  ;;  %vm3153_vm1 = vweird.f32 %v3145_v4 }
 0x498   :  { %v3160_v14 = vor.u32 1.1754944e-38, %v3159_v8  ;;  %vm3158_vm3 = vcmp.eq.f32.partialorder %v3157_v10, 8.507059e+37 }
 0x49c   :  { %v5069_v5 = vpop.eup %5068 }
 0x49d   :  { %v3149_v52 = vmul.f32 %v5069_v5, %v3145_v4  ;;  %v3147_v6 = vpop.xlane.xlu1 %3146  ;;  %vm3154_vm0 = vweird.f32 %v5069_v5 }
 0x49e   :  { %5070 = vrcp.f32 %v3147_v6  ;;  %vm3155_vm2 = vmor %vm3153_vm1, %vm3154_vm0  ;;  %v3174_v17 = vand.u32 2147483648, %v3147_v6  ;;  %v3172_v23 = vand.u32 2147483647, %v3147_v6  ;;  %vm3168_vm5 = vweird.f32 %v3147_v6 }
 0x49f   :  { %v3150_v7 = vsub.f32 1.0, %v3149_v52 }
 0x4a0   :  { %v3175_v26 = vor.u32 1.1754944e-38, %v3174_v17  ;;  %vm3173_vm7 = vcmp.eq.f32.partialorder %v3172_v23, 8.507059e+37 }
 0x4a1   :  { %v3151_v9 = vmul.f32 %v5069_v5, %v3150_v7 }
 0x4a3   :  { %v3152_v12 = vadd.f32 %v5069_v5, %v3151_v9 }
 0x4a4   :  { %v5071_v13 = vpop.eup %5070 }
 0x4a5   :  { %v3164_v16 = vmul.f32 %v5071_v13, %v3147_v6  ;;  %v3156_v1 = vsel %vm3155_vm2, %v5069_v5, %v3152_v12  ;;  %vm3169_vm4 = vweird.f32 %v5071_v13 }
 0x4a6   :  { %v3161_v18 = vsel %vm3158_vm3, %v3160_v14, %v3156_v1  ;;  %vm3170_vm6 = vmor %vm3168_vm5, %vm3169_vm4 }
 0x4a7   :  { %v3165_v19 = vsub.f32 1.0, %v3164_v16  ;;  %v3162_v20 = vmul.f32 %v5065_v63, %v3161_v18 }
 0x4a9   :  { %v3166_v22 = vmul.f32 %v5071_v13, %v3165_v19  ;;  %3178 = vst [vmem:[#allocation16] sm:$0xff] %v3162_v20 }
 0x4ab   :  { %v3167_v24 = vadd.f32 %v5071_v13, %v3166_v22 }
 0x4ad   :  { %v3171_v28 = vsel %vm3170_vm6, %v5071_v13, %v3167_v24 }
 0x4ae   :  { %v3176_v29 = vsel %vm3173_vm7, %v3175_v26, %v3171_v28 }
 0x4af   :  { %v3177_v30 = vmul.f32 %v5067_v2, %v3176_v29 }
 0x4b1   :  { %3179 = vst [vmem:[#allocation16 + $0x8] sm:$0xff] %v3177_v30 }
 0x4b2   :  { %3192 = dma.vmem_to_hbm [thread:$0]  %s3185_s19, 256, %s3187_s21, [#allocation4], %s5311_s15, %s5311_s15, %s5312_s4  }
 0x4b3   :  { %5298 = dma.done.wait [#allocation4], 256  }
 0x4b4   :  { %5299 = vsyncadd [#allocation4], 4294967040 }
 0x4b5   :  { %3197 = vsyncpa [#allocation3], 1 }
 0x4b6   :  { %3198 = vsyncpa [#allocation6], 1 }
 0x4b7   :  { %3199 = vsyncpa [#allocation9], 1 }
 0x4b8   :  { %3200 = vsyncpa [#allocation12], 1 }
 0x4b9   :  { %3201 = vsyncpa [#allocation15], 1 }
 0x4ba   :  { %3202 = vsyncpa [#allocation4], 1 }

</bundles_post_ra>
